<compile_context>
chip_gen: v5e
topology: v5e:2x2
jax: 0.10.0
libtpu: 0.0.40
codegen_flags: <defaults>
</compile_context>

<pallas_src>
import math
from functools import partial

import jax
import jax.numpy as jnp
from jax.experimental import pallas as pl
from jax.experimental.pallas import tpu as pltpu


# ----------------------------- wrapper-side glue helpers -----------------------------

def _conv1x1(x, w, b):
    """x: (B, C_in, H, W), w: (C_out, C_in), b: (C_out,) -> (B, C_out, H, W)."""
    y = jnp.einsum("bchw,oc->bohw", x, w, precision=jax.lax.Precision.HIGHEST)
    return y + b[None, :, None, None]


def _maxpool2x2(x):
    """(B, C, H, W) -> (B, C, H//2, W//2), kernel 2x2 / stride 2 (nn.MaxPool2d((2,2)))."""
    B, C, H, W = x.shape
    return x.reshape(B, C, H // 2, 2, W // 2, 2).max(axis=(3, 5))


# ------------------------------------ Pallas kernel -----------------------------------

def spatial_similarity_kernel(q_ref, s_cls_ref, s_val_ref,
                              wq_ref, bq_ref, wc_ref, bc_ref,
                              bn_scale_ref, bn_shift_ref,
                              combined_ref, classifier_ref, filtered_ref,
                              *, inter, inv_sqrt_inter, ln_eps):
    # q_ref:        (1, C, HWq)      query, channel-major (free reshape of NCHW)
    # s_cls_ref:    (1, inter, HWsp) support classifier features (conv + pool, wrapper glue)
    # s_val_ref:    (1, inter, HWsp) support value features      (conv + pool, wrapper glue)
    # wq_ref:       (C, inter)       query classifier conv weight (pre-transposed)
    # bq_ref:       (1, inter)
    # wc_ref:       (inter, C)       combined conv weight (pre-transposed)
    # bc_ref:       (1, C)
    # bn_scale_ref: (1, C)           eval-mode BatchNorm folded:  gamma / sqrt(var + eps)
    # bn_shift_ref: (1, C)                                         beta - mean * scale
    q_cm = q_ref[0]                               # (C, HWq)
    q_hwc = q_cm.T                                # (HWq, C)  -- XLU transpose

    # query 1x1 classifier conv
    qc = jnp.dot(q_hwc, wq_ref[...],
                 preferred_element_type=jnp.float32) + bq_ref[...]      # (HWq, inter)

    # scaled spatial similarity + softmax over support positions
    logits = jnp.dot(qc, s_cls_ref[0],
                     preferred_element_type=jnp.float32) * inv_sqrt_inter  # (HWq, HWsp)
    m = jnp.max(logits, axis=-1, keepdims=True)
    e = jnp.exp(logits - m)
    denom = jnp.sum(e, axis=-1, keepdims=True)
    classifier = e / denom
    classifier_ref[0] = classifier.astype(classifier_ref.dtype)

    # attention-weighted support values
    sf = jnp.dot(classifier, s_val_ref[0].T,
                 preferred_element_type=jnp.float32)                     # (HWq, inter)

    # LayerNorm over the inter dim (torch: unbiased std, eps added to std)
    mean = jnp.sum(sf, axis=-1, keepdims=True) * (1.0 / inter)
    cen = sf - mean
    var = jnp.sum(cen * cen, axis=-1, keepdims=True) * (1.0 / (inter - 1))
    ln = cen / (jnp.sqrt(var) + ln_eps)

    # relu -> combined 1x1 conv -> folded eval-mode BatchNorm
    h = jnp.maximum(ln, 0.0)
    proj = jnp.dot(h, wc_ref[...],
                   preferred_element_type=jnp.float32) + bc_ref[...]     # (HWq, C)
    sf_out = proj * bn_scale_ref[...] + bn_shift_ref[...]                # (HWq, C)

    combined = sf_out + q_hwc                                            # residual add

    # lane-dense (last dim = HWq) channel-major stores
    filtered_ref[0] = sf_out.T.astype(filtered_ref.dtype)                # (C, HWq)
    combined_ref[0] = combined.T.astype(combined_ref.dtype)              # (C, HWq)


# -------------------------------------- wrapper ----------------------------------------

def spatial_similarity_forward(query, support, params, *, sub_sample=True):
    """query, support: (B, C, H, W). Returns (support_query_combined, classifier, support_filtered)."""
    B, C, H, W = query.shape
    inter = params["wq_cls"].shape[0]
    assert inter > 1, "LayerNorm over a single channel is degenerate (torch would NaN)"
    HWq = H * W

    # Support-side 1x1 convs (+ 2x2 maxpool): cheap pointwise glue kept in XLA.
    # TODO(synk): move support conv + maxpool into the Pallas kernel if spatial size scales.
    s_cls = _conv1x1(support, params["ws_cls"], params["bs_cls"])
    s_val = _conv1x1(support, params["ws_val"], params["bs_val"])
    if sub_sample:
        s_cls = _maxpool2x2(s_cls)
        s_val = _maxpool2x2(s_val)
    HWsp = s_cls.shape[2] * s_cls.shape[3]
    s_cls = s_cls.reshape(B, inter, HWsp)
    s_val = s_val.reshape(B, inter, HWsp)

    q_cm = query.reshape(B, C, HWq)                     # free reshape, no relayout

    # Fold eval-mode BatchNorm2d into a per-channel scale/shift.
    bn_scale = params["bn_gamma"] / jnp.sqrt(params["bn_var"] + 1e-5)
    bn_shift = params["bn_beta"] - params["bn_mean"] * bn_scale

    wq_t = params["wq_cls"].T                           # (C, inter)
    wc_t = params["wc"].T                               # (inter, C)

    flops = int(2 * B * HWq * (C * inter + inter * HWsp + HWsp * inter + inter * C)
                + 8 * B * HWq * HWsp)
    transcendentals = int(B * HWq * (HWsp + 1))
    bytes_accessed = int(4 * (q_cm.size + s_cls.size + s_val.size
                              + wq_t.size + wc_t.size + inter + 3 * C
                              + 2 * B * C * HWq + B * HWq * HWsp))

    kernel = partial(spatial_similarity_kernel,
                     inter=inter,
                     inv_sqrt_inter=float(1.0 / math.sqrt(inter)),
                     ln_eps=1e-6)

    combined_cm, classifier, filtered_cm = pl.pallas_call(
        kernel,
        grid=(B,),
        in_specs=[
            pl.BlockSpec((1, C, HWq), lambda b: (b, 0, 0)),
            pl.BlockSpec((1, inter, HWsp), lambda b: (b, 0, 0)),
            pl.BlockSpec((1, inter, HWsp), lambda b: (b, 0, 0)),
            pl.BlockSpec((C, inter), lambda b: (0, 0)),
            pl.BlockSpec((1, inter), lambda b: (0, 0)),
            pl.BlockSpec((inter, C), lambda b: (0, 0)),
            pl.BlockSpec((1, C), lambda b: (0, 0)),
            pl.BlockSpec((1, C), lambda b: (0, 0)),
            pl.BlockSpec((1, C), lambda b: (0, 0)),
        ],
        out_specs=(
            pl.BlockSpec((1, C, HWq), lambda b: (b, 0, 0)),
            pl.BlockSpec((1, HWq, HWsp), lambda b: (b, 0, 0)),
            pl.BlockSpec((1, C, HWq), lambda b: (b, 0, 0)),
        ),
        out_shape=(
            jax.ShapeDtypeStruct((B, C, HWq), query.dtype),
            jax.ShapeDtypeStruct((B, HWq, HWsp), query.dtype),
            jax.ShapeDtypeStruct((B, C, HWq), query.dtype),
        ),
        compiler_params=pltpu.CompilerParams(dimension_semantics=("parallel",)),
        cost_estimate=pl.CostEstimate(flops=flops, transcendentals=transcendentals,
                                      bytes_accessed=bytes_accessed),
    )(q_cm, s_cls, s_val,
      wq_t, params["bq_cls"].reshape(1, inter),
      wc_t, params["bc"].reshape(1, C),
      bn_scale.reshape(1, C), bn_shift.reshape(1, C))

    support_query_combined = combined_cm.reshape(B, C, H, W)
    support_filtered = filtered_cm.reshape(B, C, H, W)
    return support_query_combined, classifier, support_filtered


# ---------------------------------- pure-JAX reference ----------------------------------

def _reference(query, support, params):
    B, C, H, W = query.shape
    inter = params["wq_cls"].shape[0]
    P = jax.lax.Precision.HIGHEST

    qtc = _conv1x1(query, params["wq_cls"], params["bq_cls"]).reshape(B, inter, -1)
    qtc = jnp.transpose(qtc, (0, 2, 1))                                   # (B, HWq, inter)
    stc = _maxpool2x2(_conv1x1(support, params["ws_cls"], params["bs_cls"]))
    stc = stc.reshape(B, inter, -1)                                       # (B, inter, HWsp)
    cls = jnp.matmul(qtc, stc, precision=P) / math.sqrt(inter)
    cls = jax.nn.softmax(cls, axis=-1)

    st = _maxpool2x2(_conv1x1(support, params["ws_val"], params["bs_val"]))
    st = jnp.transpose(st.reshape(B, inter, -1), (0, 2, 1))               # (B, HWsp, inter)
    sf = jnp.matmul(cls, st, precision=P)                                 # (B, HWq, inter)

    mean = sf.mean(-1, keepdims=True)
    std = jnp.sqrt(jnp.sum((sf - mean) ** 2, axis=-1, keepdims=True) / (inter - 1))
    sf = (sf - mean) / (std + 1e-6)

    sf = jnp.transpose(sf, (0, 2, 1)).reshape(B, inter, H, W)
    sf = _conv1x1(jax.nn.relu(sf), params["wc"], params["bc"])
    sf = ((sf - params["bn_mean"][None, :, None, None])
          / jnp.sqrt(params["bn_var"][None, :, None, None] + 1e-5)
          * params["bn_gamma"][None, :, None, None]
          + params["bn_beta"][None, :, None, None])
    out = sf + query
    return out, cls, sf


# ---------------------------------------- test -----------------------------------------

if __name__ == "__main__":
    B, C_IN, H, W = 2, 8, 16, 16
    INTER = C_IN // 2                       # inter_channels = in_channels // 2 = 4

    key = jax.random.PRNGKey(0)
    ks = jax.random.split(key, 14)

    query = jax.random.normal(ks[0], (B, C_IN, H, W), jnp.float32)
    support = jax.random.normal(ks[1], (B, C_IN, H, W), jnp.float32)

    bd_in = 1.0 / math.sqrt(C_IN)
    bd_it = 1.0 / math.sqrt(INTER)
    params = {
        "wq_cls": jax.random.uniform(ks[2], (INTER, C_IN), jnp.float32, -bd_in, bd_in),
        "bq_cls": jax.random.uniform(ks[3], (INTER,), jnp.float32, -bd_in, bd_in),
        "ws_cls": jax.random.uniform(ks[4], (INTER, C_IN), jnp.float32, -bd_in, bd_in),
        "bs_cls": jax.random.uniform(ks[5], (INTER,), jnp.float32, -bd_in, bd_in),
        "ws_val": jax.random.uniform(ks[6], (INTER, C_IN), jnp.float32, -bd_in, bd_in),
        "bs_val": jax.random.uniform(ks[7], (INTER,), jnp.float32, -bd_in, bd_in),
        # module inits the combined conv to zero; use random weights here so the test
        # actually exercises the conv + BN + residual path.
        "wc": jax.random.uniform(ks[8], (C_IN, INTER), jnp.float32, -bd_it, bd_it),
        "bc": jax.random.uniform(ks[9], (C_IN,), jnp.float32, -bd_it, bd_it),
        "bn_gamma": jax.random.uniform(ks[10], (C_IN,), jnp.float32, 0.5, 1.5),
        "bn_beta": 0.1 * jax.random.normal(ks[11], (C_IN,), jnp.float32),
        "bn_mean": 0.1 * jax.random.normal(ks[12], (C_IN,), jnp.float32),
        "bn_var": jax.random.uniform(ks[13], (C_IN,), jnp.float32, 0.5, 1.5),
    }

    combined, classifier, filtered = jax.block_until_ready(
        spatial_similarity_forward(query, support, params))

    ref_combined, ref_cls, ref_filtered = _reference(query, support, params)

    assert combined.shape == (B, C_IN, H, W)
    assert filtered.shape == (B, C_IN, H, W)
    assert classifier.shape == (B, H * W, (H // 2) * (W // 2))

    for got, ref, name in [(combined, ref_combined, "support_query_combined"),
                           (classifier, ref_cls, "classifier"),
                           (filtered, ref_filtered, "support_filtered")]:
        assert jnp.allclose(got, ref, atol=1e-3, rtol=1e-3), f"mismatch vs reference: {name}"

    print("KERNEL_OK")
</pallas_src>

<mosaic_0001>
module attributes {stable_mosaic.version = 11 : i64} {
  func.func @spatial_similarity_kernel(%arg0: i32, %arg1: memref<1x8x256xf32, #tpu.memory_space<vmem>>, %arg2: memref<1x4x64xf32, #tpu.memory_space<vmem>>, %arg3: memref<1x4x64xf32, #tpu.memory_space<vmem>>, %arg4: memref<8x4xf32, #tpu.memory_space<vmem>>, %arg5: memref<1x4xf32, #tpu.memory_space<vmem>>, %arg6: memref<4x8xf32, #tpu.memory_space<vmem>>, %arg7: memref<1x8xf32, #tpu.memory_space<vmem>>, %arg8: memref<1x8xf32, #tpu.memory_space<vmem>>, %arg9: memref<1x8xf32, #tpu.memory_space<vmem>>, %arg10: memref<1x8x256xf32, #tpu.memory_space<vmem>>, %arg11: memref<1x256x64xf32, #tpu.memory_space<vmem>>, %arg12: memref<1x8x256xf32, #tpu.memory_space<vmem>>) attributes {dimension_semantics = [#tpu.dimension_semantics<parallel>], iteration_bounds = array<i64: 2>, scalar_prefetch = 0 : i64, scratch_operands = 0 : i64, tpu.core_type = #tpu.core_type<tc>, window_params = [{transform_indices = @transform_0, window_bounds = array<i64: 1, 8, 256>}, {transform_indices = @transform_1, window_bounds = array<i64: 1, 4, 64>}, {transform_indices = @transform_2, window_bounds = array<i64: 1, 4, 64>}, {pipeline_mode = #tpu.pipeline_mode<synchronous>, transform_indices = @transform_3, window_bounds = array<i64: 8, 4>}, {pipeline_mode = #tpu.pipeline_mode<synchronous>, transform_indices = @transform_4, window_bounds = array<i64: 1, 4>}, {pipeline_mode = #tpu.pipeline_mode<synchronous>, transform_indices = @transform_5, window_bounds = array<i64: 4, 8>}, {pipeline_mode = #tpu.pipeline_mode<synchronous>, transform_indices = @transform_6, window_bounds = array<i64: 1, 8>}, {pipeline_mode = #tpu.pipeline_mode<synchronous>, transform_indices = @transform_7, window_bounds = array<i64: 1, 8>}, {pipeline_mode = #tpu.pipeline_mode<synchronous>, transform_indices = @transform_8, window_bounds = array<i64: 1, 8>}, {transform_indices = @transform_9, window_bounds = array<i64: 1, 8, 256>}, {transform_indices = @transform_10, window_bounds = array<i64: 1, 256, 64>}, {transform_indices = @transform_11, window_bounds = array<i64: 1, 8, 256>}]} {
    %c0 = arith.constant 0 : index
    %c0_0 = arith.constant 0 : index
    %c0_1 = arith.constant 0 : index
    %0 = vector.load %arg1[%c0, %c0_0, %c0_1] : memref<1x8x256xf32, #tpu.memory_space<vmem>>, vector<1x8x256xf32>
    %1 = vector.shape_cast %0 : vector<1x8x256xf32> to vector<8x256xf32>
    %2 = tpu.transpose %1, [1, 0] : vector<8x256xf32> -> vector<256x8xf32>
    %c0_2 = arith.constant 0 : index
    %c0_3 = arith.constant 0 : index
    %3 = vector.load %arg4[%c0_2, %c0_3] : memref<8x4xf32, #tpu.memory_space<vmem>>, vector<8x4xf32>
    %cst = arith.constant dense<0.000000e+00> : vector<256x4xf32>
    %4 = tpu.matmul %2, %3, %cst {dimension_numbers = #tpu.dot_dimension_numbers<[1], [0], [0], [1], [0, 0, 1, 1], [], []>} : vector<256x8xf32>, vector<8x4xf32>, vector<256x4xf32> -> vector<256x4xf32>
    %c0_4 = arith.constant 0 : index
    %c0_5 = arith.constant 0 : index
    %5 = vector.load %arg5[%c0_4, %c0_5] : memref<1x4xf32, #tpu.memory_space<vmem>>, vector<1x4xf32>
    %6 = vector.broadcast %5 : vector<1x4xf32> to vector<256x4xf32>
    %7 = arith.addf %4, %6 : vector<256x4xf32>
    %c0_6 = arith.constant 0 : index
    %c0_7 = arith.constant 0 : index
    %c0_8 = arith.constant 0 : index
    %8 = vector.load %arg2[%c0_6, %c0_7, %c0_8] : memref<1x4x64xf32, #tpu.memory_space<vmem>>, vector<1x4x64xf32>
    %9 = vector.shape_cast %8 : vector<1x4x64xf32> to vector<4x64xf32>
    %cst_9 = arith.constant dense<0.000000e+00> : vector<256x64xf32>
    %10 = tpu.matmul %7, %9, %cst_9 {dimension_numbers = #tpu.dot_dimension_numbers<[1], [0], [0], [1], [0, 0, 1, 1], [], []>} : vector<256x4xf32>, vector<4x64xf32>, vector<256x64xf32> -> vector<256x64xf32>
    %cst_10 = arith.constant 5.000000e-01 : f32
    %11 = vector.broadcast %cst_10 : f32 to vector<256x64xf32>
    %12 = arith.mulf %10, %11 : vector<256x64xf32>
    %cst_11 = arith.constant dense<0xFF800000> : vector<256xf32>
    %13 = vector.multi_reduction <maximumf>, %12, %cst_11 [1] : vector<256x64xf32> to vector<256xf32>
    %14 = vector.shape_cast %13 : vector<256xf32> to vector<256x1xf32>
    %15 = vector.broadcast %14 : vector<256x1xf32> to vector<256x64xf32>
    %16 = arith.subf %12, %15 : vector<256x64xf32>
    %17 = math.exp %16 : vector<256x64xf32>
    %cst_12 = arith.constant dense<0.000000e+00> : vector<256xf32>
    %18 = vector.multi_reduction <add>, %17, %cst_12 [1] : vector<256x64xf32> to vector<256xf32>
    %19 = vector.shape_cast %18 : vector<256xf32> to vector<256x1xf32>
    %20 = vector.broadcast %19 : vector<256x1xf32> to vector<256x64xf32>
    %21 = arith.divf %17, %20 : vector<256x64xf32>
    %c0_13 = arith.constant 0 : index
    %c0_14 = arith.constant 0 : index
    %c0_15 = arith.constant 0 : index
    %22 = vector.load %arg11[%c0_13, %c0_14, %c0_15] : memref<1x256x64xf32, #tpu.memory_space<vmem>>, vector<1x256x64xf32>
    %23 = vector.shape_cast %22 : vector<1x256x64xf32> to vector<256x64xf32>
    %24 = vector.shape_cast %21 : vector<256x64xf32> to vector<1x256x64xf32>
    tpu.vector_store %arg11[%c0_13, %c0_14, %c0_15], %24 {strides = array<i32>} : memref<1x256x64xf32, #tpu.memory_space<vmem>>, vector<1x256x64xf32>,
    %c0_16 = arith.constant 0 : index
    %c0_17 = arith.constant 0 : index
    %c0_18 = arith.constant 0 : index
    %25 = vector.load %arg3[%c0_16, %c0_17, %c0_18] : memref<1x4x64xf32, #tpu.memory_space<vmem>>, vector<1x4x64xf32>
    %26 = vector.shape_cast %25 : vector<1x4x64xf32> to vector<4x64xf32>
    %27 = tpu.transpose %26, [1, 0] : vector<4x64xf32> -> vector<64x4xf32>
    %cst_19 = arith.constant dense<0.000000e+00> : vector<256x4xf32>
    %28 = tpu.matmul %21, %27, %cst_19 {dimension_numbers = #tpu.dot_dimension_numbers<[1], [0], [0], [1], [0, 0, 1, 1], [], []>} : vector<256x64xf32>, vector<64x4xf32>, vector<256x4xf32> -> vector<256x4xf32>
    %cst_20 = arith.constant dense<0.000000e+00> : vector<256xf32>
    %29 = vector.multi_reduction <add>, %28, %cst_20 [1] : vector<256x4xf32> to vector<256xf32>
    %30 = vector.shape_cast %29 : vector<256xf32> to vector<256x1xf32>
    %cst_21 = arith.constant 2.500000e-01 : f32
    %31 = vector.broadcast %cst_21 : f32 to vector<256x1xf32>
    %32 = arith.mulf %30, %31 : vector<256x1xf32>
    %33 = vector.broadcast %32 : vector<256x1xf32> to vector<256x4xf32>
    %34 = arith.subf %28, %33 : vector<256x4xf32>
    %35 = arith.mulf %34, %34 : vector<256x4xf32>
    %cst_22 = arith.constant dense<0.000000e+00> : vector<256xf32>
    %36 = vector.multi_reduction <add>, %35, %cst_22 [1] : vector<256x4xf32> to vector<256xf32>
    %37 = vector.shape_cast %36 : vector<256xf32> to vector<256x1xf32>
    %cst_23 = arith.constant 0.333333343 : f32
    %38 = vector.broadcast %cst_23 : f32 to vector<256x1xf32>
    %39 = arith.mulf %37, %38 : vector<256x1xf32>
    %40 = math.sqrt %39 : vector<256x1xf32>
    %cst_24 = arith.constant 9.99999997E-7 : f32
    %41 = vector.broadcast %cst_24 : f32 to vector<256x1xf32>
    %42 = arith.addf %40, %41 : vector<256x1xf32>
    %43 = vector.broadcast %42 : vector<256x1xf32> to vector<256x4xf32>
    %44 = arith.divf %34, %43 : vector<256x4xf32>
    %cst_25 = arith.constant 0.000000e+00 : f32
    %45 = vector.broadcast %cst_25 : f32 to vector<256x4xf32>
    %46 = arith.maximumf %44, %45 : vector<256x4xf32>
    %c0_26 = arith.constant 0 : index
    %c0_27 = arith.constant 0 : index
    %47 = vector.load %arg6[%c0_26, %c0_27] : memref<4x8xf32, #tpu.memory_space<vmem>>, vector<4x8xf32>
    %cst_28 = arith.constant dense<0.000000e+00> : vector<256x8xf32>
    %48 = tpu.matmul %46, %47, %cst_28 {dimension_numbers = #tpu.dot_dimension_numbers<[1], [0], [0], [1], [0, 0, 1, 1], [], []>} : vector<256x4xf32>, vector<4x8xf32>, vector<256x8xf32> -> vector<256x8xf32>
    %c0_29 = arith.constant 0 : index
    %c0_30 = arith.constant 0 : index
    %49 = vector.load %arg7[%c0_29, %c0_30] : memref<1x8xf32, #tpu.memory_space<vmem>>, vector<1x8xf32>
    %50 = vector.broadcast %49 : vector<1x8xf32> to vector<256x8xf32>
    %51 = arith.addf %48, %50 : vector<256x8xf32>
    %c0_31 = arith.constant 0 : index
    %c0_32 = arith.constant 0 : index
    %52 = vector.load %arg8[%c0_31, %c0_32] : memref<1x8xf32, #tpu.memory_space<vmem>>, vector<1x8xf32>
    %53 = vector.broadcast %52 : vector<1x8xf32> to vector<256x8xf32>
    %54 = arith.mulf %51, %53 : vector<256x8xf32>
    %c0_33 = arith.constant 0 : index
    %c0_34 = arith.constant 0 : index
    %55 = vector.load %arg9[%c0_33, %c0_34] : memref<1x8xf32, #tpu.memory_space<vmem>>, vector<1x8xf32>
    %56 = vector.broadcast %55 : vector<1x8xf32> to vector<256x8xf32>
    %57 = arith.addf %54, %56 : vector<256x8xf32>
    %58 = arith.addf %57, %2 : vector<256x8xf32>
    %59 = tpu.transpose %57, [1, 0] : vector<256x8xf32> -> vector<8x256xf32>
    %c0_35 = arith.constant 0 : index
    %c0_36 = arith.constant 0 : index
    %c0_37 = arith.constant 0 : index
    %60 = vector.load %arg12[%c0_35, %c0_36, %c0_37] : memref<1x8x256xf32, #tpu.memory_space<vmem>>, vector<1x8x256xf32>
    %61 = vector.shape_cast %60 : vector<1x8x256xf32> to vector<8x256xf32>
    %62 = vector.shape_cast %59 : vector<8x256xf32> to vector<1x8x256xf32>
    tpu.vector_store %arg12[%c0_35, %c0_36, %c0_37], %62 {strides = array<i32>} : memref<1x8x256xf32, #tpu.memory_space<vmem>>, vector<1x8x256xf32>,
    %63 = tpu.transpose %58, [1, 0] : vector<256x8xf32> -> vector<8x256xf32>
    %c0_38 = arith.constant 0 : index
    %c0_39 = arith.constant 0 : index
    %c0_40 = arith.constant 0 : index
    %64 = vector.load %arg10[%c0_38, %c0_39, %c0_40] : memref<1x8x256xf32, #tpu.memory_space<vmem>>, vector<1x8x256xf32>
    %65 = vector.shape_cast %64 : vector<1x8x256xf32> to vector<8x256xf32>
    %66 = vector.shape_cast %63 : vector<8x256xf32> to vector<1x8x256xf32>
    tpu.vector_store %arg10[%c0_38, %c0_39, %c0_40], %66 {strides = array<i32>} : memref<1x8x256xf32, #tpu.memory_space<vmem>>, vector<1x8x256xf32>,
    return
  }
  func.func @transform_0(%arg0: i32) -> (i32, i32, i32) {
    %c0_i32 = arith.constant 0 : i32
    %c0_i32_0 = arith.constant 0 : i32
    %c0_i32_1 = arith.constant 0 : i32
    return %arg0, %c0_i32, %c0_i32_0 : i32, i32, i32
  }
  func.func @transform_1(%arg0: i32) -> (i32, i32, i32) {
    %c0_i32 = arith.constant 0 : i32
    %c0_i32_0 = arith.constant 0 : i32
    %c0_i32_1 = arith.constant 0 : i32
    return %arg0, %c0_i32, %c0_i32_0 : i32, i32, i32
  }
  func.func @transform_2(%arg0: i32) -> (i32, i32, i32) {
    %c0_i32 = arith.constant 0 : i32
    %c0_i32_0 = arith.constant 0 : i32
    %c0_i32_1 = arith.constant 0 : i32
    return %arg0, %c0_i32, %c0_i32_0 : i32, i32, i32
  }
  func.func @transform_3(%arg0: i32) -> (i32, i32) {
    %c0_i32 = arith.constant 0 : i32
    %c0_i32_0 = arith.constant 0 : i32
    %c0_i32_1 = arith.constant 0 : i32
    return %c0_i32, %c0_i32_0 : i32, i32
  }
  func.func @transform_4(%arg0: i32) -> (i32, i32) {
    %c0_i32 = arith.constant 0 : i32
    %c0_i32_0 = arith.constant 0 : i32
    %c0_i32_1 = arith.constant 0 : i32
    return %c0_i32, %c0_i32_0 : i32, i32
  }
  func.func @transform_5(%arg0: i32) -> (i32, i32) {
    %c0_i32 = arith.constant 0 : i32
    %c0_i32_0 = arith.constant 0 : i32
    %c0_i32_1 = arith.constant 0 : i32
    return %c0_i32, %c0_i32_0 : i32, i32
  }
  func.func @transform_6(%arg0: i32) -> (i32, i32) {
    %c0_i32 = arith.constant 0 : i32
    %c0_i32_0 = arith.constant 0 : i32
    %c0_i32_1 = arith.constant 0 : i32
    return %c0_i32, %c0_i32_0 : i32, i32
  }
  func.func @transform_7(%arg0: i32) -> (i32, i32) {
    %c0_i32 = arith.constant 0 : i32
    %c0_i32_0 = arith.constant 0 : i32
    %c0_i32_1 = arith.constant 0 : i32
    return %c0_i32, %c0_i32_0 : i32, i32
  }
  func.func @transform_8(%arg0: i32) -> (i32, i32) {
    %c0_i32 = arith.constant 0 : i32
    %c0_i32_0 = arith.constant 0 : i32
    %c0_i32_1 = arith.constant 0 : i32
    return %c0_i32, %c0_i32_0 : i32, i32
  }
  func.func @transform_9(%arg0: i32) -> (i32, i32, i32) {
    %c0_i32 = arith.constant 0 : i32
    %c0_i32_0 = arith.constant 0 : i32
    %c0_i32_1 = arith.constant 0 : i32
    return %arg0, %c0_i32, %c0_i32_0 : i32, i32, i32
  }
  func.func @transform_10(%arg0: i32) -> (i32, i32, i32) {
    %c0_i32 = arith.constant 0 : i32
    %c0_i32_0 = arith.constant 0 : i32
    %c0_i32_1 = arith.constant 0 : i32
    return %arg0, %c0_i32, %c0_i32_0 : i32, i32, i32
  }
  func.func @transform_11(%arg0: i32) -> (i32, i32, i32) {
    %c0_i32 = arith.constant 0 : i32
    %c0_i32_0 = arith.constant 0 : i32
    %c0_i32_1 = arith.constant 0 : i32
    return %arg0, %c0_i32, %c0_i32_0 : i32, i32, i32
  }
}

</mosaic_0001>

<bundles_post_ra>
// kernel: tpu_custom_call.1
= control target key start
LH: loop header
LB: loop body
LE: loop exit
PB: predicated region body
PF: predicated region fallthrough
CT: control target
= control target key end

     0   :  { %s6586_s0 = inlined_call_operand.hbm [shape: f32[2,8,256], index: 0, kind: input, shape index: {}]   ;;  %s6587_s1 = inlined_call_operand.vmem [shape: f32[2,4,64], index: 1, kind: input, shape index: {}]   ;;  %s6588_s2 = inlined_call_operand.hbm [shape: f32[2,4,64], index: 2, kind: input, shape index: {}]   ;;  %s6589_s3 = inlined_call_operand.vmem [shape: f32[8,4], index: 3, kind: input, shape index: {}]   ;;  %s6590_s4 = inlined_call_operand.vmem [shape: f32[1,4], index: 4, kind: input, shape index: {}]   ;;  %s6591_s5 = inlined_call_operand.vmem [shape: f32[4,8], index: 5, kind: input, shape index: {}]   ;;  %s6592_s6 = inlined_call_operand.vmem [shape: f32[1,8], index: 6, kind: input, shape index: {}]   ;;  %s6593_s7 = inlined_call_operand.vmem [shape: f32[1,8], index: 7, kind: input, shape index: {}]   ;;  %s6594_s8 = inlined_call_operand.vmem [shape: f32[1,8], index: 8, kind: input, shape index: {}]   ;;  %s6595_s9 = inlined_call_operand.hbm [shape: f32[2,8,256], index: 9, kind: output, shape index: {0}]   ;;  %s6596_s10 = inlined_call_operand.vmem [shape: f32[2,256,64], index: 10, kind: output, shape index: {1}]   ;;  %s6597_s11 = inlined_call_operand.hbm [shape: f32[2,8,256], index: 11, kind: output, shape index: {2}]  }
   0x1   :  { %6628 = sst [smem:[#allocation43_spill]] %s6586_s0 }
   0x2   :  { %17 = vsyncpa [#allocation3], 0 }
   0x3   :  { %19 = vsyncpa [#allocation3 + $0x1], 0 }
   0x4   :  { %20 = vsyncpa [#allocation6], 0 }
   0x5   :  { %22 = vsyncpa [#allocation6 + $0x1], 0 }
   0x6   :  { %23 = vsyncpa [#allocation4], 0 }
   0x7   :  { %25 = vsyncpa [#allocation4 + $0x1], 0 }
   0x8   :  { %26 = vsyncpa [#allocation9], 0 }
   0x9   :  { %28 = vsyncpa [#allocation9 + $0x1], 0  ;;  %s4635_s17 = smov 0   ;;  %s4637_s18 = smov 0  }
   0xa   :  { %s4639_s19 = smov 0   ;;  %s4641_s20 = smov 0  }
   0xb LB: > { %6629 = sst [smem:[#allocation14_spill]] %s4561_s17  ;;  %s4656_s21 = sadd.s32 4294967295, %s4573_s20   ;;  %s4573_s20 = sphi %s4641_s20, %s6698_s20   ;;  %s4569_s19 = sphi %s4639_s19, %s6700_s19   ;;  %s4565_s18 = sphi %s4637_s18, %s6702_s18   ;;  %s4561_s17 = sphi %s4635_s17, %s6701_s17  }
   0xc   : > { %6630 = sst [smem:[#allocation15_spill]] %s4569_s19  ;;  %s3935_s22 = sadd.s32 4294967294, %s4573_s20  }
   0xd   : > { %6631 = sst [smem:[#allocation16_spill]] %s4573_s20  ;;  %s4660_s23 = sadd.s32 1, %s4573_s20  }
   0xe   : > { %6632 = sst [smem:[#allocation17_spill]] %s4660_s23  ;;  %s41_s24 = sadd.s32 1, %s4569_s19 }
   0xf   : > { %s38_s25 = ssub.s32 %s4573_s20, %s4660_s23  ;;  %p48_p0 = scmp.ne.s32.totalorder %s4569_s19, %s4565_s18 }
  0x10   : > { %p39_p1 = scmp.eq.s32.totalorder %s38_s25, 0  ;;  %p49_p2 = scmp.eq.s32.totalorder %s4573_s20, 0 }
  0x11   : > { %p54_p3 = scmp.ne.s32.totalorder %s4565_s18, %s4561_s17  ;;  %p55_p4 = scmp.eq.s32.totalorder %s4656_s21, 0 }
  0x12   : > { %s4672_s26 = scalar_select %p39_p1, %s4569_s19, %s41_s24  }
  0x13   : > { %p4674_p5 = por %p49_p2, %p48_p0  ;;  %p4678_p6 = por %p55_p4, %p54_p3 }
  0x14   : > { %6633 = sst [smem:[#allocation18_spill]] %s4672_s26  ;;  %p256_p7 = scmp.eq.s32.totalorder %s4656_s21, 1 }
  0x15   : > { %p262_p8 = scmp.eq.s32.totalorder %s3935_s22, 1  ;;  %p4116_p10 = scmp.lt.s32.totalorder %s4573_s20, 2 }
  0x16   : > { %p4685_p11 = por %p256_p7, %p48_p0  ;;  %s4694_s12 = sand.u32 1, %s4569_s19  }
  0x17   : > { %p4689_p12 = por %p262_p8, %p54_p3  ;;  %s4090_s13 = sshll.u32 %s4573_s20, 4 }
  0x18   : > { %s6636_s29 = scalar_select %p4685_p11, 1, 0 }
  0x19   : > { %s6638_s30 = scalar_select %p4689_p12, 1, 0 }
  0x1a   : > { %6637 = sst [smem:[#allocation19_spill]] %s6636_s29  ;;  %s3938_s14 = sshll.u32 %s4694_s12, 4 }
  0x1b   : > { %6639 = sst [smem:[#allocation20_spill]] %s6638_s30  ;;  %s356_s25 = scalar_lea.vmem [#allocation2], %s3938_s14 }
  0x1c   : > { %s6640_s0 = sld [smem:[#allocation43_spill]]  ;;  %s365_s26 = sshll.u32 %s356_s25, 4  ;;  %s366_s26 = int_to_ptr.vmem [resolvable:$true] %s365_s26 }
  0x1d   : > { %p4703_p13 = pnand %p4116_p10, %p4674_p5  ;;  %p3943_p0 = scmp.ge.s32.totalorder %s4573_s20, 1 }
  0x1e   : > { %p396_p1 = scmp.lt.s32.totalorder %s4573_s20, 3  ;;  %s3941_s19 = sshll.u32 %s4694_s12, 2 }
  0x1f   : > { %s353_s30 = scalar_lea.sflag [#allocation3], %s4694_s12  ;;  %p4415_p3 = pneg %p4703_p13 }
  0x22   : > { %s361_s22 = scalar_lea.hbm %s6640_s0, %s4090_s13  ;;  %s4418_s14 = scalar_lea.hbm %s6640_s0, 32 }
  0x23   : > { %s363_s24 = sshll.u32 %s361_s22, 4  ;;  %s364_s24 = int_to_ptr.hbm [resolvable:$true] %s363_s24 }
  0x24   : > { %s4411_s17 = sshra.s32 %s364_s24, 4  ;;  %s4412_s17 = int_to_ptr.hbm [resolvable:$true] %s4411_s17 }
  0x25   : > { %s4413_s15 = scalar_lea.hbm %s4412_s17, 16  ;;  %p4419_p5 = scmp.lt.s32.totalorder %s4412_s17, %s6640_s0 }
  0x26   : > { %p4414_p2 = scmp.ne.s32.totalorder %s4412_s17, %s4413_s15  ;;  %p4420_p8 = scmp.lt.s32.totalorder %s4418_s14, %s4413_s15 }
  0x28   : > { %p4416_p4 = pnand %p4415_p3, %p4414_p2  ;;  %p4421_p10 = por %p4420_p8, %p4419_p5 }
  0x2a   : > { %p4417_p7 = pneg %p4416_p4 }
  0x2c   : > { %p4422_p9 = pnand %p4421_p10, %p4417_p7 }
  0x2e   : > { %4425 = shalt.err (!%p4422_p9)
}
  0x2f   : > { %4105 = dma.hbm_to_vmem [thread:$0]  (!%p4703_p13), %s364_s24, 256, %s366_s26, %s353_s30  }
  0x30   : > { %p4728_p2 = pnand %p3943_p0, %p396_p1  ;;  %s3942_s27 = sshll.u32 %s4573_s20, 2 }
  0x31   : > { %s383_s17 = scalar_lea.vmem [#allocation5], %s3941_s19  ;;  %s387_s16 = scalar_lea.hbm %s6588_s2, %s3942_s27 }
  0x32   : > { %s391_s15 = sshll.u32 %s383_s17, 4  ;;  %s389_s22 = sshll.u32 %s387_s16, 4  ;;  %s392_s15 = int_to_ptr.vmem [resolvable:$true] %s391_s15  ;;  %s390_s22 = int_to_ptr.hbm [resolvable:$true] %s389_s22 }
  0x33   : > { %s380_s0 = scalar_lea.sflag [#allocation6], %s4694_s12  ;;  %s4441_s29 = sshra.s32 %s390_s22, 4  ;;  %s4442_s29 = int_to_ptr.hbm [resolvable:$true] %s4441_s29 }
  0x34   : > { %s4443_s26 = scalar_lea.hbm %s4442_s29, 4  ;;  %s4448_s19 = scalar_lea.hbm %s6588_s2, 8 }
  0x35   : > { %p4444_p9 = scmp.ne.s32.totalorder %s4442_s29, %s4443_s26  ;;  %p4449_p4 = scmp.lt.s32.totalorder %s4442_s29, %s6588_s2 }
  0x36   : > { %p4450_p7 = scmp.lt.s32.totalorder %s4448_s19, %s4443_s26 }
  0x37   : > { %p4446_p0 = pnand %p4444_p9, %p4415_p3 }
  0x38   : > { %p4451_p5 = por %p4450_p7, %p4449_p4 }
  0x39   : > { %p4447_p1 = pneg %p4446_p0 }
  0x3b   : > { %p4452_p8 = pnand %p4451_p5, %p4447_p1 }
  0x3d   : > { %4455 = shalt.err (!%p4452_p8)
}
  0x3e   : > { %4108 = dma.hbm_to_vmem [thread:$0]  (!%p4703_p13), %s390_s22, 64, %s392_s15, %s380_s0  }
  0x3f   : > { %400 = sbr.rel (%p4728_p2) target bundleno = 1909 (0x775), region = 56 }
  0x44   : > { %s4751_s12 = sand.u32 1, %s4565_s18  }
  0x45   : > { %s4754_s27 = sshll.u32 %s4751_s12, 4  ;;  %s403_s20 = scalar_lea.sflag [#allocation3], %s4751_s12 }
  0x46   : > { %s406_s29 = scalar_lea.vmem [#allocation2], %s4754_s27 }
  0x47   : > { %4544 = dma.done.wait (%p4678_p6), %s403_s20, 256  }
  0x48   : > { %4546 = vsyncadd (%p4678_p6), %s403_s20, 4294967040  ;;  %s3945_s0 = sshll.u32 %s4751_s12, 2  ;;  %s413_s23 = scalar_lea.sflag [#allocation6], %s4751_s12 }
  0x49   : > { %s4764_s25 = scalar_lea.vmem [#allocation5], %s3945_s0 }
  0x4a   : > { %4548 = dma.done.wait (%p4678_p6), %s413_s23, 64  }
  0x4b   : > { %4550 = vsyncadd (%p4678_p6), %s413_s23, 4294967232  ;;  %v484_v0 = vld [vmem:[%s406_s29] sm:$0xff]  ;;  %v485_v2 = vld [vmem:[%s406_s29 + $0x8] sm:$0xff]  ;;  %vm555_vm0 = vcmask 64512   ;;  %p475_p6 = scmp.lt.s32.totalorder %s4656_s21, 1  ;;  %vm863_vm1 = vcmask 1043456  }
  0x4c   : > { %486 = vxpose.xlu0.b32.start.end [1/1] (short) %v484_v0, 128  ;;  %v550_v1 = vld [vmem:[%s6589_s3] sm:$0xff]  ;;  %vm766_vm2 = vcmask 31744   ;;  %vm1012_vm3 = vcmask 523264   ;;  %s6506_s22 = scalar_lea.vmem [#allocation8], %s4754_s27  ;;  %s4491_s30 = scalar_lea.hbm %s6597_s11, 32 }
  0x4d   : > { %667 = vmatpush.msra.mxu0 %v550_v1  ;;  %s4819_s28 = scalar_select %p475_p6, %s4656_s21, 1  ;;  %v4849_v20 = vld [vmem:[%s6590_s4] ss:$0 sm:$0xff] }
  0x4e   : > { %s3769_s17 = sshll.u32 %s6506_s22, 4  ;;  %s3770_s17 = int_to_ptr.vmem [resolvable:$true] %s3769_s17 }
  0x4f   : > { %s3948_s14 = sshll.u32 %s4819_s28, 2  ;;  %s4091_s19 = sshll.u32 %s4819_s28, 8 }
  0x50   : > { %s478_s26 = scalar_lea.vmem %s6587_s1, %s3948_s14  ;;  %s5194_s29 = scalar_lea.vmem %s6596_s10, %s4091_s19 }
  0x51   : > { %v765_v15 = vld [vmem:[%s478_s26] sm:$0xf]  ;;  %s6511_s26 = scalar_lea.vmem [#allocation7], %s4754_s27  ;;  %s4092_s27 = sshll.u32 %s4656_s21, 4 }
  0x52   : > { %3983 = vmatpush.msk.msra.mxu1 %vm863_vm1, %v765_v15  ;;  %s3767_s19 = scalar_lea.hbm %s6597_s11, %s4092_s27  ;;  %s3749_s0 = scalar_lea.hbm %s6595_s9, %s4092_s27 }
  0x53   : > { %s3751_s15 = sshll.u32 %s6511_s26, 4  ;;  %s3753_s13 = sshll.u32 %s3749_s0, 4  ;;  %s6537_s15 = int_to_ptr.vmem [resolvable:$true] %s3751_s15  ;;  %s6540_s13 = int_to_ptr.hbm [resolvable:$true] %s3753_s13 }
  0x54   : > { %s3738_s21 = scalar_lea.sflag [#allocation9], %s4751_s12 }
  0xcc   : > { %518 = vxpose.xlu0.b32.start.end [1/1] (short) %v485_v2, 128 }
  0xf0   : > { %v4773_v3 = vpop.trf.xlu0 }
  0xf1   : > { %3951 = vmatmul.msk.f32.vlgmr.msra.gmra.mxu0 %vm555_vm0, %v4773_v3 }
  0xf8   : > { %v4777_v4 = vpop.trf.xlu0 }
  0xf9   : > { %3952 = vmatmul.msk.f32.gmra.mxu0 %vm555_vm0, %v4777_v4 }
 0x100   : > { %v4781_v5 = vpop.trf.xlu0 }
 0x101   : > { %3953 = vmatmul.msk.f32.gmra.mxu0 %vm555_vm0, %v4781_v5 }
 0x108   : > { %v4785_v6 = vpop.trf.xlu0 }
 0x109   : > { %3954 = vmatmul.msk.f32.gmra.mxu0 %vm555_vm0, %v4785_v6 }
 0x110   : > { %v4789_v7 = vpop.trf.xlu0 }
 0x111   : > { %3955 = vmatmul.msk.f32.gmra.mxu0 %vm555_vm0, %v4789_v7 }
 0x118   : > { %v4793_v8 = vpop.trf.xlu0 }
 0x119   : > { %3956 = vmatmul.msk.f32.gmra.mxu0 %vm555_vm0, %v4793_v8 }
 0x120   : > { %v4797_v9 = vpop.trf.xlu0 }
 0x121   : > { %3957 = vmatmul.msk.f32.gmra.mxu0 %vm555_vm0, %v4797_v9 }
 0x128   : > { %v4801_v10 = vpop.trf.xlu0 }
 0x129   : > { %3958 = vmatmul.msk.f32.gmra.mxu0 %vm555_vm0, %v4801_v10 }
 0x130   : > { %v4805_v11 = vpop.trf.xlu0 }
 0x131   : > { %3959 = vmatmul.msk.f32.gmra.mxu0 %vm555_vm0, %v4805_v11 }
 0x138   : > { %v4809_v12 = vpop.trf.xlu0 }
 0x139   : > { %3960 = vmatmul.msk.f32.gmra.mxu0 %vm555_vm0, %v4809_v12 }
 0x140   : > { %v4813_v13 = vpop.trf.xlu0 }
 0x141   : > { %6643 = vst [vmem:[#allocation21_spill] sm:$0xff] %v4813_v13  ;;  %3961 = vmatmul.msk.f32.gmra.mxu0 %vm555_vm0, %v4813_v13 }
 0x148   : > { %v4821_v14 = vpop.trf.xlu0 }
 0x149   : > { %6644 = vst [vmem:[#allocation22_spill] sm:$0xff] %v4821_v14  ;;  %3962 = vmatmul.msk.f32.gmra.mxu0 %vm555_vm0, %v4821_v14 }
 0x150   : > { %v4829_v16 = vpop.trf.xlu0 }
 0x151   : > { %6645 = vst [vmem:[#allocation23_spill] sm:$0xff] %v4829_v16  ;;  %3963 = vmatmul.msk.f32.gmra.mxu0 %vm555_vm0, %v4829_v16 }
 0x158   : > { %v4834_v17 = vpop.trf.xlu0 }
 0x159   : > { %6646 = vst [vmem:[#allocation24_spill] sm:$0xff] %v4834_v17  ;;  %3964 = vmatmul.msk.f32.gmra.mxu0 %vm555_vm0, %v4834_v17 }
 0x160   : > { %v4838_v18 = vpop.trf.xlu0 }
 0x161   : > { %6647 = vst [vmem:[#allocation25_spill] sm:$0xff] %v4838_v18  ;;  %3965 = vmatmul.msk.f32.gmra.mxu0 %vm555_vm0, %v4838_v18 }
 0x168   : > { %v4842_v19 = vpop.trf.xlu0 }
 0x169   : > { %6648 = vst [vmem:[#allocation26_spill] sm:$0xff] %v4842_v19  ;;  %3966 = vmatmul.msk.f32.gmra.mxu0 %vm555_vm0, %v4842_v19 }
 0x16e   : > { %v669_v21 = vpop.f32.mrf.mxu0 }
 0x16f   : > { %v670_v22 = vadd.f32 %v4849_v20, %v669_v21 }
 0x170   : > { %v4852_v23 = vpop.trf.xlu0 }
 0x171   : > { %6649 = vst [vmem:[#allocation27_spill] sm:$0xff] %v4852_v23  ;;  %3967 = vmatmul.msk.f32.gmra.mxu0 %vm555_vm0, %v4852_v23  ;;  %3984 = vmatmul.msk.f32.vlgmr.msra.gmra.mxu1 %vm766_vm2, %v670_v22 }
 0x176   : > { %v672_v24 = vpop.f32.mrf.mxu0 }
 0x177   : > { %v673_v25 = vadd.f32 %v4849_v20, %v672_v24 }
 0x178   : > { %v4858_v26 = vpop.trf.xlu0 }
 0x179   : > { %6650 = vst [vmem:[#allocation28_spill] sm:$0xff] %v4858_v26  ;;  %3968 = vmatmul.msk.f32.gmra.mxu0 %vm555_vm0, %v4858_v26  ;;  %3985 = vmatmul.msk.f32.gmra.mxu1 %vm766_vm2, %v673_v25 }
 0x17e   : > { %v675_v27 = vpop.f32.mrf.mxu0 }
 0x17f   : > { %v676_v28 = vadd.f32 %v4849_v20, %v675_v27 }
 0x180   : > { %v4864_v29 = vpop.trf.xlu0 }
 0x181   : > { %6651 = vst [vmem:[#allocation29_spill] sm:$0xff] %v4864_v29  ;;  %3969 = vmatmul.msk.f32.gmra.mxu0 %vm555_vm0, %v4864_v29  ;;  %3986 = vmatmul.msk.f32.gmra.mxu1 %vm766_vm2, %v676_v28 }
 0x186   : > { %v678_v30 = vpop.f32.mrf.mxu0 }
 0x187   : > { %v679_v31 = vadd.f32 %v4849_v20, %v678_v30 }
 0x188   : > { %v4870_v32 = vpop.trf.xlu0 }
 0x189   : > { %6652 = vst [vmem:[#allocation30_spill] sm:$0xff] %v4870_v32  ;;  %3970 = vmatmul.msk.f32.gmra.mxu0 %vm555_vm0, %v4870_v32  ;;  %3987 = vmatmul.msk.f32.gmra.mxu1 %vm766_vm2, %v679_v31 }
 0x18e   : > { %v681_v33 = vpop.f32.mrf.mxu0 }
 0x18f   : > { %v682_v34 = vadd.f32 %v4849_v20, %v681_v33 }
 0x190   : > { %v4876_v35 = vpop.trf.xlu0 }
 0x191   : > { %6653 = vst [vmem:[#allocation31_spill] sm:$0xff] %v4876_v35  ;;  %3971 = vmatmul.msk.f32.gmra.mxu0 %vm555_vm0, %v4876_v35  ;;  %3988 = vmatmul.msk.f32.gmra.mxu1 %vm766_vm2, %v682_v34 }
 0x196   : > { %v684_v36 = vpop.f32.mrf.mxu0 }
 0x197   : > { %v685_v37 = vadd.f32 %v4849_v20, %v684_v36 }
 0x198   : > { %v4882_v38 = vpop.trf.xlu0 }
 0x199   : > { %6654 = vst [vmem:[#allocation32_spill] sm:$0xff] %v4882_v38  ;;  %3989 = vmatmul.msk.f32.gmra.mxu1 %vm766_vm2, %v685_v37  ;;  %3972 = vmatmul.msk.f32.gmra.mxu0 %vm555_vm0, %v4882_v38 }
 0x19e   : > { %v687_v39 = vpop.f32.mrf.mxu0 }
 0x19f   : > { %v688_v40 = vadd.f32 %v4849_v20, %v687_v39 }
 0x1a0   : > { %v4888_v41 = vpop.trf.xlu0 }
 0x1a1   : > { %6655 = vst [vmem:[#allocation33_spill] sm:$0xff] %v4888_v41  ;;  %3990 = vmatmul.msk.f32.gmra.mxu1 %vm766_vm2, %v688_v40  ;;  %3973 = vmatmul.msk.f32.gmra.mxu0 %vm555_vm0, %v4888_v41 }
 0x1a6   : > { %v690_v42 = vpop.f32.mrf.mxu0 }
 0x1a7   : > { %v691_v43 = vadd.f32 %v4849_v20, %v690_v42 }
 0x1a8   : > { %v4894_v44 = vpop.trf.xlu0 }
 0x1a9   : > { %6656 = vst [vmem:[#allocation34_spill] sm:$0xff] %v4894_v44  ;;  %3991 = vmatmul.msk.f32.gmra.mxu1 %vm766_vm2, %v691_v43  ;;  %3974 = vmatmul.msk.f32.gmra.mxu0 %vm555_vm0, %v4894_v44 }
 0x1ae   : > { %v693_v45 = vpop.f32.mrf.mxu0 }
 0x1af   : > { %v694_v46 = vadd.f32 %v4849_v20, %v693_v45 }
 0x1b0   : > { %v4900_v47 = vpop.trf.xlu0 }
 0x1b1   : > { %6657 = vst [vmem:[#allocation35_spill] sm:$0xff] %v4900_v47  ;;  %3992 = vmatmul.msk.f32.gmra.mxu1 %vm766_vm2, %v694_v46  ;;  %3975 = vmatmul.msk.f32.gmra.mxu0 %vm555_vm0, %v4900_v47 }
 0x1b6   : > { %v696_v48 = vpop.f32.mrf.mxu0 }
 0x1b7   : > { %v697_v49 = vadd.f32 %v4849_v20, %v696_v48 }
 0x1b8   : > { %v4906_v50 = vpop.trf.xlu0 }
 0x1b9   : > { %6658 = vst [vmem:[#allocation36_spill] sm:$0xff] %v4906_v50  ;;  %3993 = vmatmul.msk.f32.gmra.mxu1 %vm766_vm2, %v697_v49  ;;  %3976 = vmatmul.msk.f32.gmra.mxu0 %vm555_vm0, %v4906_v50 }
 0x1be   : > { %v699_v51 = vpop.f32.mrf.mxu0 }
 0x1bf   : > { %v700_v52 = vadd.f32 %v4849_v20, %v699_v51 }
 0x1c0   : > { %v4912_v53 = vpop.trf.xlu0 }
 0x1c1   : > { %6659 = vst [vmem:[#allocation37_spill] sm:$0xff] %v4912_v53  ;;  %3994 = vmatmul.msk.f32.gmra.mxu1 %vm766_vm2, %v700_v52  ;;  %3977 = vmatmul.msk.f32.gmra.mxu0 %vm555_vm0, %v4912_v53 }
 0x1c6   : > { %v702_v54 = vpop.f32.mrf.mxu0 }
 0x1c7   : > { %v703_v55 = vadd.f32 %v4849_v20, %v702_v54 }
 0x1c8   : > { %v4918_v56 = vpop.trf.xlu0 }
 0x1c9   : > { %6660 = vst [vmem:[#allocation38_spill] sm:$0xff] %v4918_v56  ;;  %3995 = vmatmul.msk.f32.gmra.mxu1 %vm766_vm2, %v703_v55  ;;  %3978 = vmatmul.msk.f32.gmra.mxu0 %vm555_vm0, %v4918_v56 }
 0x1ce   : > { %v705_v57 = vpop.f32.mrf.mxu0 }
 0x1cf   : > { %v706_v58 = vadd.f32 %v4849_v20, %v705_v57 }
 0x1d0   : > { %v4924_v59 = vpop.trf.xlu0 }
 0x1d1   : > { %6661 = vst [vmem:[#allocation39_spill] sm:$0xff] %v4924_v59  ;;  %3996 = vmatmul.msk.f32.gmra.mxu1 %vm766_vm2, %v706_v58  ;;  %3979 = vmatmul.msk.f32.gmra.mxu0 %vm555_vm0, %v4924_v59 }
 0x1d6   : > { %v708_v60 = vpop.f32.mrf.mxu0 }
 0x1d7   : > { %v709_v61 = vadd.f32 %v4849_v20, %v708_v60 }
 0x1d8   : > { %v4930_v62 = vpop.trf.xlu0 }
 0x1d9   : > { %6662 = vst [vmem:[#allocation40_spill] sm:$0xff] %v4930_v62  ;;  %3997 = vmatmul.msk.f32.gmra.mxu1 %vm766_vm2, %v709_v61  ;;  %3980 = vmatmul.msk.f32.gmra.mxu0 %vm555_vm0, %v4930_v62 }
 0x1de   : > { %v711_v63 = vpop.f32.mrf.mxu0 }
 0x1df   : > { %v712_v0 = vadd.f32 %v4849_v20, %v711_v63 }
 0x1e0   : > { %v4936_v1 = vpop.trf.xlu0 }
 0x1e1   : > { %6663 = vst [vmem:[#allocation41_spill] sm:$0xff] %v4936_v1  ;;  %3998 = vmatmul.msk.f32.gmra.mxu1 %vm766_vm2, %v712_v0  ;;  %3981 = vmatmul.msk.f32.gmra.mxu0 %vm555_vm0, %v4936_v1 }
 0x1e6   : > { %v714_v2 = vpop.f32.mrf.mxu0 }
 0x1e7   : > { %v715_v15 = vadd.f32 %v4849_v20, %v714_v2 }
 0x1e8   : > { %v4942_v21 = vpop.trf.xlu0 }
 0x1e9   : > { %6664 = vst [vmem:[#allocation42_spill] sm:$0xff] %v4942_v21  ;;  %3999 = vmatmul.msk.f32.gmra.mxu1 %vm766_vm2, %v715_v15  ;;  %3982 = vmatmul.msk.f32.gmra.mxu0 %vm555_vm0, %v4942_v21 }
 0x1ee   : > { %v717_v22 = vpop.f32.mrf.mxu0  ;;  %v884_v24 = vpop.f32.mrf.mxu1 }
 0x1ef   : > { %v718_v25 = vadd.f32 %v4849_v20, %v717_v22  ;;  %v4948_v27 = vmul.f32 0.5, %v884_v24 }
 0x1f1   : > { %4000 = vmatmul.msk.f32.gmra.mxu1 %vm766_vm2, %v718_v25  ;;  %v1013_v28 = vsel %vm1012_vm3, %v4948_v27, -inf }
 0x1f2   : > { %1014 = vmax.xlane.f32.xlu1 %v1013_v28 }
 0x1f6   : > { %v720_v30 = vpop.f32.mrf.mxu0  ;;  %v887_v31 = vpop.f32.mrf.mxu1 }
 0x1f7   : > { %v721_v33 = vadd.f32 %v4849_v20, %v720_v30  ;;  %v4954_v34 = vmul.f32 0.5, %v887_v31 }
 0x1f9   : > { %4001 = vmatmul.msk.f32.gmra.mxu1 %vm766_vm2, %v721_v33  ;;  %v1016_v36 = vsel %vm1012_vm3, %v4954_v34, -inf }
 0x1fa   : > { %1017 = vmax.xlane.f32.xlu1 %v1016_v36 }
 0x1fe   : > { %v723_v37 = vpop.f32.mrf.mxu0  ;;  %v890_v39 = vpop.f32.mrf.mxu1 }
 0x1ff   : > { %v724_v40 = vadd.f32 %v4849_v20, %v723_v37  ;;  %v4960_v42 = vmul.f32 0.5, %v890_v39 }
 0x201   : > { %4002 = vmatmul.msk.f32.gmra.mxu1 %vm766_vm2, %v724_v40  ;;  %v1019_v43 = vsel %vm1012_vm3, %v4960_v42, -inf }
 0x202   : > { %1020 = vmax.xlane.f32.xlu2 %v1019_v43 }
 0x206   : > { %v726_v45 = vpop.f32.mrf.mxu0  ;;  %v893_v46 = vpop.f32.mrf.mxu1 }
 0x207   : > { %v727_v48 = vadd.f32 %v4849_v20, %v726_v45  ;;  %v4966_v49 = vmul.f32 0.5, %v893_v46 }
 0x209   : > { %4003 = vmatmul.msk.f32.gmra.mxu1 %vm766_vm2, %v727_v48  ;;  %v1022_v51 = vsel %vm1012_vm3, %v4966_v49, -inf }
 0x20a   : > { %1023 = vmax.xlane.f32.xlu2 %v1022_v51 }
 0x20e   : > { %v729_v52 = vpop.f32.mrf.mxu0  ;;  %v896_v54 = vpop.f32.mrf.mxu1 }
 0x20f   : > { %v730_v55 = vadd.f32 %v4849_v20, %v729_v52  ;;  %v4972_v57 = vmul.f32 0.5, %v896_v54 }
 0x211   : > { %4004 = vmatmul.msk.f32.gmra.mxu1 %vm766_vm2, %v730_v55  ;;  %v1025_v58 = vsel %vm1012_vm3, %v4972_v57, -inf }
 0x212   : > { %1026 = vmax.xlane.f32.xlu1 %v1025_v58 }
 0x216   : > { %v899_v60 = vpop.f32.mrf.mxu1  ;;  %v732_v61 = vpop.f32.mrf.mxu0 }
 0x217   : > { %v4977_v63 = vmul.f32 0.5, %v899_v60  ;;  %v733_v0 = vadd.f32 %v4849_v20, %v732_v61 }
 0x219   : > { %v1028_v2 = vsel %vm1012_vm3, %v4977_v63, -inf  ;;  %4005 = vmatmul.msk.f32.gmra.mxu1 %vm766_vm2, %v733_v0 }
 0x21a   : > { %1029 = vmax.xlane.f32.xlu2 %v1028_v2 }
 0x21e   : > { %v902_v15 = vpop.f32.mrf.mxu1  ;;  %v735_v22 = vpop.f32.mrf.mxu0 }
 0x21f   : > { %v4983_v24 = vmul.f32 0.5, %v902_v15  ;;  %v736_v25 = vadd.f32 %v4849_v20, %v735_v22 }
 0x221   : > { %v1031_v28 = vsel %vm1012_vm3, %v4983_v24, -inf  ;;  %4006 = vmatmul.msk.f32.gmra.mxu1 %vm766_vm2, %v736_v25 }
 0x222   : > { %1032 = vmax.xlane.f32.xlu1 %v1031_v28 }
 0x226   : > { %v905_v30 = vpop.f32.mrf.mxu1  ;;  %v738_v31 = vpop.f32.mrf.mxu0 }
 0x227   : > { %v4989_v33 = vmul.f32 0.5, %v905_v30  ;;  %v739_v36 = vadd.f32 %v4849_v20, %v738_v31 }
 0x229   : > { %v1034_v37 = vsel %vm1012_vm3, %v4989_v33, -inf  ;;  %4007 = vmatmul.msk.f32.gmra.mxu1 %vm766_vm2, %v739_v36 }
 0x22a   : > { %1035 = vmax.xlane.f32.xlu1 %v1034_v37 }
 0x22e   : > { %v908_v39 = vpop.f32.mrf.mxu1  ;;  %v741_v40 = vpop.f32.mrf.mxu0 }
 0x22f   : > { %v4995_v43 = vmul.f32 0.5, %v908_v39  ;;  %v742_v45 = vadd.f32 %v4849_v20, %v741_v40 }
 0x231   : > { %v1037_v46 = vsel %vm1012_vm3, %v4995_v43, -inf  ;;  %4008 = vmatmul.msk.f32.gmra.mxu1 %vm766_vm2, %v742_v45 }
 0x232   : > { %1038 = vmax.xlane.f32.xlu1 %v1037_v46 }
 0x236   : > { %v911_v48 = vpop.f32.mrf.mxu1  ;;  %v744_v51 = vpop.f32.mrf.mxu0 }
 0x237   : > { %v5001_v52 = vmul.f32 0.5, %v911_v48  ;;  %v745_v54 = vadd.f32 %v4849_v20, %v744_v51 }
 0x239   : > { %v1040_v55 = vsel %vm1012_vm3, %v5001_v52, -inf  ;;  %4009 = vmatmul.msk.f32.gmra.mxu1 %vm766_vm2, %v745_v54 }
 0x23a   : > { %1041 = vmax.xlane.f32.xlu1 %v1040_v55 }
 0x23e   : > { %v914_v58 = vpop.f32.mrf.mxu1  ;;  %v747_v60 = vpop.f32.mrf.mxu0 }
 0x23f   : > { %v5007_v61 = vmul.f32 0.5, %v914_v58  ;;  %v748_v0 = vadd.f32 %v4849_v20, %v747_v60 }
 0x241   : > { %v1043_v2 = vsel %vm1012_vm3, %v5007_v61, -inf  ;;  %4010 = vmatmul.msk.f32.gmra.mxu1 %vm766_vm2, %v748_v0 }
 0x242   : > { %1044 = vmax.xlane.f32.xlu1 %v1043_v2 }
 0x246   : > { %v917_v15 = vpop.f32.mrf.mxu1  ;;  %v750_v22 = vpop.f32.mrf.mxu0 }
 0x247   : > { %v5013_v25 = vmul.f32 0.5, %v917_v15  ;;  %v751_v28 = vadd.f32 %v4849_v20, %v750_v22 }
 0x249   : > { %v1046_v30 = vsel %vm1012_vm3, %v5013_v25, -inf  ;;  %4011 = vmatmul.msk.f32.gmra.mxu1 %vm766_vm2, %v751_v28 }
 0x24a   : > { %1047 = vmax.xlane.f32.xlu1 %v1046_v30 }
 0x24e   : > { %v920_v31 = vpop.f32.mrf.mxu1  ;;  %v753_v36 = vpop.f32.mrf.mxu0 }
 0x24f   : > { %v5019_v37 = vmul.f32 0.5, %v920_v31  ;;  %v754_v39 = vadd.f32 %v4849_v20, %v753_v36 }
 0x251   : > { %v1049_v40 = vsel %vm1012_vm3, %v5019_v37, -inf  ;;  %4012 = vmatmul.msk.f32.gmra.mxu1 %vm766_vm2, %v754_v39 }
 0x252   : > { %1050 = vmax.xlane.f32.xlu1 %v1049_v40 }
 0x256   : > { %v923_v45 = vpop.f32.mrf.mxu1  ;;  %v756_v46 = vpop.f32.mrf.mxu0 }
 0x257   : > { %v5025_v48 = vmul.f32 0.5, %v923_v45  ;;  %v757_v51 = vadd.f32 %v4849_v20, %v756_v46 }
 0x259   : > { %v1052_v54 = vsel %vm1012_vm3, %v5025_v48, -inf  ;;  %4013 = vmatmul.msk.f32.gmra.mxu1 %vm766_vm2, %v757_v51 }
 0x25a   : > { %1053 = vmax.xlane.f32.xlu1 %v1052_v54 }
 0x25e   : > { %v926_v55 = vpop.f32.mrf.mxu1  ;;  %v759_v58 = vpop.f32.mrf.mxu0 }
 0x25f   : > { %v5031_v60 = vmul.f32 0.5, %v926_v55  ;;  %v760_v0 = vadd.f32 %v4849_v20, %v759_v58 }
 0x261   : > { %v1055_v2 = vsel %vm1012_vm3, %v5031_v60, -inf  ;;  %4014 = vmatmul.msk.f32.gmra.mxu1 %vm766_vm2, %v760_v0 }
 0x262   : > { %1056 = vmax.xlane.f32.xlu1 %v1055_v2 }
 0x265   : > { %v1015_v15 = vpop.xlane.xlu1 %1014 }
 0x266   : > { %v1109_v22 = vsub.f32 %v4948_v27, %v1015_v15  ;;  %v929_v28 = vpop.f32.mrf.mxu1  ;;  %v762_v30 = vpop.f32.mrf.mxu0 }
 0x267   : > { %v5038_v31 = vmul.f32 0.5, %v929_v28  ;;  %v763_v36 = vadd.f32 %v4849_v20, %v762_v30 }
 0x268   : > { %v1141_v39 = vmul.f32 1.442695, %v1109_v22 }
 0x269   : > { %v1058_v40 = vsel %vm1012_vm3, %v5038_v31, -inf  ;;  %4015 = vmatmul.msk.f32.gmra.mxu1 %vm766_vm2, %v763_v36 }
 0x26a   : > { %4155 = vpow2.f32 %v1141_v39  ;;  %1059 = vmax.xlane.f32.xlu1 %v1058_v40 }
 0x26d   : > { %v1018_v45 = vpop.xlane.xlu1 %1017 }
 0x26e   : > { %v1110_v46 = vsub.f32 %v4954_v34, %v1018_v45  ;;  %v932_v51 = vpop.f32.mrf.mxu1 }
 0x26f   : > { %v5045_v54 = vmul.f32 0.5, %v932_v51 }
 0x270   : > { %v5047_v27 = vpop.eup %4155  ;;  %v1143_v55 = vmul.f32 1.442695, %v1110_v46 }
 0x271   : > { %v1205_v20 = vsel %vm1012_vm3, %v5047_v27, 0.0  ;;  %v1061_v58 = vsel %vm1012_vm3, %v5045_v54, -inf }
 0x272   : > { %4157 = vpow2.f32 %v1143_v55  ;;  %1206 = vadd.xlane.f32.xlu2 %v1205_v20  ;;  %1062 = vmax.xlane.f32.xlu1 %v1061_v58 }
 0x275   : > { %v1021_v0 = vpop.xlane.xlu2 %1020 }
 0x276   : > { %v1111_v2 = vsub.f32 %v4960_v42, %v1021_v0  ;;  %v935_v15 = vpop.f32.mrf.mxu1 }
 0x277   : > { %v5054_v34 = vmul.f32 0.5, %v935_v15 }
 0x278   : > { %v5056_v22 = vpop.eup %4157  ;;  %v1145_v28 = vmul.f32 1.442695, %v1111_v2 }
 0x279   : > { %v1208_v30 = vsel %vm1012_vm3, %v5056_v22, 0.0  ;;  %v1064_v36 = vsel %vm1012_vm3, %v5054_v34, -inf }
 0x27a   : > { %4159 = vpow2.f32 %v1145_v28  ;;  %1209 = vadd.xlane.f32.xlu2 %v1208_v30  ;;  %1065 = vmax.xlane.f32.xlu1 %v1064_v36 }
 0x27d   : > { %v1024_v39 = vpop.xlane.xlu2 %1023 }
 0x27e   : > { %v1112_v40 = vsub.f32 %v4966_v49, %v1024_v39  ;;  %v938_v45 = vpop.f32.mrf.mxu1 }
 0x27f   : > { %v5063_v42 = vmul.f32 0.5, %v938_v45 }
 0x280   : > { %v5065_v46 = vpop.eup %4159  ;;  %v1147_v51 = vmul.f32 1.442695, %v1112_v40 }
 0x281   : > { %v1211_v55 = vsel %vm1012_vm3, %v5065_v46, 0.0  ;;  %v1067_v20 = vsel %vm1012_vm3, %v5063_v42, -inf }
 0x282   : > { %4161 = vpow2.f32 %v1147_v51  ;;  %1212 = vadd.xlane.f32.xlu2 %v1211_v55  ;;  %1068 = vmax.xlane.f32.xlu1 %v1067_v20 }
 0x285   : > { %v1027_v58 = vpop.xlane.xlu1 %1026 }
 0x286   : > { %v1113_v0 = vsub.f32 %v4972_v57, %v1027_v58  ;;  %v941_v2 = vpop.f32.mrf.mxu1 }
 0x287   : > { %v5072_v49 = vmul.f32 0.5, %v941_v2 }
 0x288   : > { %v5074_v15 = vpop.eup %4161  ;;  %v1149_v28 = vmul.f32 1.442695, %v1113_v0 }
 0x289   : > { %v1214_v30 = vsel %vm1012_vm3, %v5074_v15, 0.0  ;;  %v1070_v36 = vsel %vm1012_vm3, %v5072_v49, -inf }
 0x28a   : > { %4163 = vpow2.f32 %v1149_v28  ;;  %1215 = vadd.xlane.f32.xlu2 %v1214_v30  ;;  %1071 = vmax.xlane.f32.xlu1 %v1070_v36 }
 0x28d   : > { %v1030_v39 = vpop.xlane.xlu2 %1029 }
 0x28e   : > { %v1114_v40 = vsub.f32 %v4977_v63, %v1030_v39  ;;  %v944_v45 = vpop.f32.mrf.mxu1 }
 0x28f   : > { %v5081_v57 = vmul.f32 0.5, %v944_v45 }
 0x290   : > { %v5083_v51 = vpop.eup %4163  ;;  %v1151_v55 = vmul.f32 1.442695, %v1114_v40 }
 0x291   : > { %v1217_v20 = vsel %vm1012_vm3, %v5083_v51, 0.0  ;;  %v1073_v58 = vsel %vm1012_vm3, %v5081_v57, -inf }
 0x292   : > { %4165 = vpow2.f32 %v1151_v55  ;;  %1218 = vadd.xlane.f32.xlu2 %v1217_v20  ;;  %1074 = vmax.xlane.f32.xlu0 %v1073_v58 }
 0x295   : > { %v1033_v0 = vpop.xlane.xlu1 %1032 }
 0x296   : > { %v947_v2 = vpop.f32.mrf.mxu1  ;;  %v1115_v63 = vsub.f32 %v4983_v24, %v1033_v0 }
 0x297   : > { %v5094_v36 = vmul.f32 0.5, %v947_v2 }
 0x298   : > { %v5089_v28 = vpop.eup %4165  ;;  %v1153_v39 = vmul.f32 1.442695, %v1115_v63 }
 0x299   : > { %v1220_v30 = vsel %vm1012_vm3, %v5089_v28, 0.0  ;;  %v1076_v55 = vsel %vm1012_vm3, %v5094_v36, -inf }
 0x29a   : > { %1221 = vadd.xlane.f32.xlu2 %v1220_v30  ;;  %4167 = vpow2.f32 %v1153_v39 }
 0x29d   : > { %v1036_v40 = vpop.xlane.xlu1 %1035 }
 0x29e   : > { %v5096_v45 = vpop.f32.mrf.mxu1  ;;  %v1116_v20 = vsub.f32 %v4989_v33, %v1036_v40 }
 0x2a0   : > { %v1155_v58 = vmul.f32 1.442695, %v1116_v20  ;;  %v5101_v24 = vpop.eup %4167 }
 0x2a1   : > { %v1223_v63 = vsel %vm1012_vm3, %v5101_v24, 0.0 }
 0x2a2   : > { %1077 = vmax.xlane.f32.xlu2 %v1076_v55  ;;  %4169 = vpow2.f32 %v1155_v58 }
 0x2a5   : > { %v1039_v21 = vpop.xlane.xlu1 %1038 }
 0x2a6   : > { %v5103_v0 = vpop.f32.mrf.mxu1  ;;  %v1117_v2 = vsub.f32 %v4995_v43, %v1039_v21 }
 0x2a8   : > { %v1157_v30 = vmul.f32 1.442695, %v1117_v2  ;;  %v5108_v62 = vpop.eup %4169 }
 0x2a9   : > { %v1226_v40 = vsel %vm1012_vm3, %v5108_v62, 0.0 }
 0x2aa   : > { %1224 = vadd.xlane.f32.xlu2 %v1223_v63  ;;  %4171 = vpow2.f32 %v1157_v30 }
 0x2ad   : > { %v1042_v1 = vpop.xlane.xlu1 %1041 }
 0x2ae   : > { %v5110_v39 = vpop.f32.mrf.mxu1  ;;  %v1118_v33 = vsub.f32 %v5001_v52, %v1042_v1 }
 0x2b0   : > { %v1159_v55 = vmul.f32 1.442695, %v1118_v33  ;;  %v5115_v21 = vpop.eup %4171 }
 0x2b1   : > { %v1229_v2 = vsel %vm1012_vm3, %v5115_v21, 0.0 }
 0x2b2   : > { %1227 = vadd.xlane.f32.xlu2 %v1226_v40  ;;  %4173 = vpow2.f32 %v1159_v55 }
 0x2b5   : > { %v1045_v20 = vpop.xlane.xlu1 %1044 }
 0x2b6   : > { %v5117_v43 = vpop.f32.mrf.mxu1  ;;  %v1119_v58 = vsub.f32 %v5007_v61, %v1045_v20 }
 0x2b8   : > { %v1161_v63 = vmul.f32 1.442695, %v1119_v58  ;;  %v5122_v1 = vpop.eup %4173 }
 0x2b9   : > { %v1232_v40 = vsel %vm1012_vm3, %v5122_v1, 0.0 }
 0x2ba   : > { %1230 = vadd.xlane.f32.xlu2 %v1229_v2  ;;  %4175 = vpow2.f32 %v1161_v63 }
 0x2bd   : > { %v1048_v30 = vpop.xlane.xlu1 %1047 }
 0x2be   : > { %v5124_v52 = vpop.f32.mrf.mxu1  ;;  %v1120_v33 = vsub.f32 %v5013_v25, %v1048_v30 }
 0x2c0   : > { %v1163_v55 = vmul.f32 1.442695, %v1120_v33  ;;  %v5129_v61 = vpop.eup %4175 }
 0x2c1   : > { %v1235_v2 = vsel %vm1012_vm3, %v5129_v61, 0.0 }
 0x2c2   : > { %1233 = vadd.xlane.f32.xlu2 %v1232_v40  ;;  %4177 = vpow2.f32 %v1163_v55 }
 0x2c5   : > { %v1051_v59 = vpop.xlane.xlu1 %1050 }
 0x2c6   : > { %v5131_v20 = vpop.f32.mrf.mxu1  ;;  %v1121_v58 = vsub.f32 %v5019_v37, %v1051_v59  ;;  %v1813_v59 = vld [vmem:[%s4764_s25] sm:$0xf]  ;;  %s3771_s25 = sshll.u32 %s3767_s19, 4  ;;  %s3772_s25 = int_to_ptr.hbm [resolvable:$true] %s3771_s25 }
 0x2c7   : > { %4016 = vmatpush.xpose.msk.msra.mxu2 %vm1012_vm3, %v1813_v59  ;;  %s4485_s28 = sshra.s32 %s3772_s25, 4  ;;  %s4486_s28 = int_to_ptr.hbm [resolvable:$true] %s4485_s28 }
 0x2c8   : > { %v1165_v63 = vmul.f32 1.442695, %v1121_v58  ;;  %v5136_v30 = vpop.eup %4177  ;;  %s4487_s14 = scalar_lea.hbm %s4486_s28, 16  ;;  %p4492_p2 = scmp.lt.s32.totalorder %s4486_s28, %s6597_s11 }
 0x2c9   : > { %v1238_v40 = vsel %vm1012_vm3, %v5136_v30, 0.0  ;;  %p4488_p13 = scmp.ne.s32.totalorder %s4486_s28, %s4487_s14  ;;  %p4493_p9 = scmp.lt.s32.totalorder %s4491_s30, %s4487_s14 }
 0x2ca   : > { %1236 = vadd.xlane.f32.xlu2 %v1235_v2  ;;  %4179 = vpow2.f32 %v1165_v63 }
 0x2cb   : > { %p4489_p3 = pnand %p4488_p13, %p4685_p11  ;;  %p4494_p0 = por %p4493_p9, %p4492_p2 }
 0x2cd   : > { %v1054_v25 = vpop.xlane.xlu1 %1053  ;;  %p4490_p10 = pneg %p4489_p3 }
 0x2ce   : > { %v5138_v56 = vpop.f32.mrf.mxu1  ;;  %v1122_v33 = vsub.f32 %v5025_v48, %v1054_v25 }
 0x2cf   : > { %p4495_p1 = pnand %p4494_p0, %p4490_p10 }
 0x2d0   : > { %v1167_v55 = vmul.f32 1.442695, %v1122_v33  ;;  %v5144_v37 = vpop.eup %4179 }
 0x2d1   : > { %v1241_v48 = vsel %vm1012_vm3, %v5144_v37, 0.0 }
 0x2d2   : > { %1239 = vadd.xlane.f32.xlu2 %v1238_v40  ;;  %4181 = vpow2.f32 %v1167_v55 }
 0x2d5   : > { %v1057_v53 = vpop.xlane.xlu1 %1056 }
 0x2d6   : > { %v1123_v2 = vsub.f32 %v5031_v60, %v1057_v53  ;;  %v5147_v58 = vpop.f32.mrf.mxu1 }
 0x2d8   : > { %v1169_v50 = vmul.f32 1.442695, %v1123_v2  ;;  %v5152_v25 = vpop.eup %4181 }
 0x2d9   : > { %v1244_v55 = vsel %vm1012_vm3, %v5152_v25, 0.0 }
 0x2da   : > { %4183 = vpow2.f32 %v1169_v50  ;;  %1242 = vadd.xlane.f32.xlu2 %v1241_v48  ;;  %v5164_v50 = vmul.f32 0.5, %v5096_v45 }
 0x2dd   : > { %v1060_v63 = vpop.xlane.xlu1 %1059 }
 0x2de   : > { %v1124_v33 = vsub.f32 %v5038_v31, %v1060_v63  ;;  %v5155_v40 = vpop.f32.mrf.mxu1  ;;  %v1079_v31 = vsel %vm1012_vm3, %v5164_v50, -inf }
 0x2e0   : > { %v5157_v47 = vpop.eup %4183  ;;  %v1171_v53 = vmul.f32 1.442695, %v1124_v33 }
 0x2e1   : > { %v1247_v60 = vsel %vm1012_vm3, %v5157_v47, 0.0 }
 0x2e2   : > { %4185 = vpow2.f32 %v1171_v53  ;;  %1248 = vadd.xlane.f32.xlu1 %v1247_v60  ;;  %1245 = vadd.xlane.f32.xlu2 %v1244_v55  ;;  %v5174_v53 = vmul.f32 0.5, %v5103_v0 }
 0x2e5   : > { %v1207_v59 = vpop.xlane.xlu2 %1206  ;;  %v1063_v2 = vpop.xlane.xlu1 %1062 }
 0x2e6   : > { %4187 = vrcp.f32 %v1207_v59  ;;  %v1125_v63 = vsub.f32 %v5045_v54, %v1063_v2  ;;  %v977_v33 = vpop.f32.mrf.mxu1  ;;  %v1082_v54 = vsel %vm1012_vm3, %v5174_v53, -inf  ;;  %v1312_v2 = vand.u32 2147483648, %v1207_v59 }
 0x2e7   : > { %v5176_v45 = vmul.f32 0.5, %v977_v33  ;;  %v1310_v33 = vand.u32 2147483647, %v1207_v59  ;;  %vm1306_vm5 = vweird.f32 %v1207_v59 }
 0x2e8   : > { %v5168_v48 = vpop.eup %4185  ;;  %v1173_v55 = vmul.f32 1.442695, %v1125_v63  ;;  %v5185_v63 = vmul.f32 0.5, %v5110_v39  ;;  %v1313_v26 = vor.u32 1.1754944e-38, %v1312_v2 }
 0x2e9   : > { %v1250_v44 = vsel %vm1012_vm3, %v5168_v48, 0.0  ;;  %vm1311_vm7 = vcmp.eq.f32.partialorder %v1310_v33, 8.507059e+37 }
 0x2ea   : > { %1251 = vadd.xlane.f32.xlu1 %v1250_v44  ;;  %1080 = vmax.xlane.f32.xlu2 %v1079_v31  ;;  %v1106_v44 = vsel %vm1012_vm3, %v5176_v45, -inf }
 0x2ec   : > { %v4188_v60 = vpop.eup %4187 }
 0x2ed   : > { %v1302_v41 = vmul.f32 %v4188_v60, %v1207_v59  ;;  %v1210_v38 = vpop.xlane.xlu2 %1209  ;;  %v1066_v35 = vpop.xlane.xlu1 %1065  ;;  %vm1307_vm4 = vweird.f32 %v4188_v60 }
 0x2ee   : > { %4189 = vrcp.f32 %v1210_v38  ;;  %v1126_v0 = vsub.f32 %v5054_v34, %v1066_v35  ;;  %vm1308_vm6 = vmor %vm1306_vm5, %vm1307_vm4  ;;  %vm1321_vm9 = vweird.f32 %v1210_v38 }
 0x2ef   : > { %v1303_v32 = vsub.f32 1.0, %v1302_v41  ;;  %4191 = vpow2.f32 %v1173_v55 }
 0x2f0   : > { %v1175_v19 = vmul.f32 1.442695, %v1126_v0  ;;  %v1327_v0 = vand.u32 2147483648, %v1210_v38 }
 0x2f1   : > { %v1304_v31 = vmul.f32 %v4188_v60, %v1303_v32 }
 0x2f2   : > { %1083 = vmax.xlane.f32.xlu2 %v1082_v54  ;;  %1107 = vmax.xlane.f32.xlu1 %v1106_v44  ;;  %v1085_v44 = vsel %vm1012_vm3, %v5185_v63, -inf  ;;  %v1328_v33 = vor.u32 1.1754944e-38, %v1327_v0 }
 0x2f3   : > { %v1305_v41 = vadd.f32 %v4188_v60, %v1304_v31 }
 0x2f4   : > { %v4190_v29 = vpop.eup %4189 }
 0x2f5   : > { %v1317_v18 = vmul.f32 %v4190_v29, %v1210_v38  ;;  %v5187_v55 = vpop.xlane.xlu2 %1212  ;;  %v1069_v35 = vpop.xlane.xlu1 %1068  ;;  %v1309_v34 = vsel %vm1308_vm6, %v4188_v60, %v1305_v41  ;;  %vm1322_vm8 = vweird.f32 %v4190_v29 }
 0x2f6   : > { %v5189_v32 = vpop.eup %4191  ;;  %4193 = vrcp.f32 %v5187_v55  ;;  %v1314_v39 = vsel %vm1311_vm7, %v1313_v26, %v1309_v34  ;;  %v1127_v60 = vsub.f32 %v5063_v42, %v1069_v35  ;;  %v1325_v26 = vand.u32 2147483647, %v1210_v38  ;;  %vm1323_vm10 = vmor %vm1321_vm9, %vm1322_vm8 }
 0x2f7   : > { %v1318_v59 = vsub.f32 1.0, %v1317_v18  ;;  %v1315_v54 = vmul.f32 %v5047_v27, %v1314_v39  ;;  %4195 = vpow2.f32 %v1175_v19  ;;  %v1253_v2 = vsel %vm1012_vm3, %v5189_v32, 0.0 }
 0x2f8   : > { %v5207_v18 = vmul.f32 0.5, %v5117_v43  ;;  %v1177_v42 = vmul.f32 1.442695, %v1127_v60  ;;  %vm1326_vm11 = vcmp.eq.f32.partialorder %v1325_v26, 8.507059e+37  ;;  %v1342_v0 = vand.u32 2147483648, %v5187_v55 }
 0x2f9   : > { %1781 = vst.msk [vmem:[%s5194_s29] sm:$0xff] %vm1012_vm3, %v1315_v54  ;;  %4017 = vmatmul.msk.f32.vlgmr.msra.gmra.mxu2 %vm1012_vm3, %v1315_v54  ;;  %v1319_v31 = vmul.f32 %v4190_v29, %v1318_v59  ;;  %vm1336_vm13 = vweird.f32 %v5187_v55 }
 0x2fa   : > { %1086 = vmax.xlane.f32.xlu2 %v1085_v44  ;;  %1254 = vadd.xlane.f32.xlu1 %v1253_v2  ;;  %v1088_v38 = vsel %vm1012_vm3, %v5207_v18, -inf }
 0x2fb   : > { %v1320_v27 = vadd.f32 %v4190_v29, %v1319_v31  ;;  %v1340_v31 = vand.u32 2147483647, %v5187_v55 }
 0x2fc   : > { %v4194_v19 = vpop.eup %4193 }
 0x2fd   : > { %v1332_v41 = vmul.f32 %v4194_v19, %v5187_v55  ;;  %v1216_v35 = vpop.xlane.xlu2 %1215  ;;  %v1072_v34 = vpop.xlane.xlu1 %1071  ;;  %v1324_v39 = vsel %vm1323_vm10, %v4190_v29, %v1320_v27  ;;  %vm1337_vm12 = vweird.f32 %v4194_v19  ;;  %vm1341_vm15 = vcmp.eq.f32.partialorder %v1340_v31, 8.507059e+37 }
 0x2fe   : > { %v5210_v59 = vpop.eup %4195  ;;  %4197 = vrcp.f32 %v1216_v35  ;;  %v1329_v54 = vsel %vm1326_vm11, %v1328_v33, %v1324_v39  ;;  %v1128_v60 = vsub.f32 %v5072_v49, %v1072_v34  ;;  %vm1338_vm14 = vmor %vm1336_vm13, %vm1337_vm12  ;;  %vm1351_vm4 = vweird.f32 %v1216_v35 }
 0x2ff   : > { %v1333_v44 = vsub.f32 1.0, %v1332_v41  ;;  %v1330_v43 = vmul.f32 %v5056_v22, %v1329_v54  ;;  %4199 = vpow2.f32 %v1177_v42  ;;  %v1256_v29 = vsel %vm1012_vm3, %v5210_v59, 0.0 }
 0x300   : > { %v5224_v22 = vmul.f32 0.5, %v5124_v52  ;;  %v1179_v27 = vmul.f32 1.442695, %v1128_v60  ;;  %v1343_v42 = vor.u32 1.1754944e-38, %v1342_v0  ;;  %v1357_v60 = vand.u32 2147483648, %v1216_v35 }
 0x301   : > { %1782 = vst.msk [vmem:[%s5194_s29 + $0x8] sm:$0xff] %vm1012_vm3, %v1330_v43  ;;  %4018 = vmatmul.msk.f32.gmra.mxu2 %vm1012_vm3, %v1330_v43  ;;  %v1334_v2 = vmul.f32 %v4194_v19, %v1333_v44 }
 0x302   : > { %1089 = vmax.xlane.f32.xlu2 %v1088_v38  ;;  %1257 = vadd.xlane.f32.xlu1 %v1256_v29  ;;  %v1091_v55 = vsel %vm1012_vm3, %v5224_v22, -inf  ;;  %v1355_v29 = vand.u32 2147483647, %v1216_v35 }
 0x303   : > { %v1335_v26 = vadd.f32 %v4194_v19, %v1334_v2 }
 0x304   : > { %v4198_v49 = vpop.eup %4197  ;;  %vm1356_vm6 = vcmp.eq.f32.partialorder %v1355_v29, 8.507059e+37 }
 0x305   : > { %v1347_v33 = vmul.f32 %v4198_v49, %v1216_v35  ;;  %v1219_v41 = vpop.xlane.xlu2 %1218  ;;  %v1075_v34 = vpop.xlane.xlu0 %1074  ;;  %v1339_v39 = vsel %vm1338_vm14, %v4194_v19, %v1335_v26  ;;  %vm1352_vm0 = vweird.f32 %v4198_v49  ;;  %v1358_v26 = vor.u32 1.1754944e-38, %v1357_v60 }
 0x306   : > { %v5227_v54 = vpop.eup %4199  ;;  %4201 = vrcp.f32 %v1219_v41  ;;  %v1344_v44 = vsel %vm1341_vm15, %v1343_v42, %v1339_v39  ;;  %v1129_v38 = vsub.f32 %v5081_v57, %v1075_v34  ;;  %vm1353_vm5 = vmor %vm1351_vm4, %vm1352_vm0  ;;  %v1372_v35 = vand.u32 2147483648, %v1219_v41 }
 0x307   : > { %v1348_v43 = vsub.f32 1.0, %v1347_v33  ;;  %v1345_v52 = vmul.f32 %v5065_v46, %v1344_v44  ;;  %4203 = vpow2.f32 %v1179_v27  ;;  %v1259_v19 = vsel %vm1012_vm3, %v5227_v54, 0.0 }
 0x308   : > { %v5239_v46 = vmul.f32 0.5, %v5131_v20  ;;  %v1181_v57 = vmul.f32 1.442695, %v1129_v38  ;;  %v5252_v38 = vmul.f32 0.5, %v5138_v56  ;;  %vm1366_vm8 = vweird.f32 %v1219_v41 }
 0x309   : > { %1783 = vst.msk [vmem:[%s5194_s29 + $0x10] sm:$0xff] %vm1012_vm3, %v1345_v52  ;;  %4019 = vmatmul.msk.f32.gmra.mxu2 %vm1012_vm3, %v1345_v52  ;;  %v1349_v0 = vmul.f32 %v4198_v49, %v1348_v43 }
 0x30a   : > { %1092 = vmax.xlane.f32.xlu2 %v1091_v55  ;;  %1260 = vadd.xlane.f32.xlu1 %v1259_v19  ;;  %v1094_v20 = vsel %vm1012_vm3, %v5239_v46, -inf  ;;  %v1370_v55 = vand.u32 2147483647, %v1219_v41  ;;  %v1373_v19 = vor.u32 1.1754944e-38, %v1372_v35  ;;  %v1097_v56 = vsel %vm1012_vm3, %v5252_v38, -inf }
 0x30b   : > { %v1350_v2 = vadd.f32 %v4198_v49, %v1349_v0 }
 0x30c   : > { %v4202_v31 = vpop.eup %4201  ;;  %vm1371_vm10 = vcmp.eq.f32.partialorder %v1370_v55, 8.507059e+37 }
 0x30d   : > { %v1362_v27 = vmul.f32 %v4202_v31, %v1219_v41  ;;  %v1222_v42 = vpop.xlane.xlu2 %1221  ;;  %v1354_v33 = vsel %vm1353_vm5, %v4198_v49, %v1350_v2  ;;  %v5241_v34 = vpop.eup %4203  ;;  %vm1367_vm7 = vweird.f32 %v4202_v31 }
 0x30e   : > { %4205 = vrcp.f32 %v1222_v42  ;;  %v1359_v39 = vsel %vm1356_vm6, %v1358_v26, %v1354_v33  ;;  %v1262_v49 = vsel %vm1012_vm3, %v5241_v34, 0.0  ;;  %vm1368_vm9 = vmor %vm1366_vm8, %vm1367_vm7  ;;  %vm1381_vm12 = vweird.f32 %v1222_v42 }
 0x30f   : > { %v1363_v44 = vsub.f32 1.0, %v1362_v27  ;;  %v1360_v43 = vmul.f32 %v5074_v15, %v1359_v39  ;;  %4207 = vpow2.f32 %v1181_v57 }
 0x311   : > { %1784 = vst.msk [vmem:[%s5194_s29 + $0x18] sm:$0xff] %vm1012_vm3, %v1360_v43  ;;  %4020 = vmatmul.msk.f32.gmra.mxu2 %vm1012_vm3, %v1360_v43  ;;  %v1364_v52 = vmul.f32 %v4202_v31, %v1363_v44  ;;  %v1387_v44 = vand.u32 2147483648, %v1222_v42 }
 0x312   : > { %1095 = vmax.xlane.f32.xlu2 %v1094_v20  ;;  %1263 = vadd.xlane.f32.xlu1 %v1262_v49  ;;  %v1385_v20 = vand.u32 2147483647, %v1222_v42 }
 0x313   : > { %v1365_v15 = vadd.f32 %v4202_v31, %v1364_v52  ;;  %v1388_v35 = vor.u32 1.1754944e-38, %v1387_v44 }
 0x314   : > { %v4206_v60 = vpop.eup %4205  ;;  %vm1386_vm14 = vcmp.eq.f32.partialorder %v1385_v20, 8.507059e+37 }
 0x315   : > { %v1377_v0 = vmul.f32 %v4206_v60, %v1222_v42  ;;  %v1078_v29 = vpop.xlane.xlu2 %1077  ;;  %v1369_v2 = vsel %vm1368_vm9, %v4202_v31, %v1365_v15  ;;  %v5254_v57 = vpop.eup %4207  ;;  %vm1382_vm11 = vweird.f32 %v4206_v60  ;;  %v5279_v42 = vmul.f32 0.5, %v5155_v40 }
 0x316   : > { %v1130_v26 = vsub.f32 %v5094_v36, %v1078_v29  ;;  %v1374_v27 = vsel %vm1371_vm10, %v1373_v19, %v1369_v2  ;;  %v1265_v31 = vsel %vm1012_vm3, %v5254_v57, 0.0  ;;  %vm1383_vm13 = vmor %vm1381_vm12, %vm1382_vm11 }
 0x317   : > { %v1378_v33 = vsub.f32 1.0, %v1377_v0  ;;  %v1375_v39 = vmul.f32 %v5083_v51, %v1374_v27  ;;  %v5266_v51 = vmul.f32 0.5, %v5147_v58 }
 0x318   : > { %v1183_v41 = vmul.f32 1.442695, %v1130_v26  ;;  %v1103_v26 = vsel %vm1012_vm3, %v5279_v42, -inf }
 0x319   : > { %1785 = vst.msk [vmem:[%s5194_s29 + $0x20] sm:$0xff] %vm1012_vm3, %v1375_v39  ;;  %4021 = vmatmul.msk.f32.gmra.mxu2 %vm1012_vm3, %v1375_v39  ;;  %v1379_v43 = vmul.f32 %v4206_v60, %v1378_v33  ;;  %v1100_v19 = vsel %vm1012_vm3, %v5266_v51, -inf }
 0x31a   : > { %4209 = vpow2.f32 %v1183_v41  ;;  %1098 = vmax.xlane.f32.xlu2 %v1097_v56  ;;  %1266 = vadd.xlane.f32.xlu1 %v1265_v31 }
 0x31b   : > { %v1380_v36 = vadd.f32 %v4206_v60, %v1379_v43 }
 0x31d   : > { %v1225_v49 = vpop.xlane.xlu2 %1224  ;;  %v1384_v52 = vsel %vm1383_vm13, %v4206_v60, %v1380_v36 }
 0x31e   : > { %4211 = vrcp.f32 %v1225_v49  ;;  %v1389_v55 = vsel %vm1386_vm14, %v1388_v35, %v1384_v52  ;;  %v1402_v27 = vand.u32 2147483648, %v1225_v49  ;;  %v1400_v39 = vand.u32 2147483647, %v1225_v49 }
 0x31f   : > { %v1390_v15 = vmul.f32 %v5089_v28, %v1389_v55  ;;  %vm1396_vm0 = vweird.f32 %v1225_v49 }
 0x320   : > { %v5271_v0 = vpop.eup %4209  ;;  %v1403_v44 = vor.u32 1.1754944e-38, %v1402_v27  ;;  %vm1401_vm5 = vcmp.eq.f32.partialorder %v1400_v39, 8.507059e+37 }
 0x321   : > { %1786 = vst.msk [vmem:[%s5194_s29 + $0x28] sm:$0xff] %vm1012_vm3, %v1390_v15  ;;  %4022 = vmatmul.msk.f32.gmra.mxu2 %vm1012_vm3, %v1390_v15  ;;  %v1268_v58 = vsel %vm1012_vm3, %v5271_v0, 0.0 }
 0x322   : > { %1101 = vmax.xlane.f32.xlu2 %v1100_v19  ;;  %1269 = vadd.xlane.f32.xlu1 %v1268_v58 }
 0x324   : > { %v4212_v60 = vpop.eup %4211 }
 0x325   : > { %v1392_v29 = vmul.f32 %v4212_v60, %v1225_v49  ;;  %v1228_v28 = vpop.xlane.xlu2 %1227  ;;  %vm1397_vm15 = vweird.f32 %v4212_v60 }
 0x326   : > { %4213 = vrcp.f32 %v1228_v28  ;;  %vm1398_vm4 = vmor %vm1396_vm0, %vm1397_vm15  ;;  %v1417_v52 = vand.u32 2147483648, %v1228_v28  ;;  %v1415_v49 = vand.u32 2147483647, %v1228_v28  ;;  %vm1411_vm7 = vweird.f32 %v1228_v28 }
 0x327   : > { %v1393_v2 = vsub.f32 1.0, %v1392_v29 }
 0x328   : > { %v1418_v58 = vor.u32 1.1754944e-38, %v1417_v52  ;;  %vm1416_vm9 = vcmp.eq.f32.partialorder %v1415_v49, 8.507059e+37 }
 0x329   : > { %v1394_v33 = vmul.f32 %v4212_v60, %v1393_v2 }
 0x32a   : > { %1104 = vmax.xlane.f32.xlu2 %v1103_v26 }
 0x32b   : > { %v1395_v56 = vadd.f32 %v4212_v60, %v1394_v33 }
 0x32c   : > { %v4214_v41 = vpop.eup %4213 }
 0x32d   : > { %v1407_v40 = vmul.f32 %v4214_v41, %v1228_v28  ;;  %v1231_v31 = vpop.xlane.xlu2 %1230  ;;  %v1399_v43 = vsel %vm1398_vm4, %v4212_v60, %v1395_v56  ;;  %vm1412_vm6 = vweird.f32 %v4214_v41 }
 0x32e   : > { %4215 = vrcp.f32 %v1231_v31  ;;  %v1404_v20 = vsel %vm1401_vm5, %v1403_v44, %v1399_v43  ;;  %vm1413_vm8 = vmor %vm1411_vm7, %vm1412_vm6  ;;  %v1432_v33 = vand.u32 2147483648, %v1231_v31  ;;  %v1430_v28 = vand.u32 2147483647, %v1231_v31 }
 0x32f   : > { %v1408_v36 = vsub.f32 1.0, %v1407_v40  ;;  %v1405_v35 = vmul.f32 %v5101_v24, %v1404_v20  ;;  %vm1426_vm11 = vweird.f32 %v1231_v31 }
 0x330   : > { %v1433_v40 = vor.u32 1.1754944e-38, %v1432_v33  ;;  %vm1431_vm13 = vcmp.eq.f32.partialorder %v1430_v28, 8.507059e+37 }
 0x331   : > { %v1409_v55 = vmul.f32 %v4214_v41, %v1408_v36  ;;  %1787 = vst.msk [vmem:[%s5194_s29 + $0x30] sm:$0xff] %vm1012_vm3, %v1405_v35  ;;  %4023 = vmatmul.msk.f32.gmra.mxu2 %vm1012_vm3, %v1405_v35 }
 0x333   : > { %v1410_v15 = vadd.f32 %v4214_v41, %v1409_v55 }
 0x334   : > { %v4216_v19 = vpop.eup %4215 }
 0x335   : > { %v1422_v60 = vmul.f32 %v4216_v19, %v1231_v31  ;;  %v1234_v29 = vpop.xlane.xlu2 %1233  ;;  %v1414_v2 = vsel %vm1413_vm8, %v4214_v41, %v1410_v15  ;;  %vm1427_vm10 = vweird.f32 %v4216_v19 }
 0x336   : > { %4217 = vrcp.f32 %v1234_v29  ;;  %v1419_v24 = vsel %vm1416_vm9, %v1418_v58, %v1414_v2  ;;  %vm1428_vm12 = vmor %vm1426_vm11, %vm1427_vm10  ;;  %v1447_v52 = vand.u32 2147483648, %v1234_v29  ;;  %v1445_v31 = vand.u32 2147483647, %v1234_v29 }
 0x337   : > { %v1423_v26 = vsub.f32 1.0, %v1422_v60  ;;  %v1420_v27 = vmul.f32 %v5108_v62, %v1419_v24  ;;  %vm1441_vm15 = vweird.f32 %v1234_v29 }
 0x338   : > { %v1448_v58 = vor.u32 1.1754944e-38, %v1447_v52  ;;  %vm1446_vm4 = vcmp.eq.f32.partialorder %v1445_v31, 8.507059e+37 }
 0x339   : > { %v1424_v39 = vmul.f32 %v4216_v19, %v1423_v26  ;;  %1788 = vst.msk [vmem:[%s5194_s29 + $0x38] sm:$0xff] %vm1012_vm3, %v1420_v27  ;;  %4024 = vmatmul.msk.f32.gmra.mxu2 %vm1012_vm3, %v1420_v27 }
 0x33b   : > { %v1425_v56 = vadd.f32 %v4216_v19, %v1424_v39 }
 0x33c   : > { %v4218_v44 = vpop.eup %4217 }
 0x33d   : > { %v1437_v41 = vmul.f32 %v4218_v44, %v1234_v29  ;;  %v1237_v43 = vpop.xlane.xlu2 %1236  ;;  %v1429_v20 = vsel %vm1428_vm12, %v4216_v19, %v1425_v56  ;;  %vm1442_vm14 = vweird.f32 %v4218_v44 }
 0x33e   : > { %4219 = vrcp.f32 %v1237_v43  ;;  %v1434_v62 = vsel %vm1431_vm13, %v1433_v40, %v1429_v20  ;;  %vm1443_vm0 = vmor %vm1441_vm15, %vm1442_vm14  ;;  %v1462_v27 = vand.u32 2147483648, %v1237_v43  ;;  %v1460_v29 = vand.u32 2147483647, %v1237_v43 }
 0x33f   : > { %v1438_v36 = vsub.f32 1.0, %v1437_v41  ;;  %v1435_v35 = vmul.f32 %v5115_v21, %v1434_v62  ;;  %vm1456_vm6 = vweird.f32 %v1237_v43 }
 0x340   : > { %v1463_v56 = vor.u32 1.1754944e-38, %v1462_v27  ;;  %vm1461_vm8 = vcmp.eq.f32.partialorder %v1460_v29, 8.507059e+37 }
 0x341   : > { %v1439_v55 = vmul.f32 %v4218_v44, %v1438_v36  ;;  %1789 = vst.msk [vmem:[%s5194_s29 + $0x40] sm:$0xff] %vm1012_vm3, %v1435_v35  ;;  %4025 = vmatmul.msk.f32.gmra.mxu2 %vm1012_vm3, %v1435_v35 }
 0x343   : > { %v1440_v49 = vadd.f32 %v4218_v44, %v1439_v55 }
 0x344   : > { %v4220_v15 = vpop.eup %4219 }
 0x345   : > { %v1452_v19 = vmul.f32 %v4220_v15, %v1237_v43  ;;  %v1240_v60 = vpop.xlane.xlu2 %1239  ;;  %v1444_v2 = vsel %vm1443_vm0, %v4218_v44, %v1440_v49  ;;  %vm1457_vm5 = vweird.f32 %v4220_v15 }
 0x346   : > { %4221 = vrcp.f32 %v1240_v60  ;;  %v1449_v21 = vsel %vm1446_vm4, %v1448_v58, %v1444_v2  ;;  %vm1458_vm7 = vmor %vm1456_vm6, %vm1457_vm5  ;;  %v1477_v35 = vand.u32 2147483648, %v1240_v60  ;;  %v1475_v43 = vand.u32 2147483647, %v1240_v60 }
 0x347   : > { %v1453_v24 = vsub.f32 1.0, %v1452_v19  ;;  %v1450_v26 = vmul.f32 %v5122_v1, %v1449_v21  ;;  %vm1471_vm10 = vweird.f32 %v1240_v60 }
 0x348   : > { %v1478_v31 = vor.u32 1.1754944e-38, %v1477_v35  ;;  %vm1476_vm12 = vcmp.eq.f32.partialorder %v1475_v43, 8.507059e+37 }
 0x349   : > { %v1454_v33 = vmul.f32 %v4220_v15, %v1453_v24  ;;  %1790 = vst.msk [vmem:[%s5194_s29 + $0x48] sm:$0xff] %vm1012_vm3, %v1450_v26  ;;  %4026 = vmatmul.msk.f32.gmra.mxu2 %vm1012_vm3, %v1450_v26 }
 0x34b   : > { %v1455_v39 = vadd.f32 %v4220_v15, %v1454_v33 }
 0x34c   : > { %v4222_v28 = vpop.eup %4221 }
 0x34d   : > { %v1467_v44 = vmul.f32 %v4222_v28, %v1240_v60  ;;  %v1243_v40 = vpop.xlane.xlu2 %1242  ;;  %v1459_v41 = vsel %vm1458_vm7, %v4220_v15, %v1455_v39  ;;  %vm1472_vm9 = vweird.f32 %v4222_v28 }
 0x34e   : > { %4223 = vrcp.f32 %v1243_v40  ;;  %v1464_v1 = vsel %vm1461_vm8, %v1463_v56, %v1459_v41  ;;  %vm1473_vm11 = vmor %vm1471_vm10, %vm1472_vm9  ;;  %v1492_v26 = vand.u32 2147483648, %v1243_v40  ;;  %v1490_v60 = vand.u32 2147483647, %v1243_v40 }
 0x34f   : > { %v1468_v20 = vsub.f32 1.0, %v1467_v44  ;;  %v1465_v62 = vmul.f32 %v5129_v61, %v1464_v1  ;;  %vm1486_vm14 = vweird.f32 %v1243_v40 }
 0x350   : > { %v1493_v39 = vor.u32 1.1754944e-38, %v1492_v26  ;;  %vm1491_vm0 = vcmp.eq.f32.partialorder %v1490_v60, 8.507059e+37 }
 0x351   : > { %v1469_v36 = vmul.f32 %v4222_v28, %v1468_v20  ;;  %1791 = vst.msk [vmem:[%s5194_s29 + $0x50] sm:$0xff] %vm1012_vm3, %v1465_v62  ;;  %4027 = vmatmul.msk.f32.gmra.mxu2 %vm1012_vm3, %v1465_v62 }
 0x353   : > { %v1470_v52 = vadd.f32 %v4222_v28, %v1469_v36 }
 0x354   : > { %v4224_v55 = vpop.eup %4223 }
 0x355   : > { %v1482_v49 = vmul.f32 %v4224_v55, %v1243_v40  ;;  %v1249_v15 = vpop.xlane.xlu1 %1248  ;;  %v1246_v58 = vpop.xlane.xlu2 %1245  ;;  %v1474_v19 = vsel %vm1473_vm11, %v4222_v28, %v1470_v52  ;;  %vm1487_vm13 = vweird.f32 %v4224_v55 }
 0x356   : > { %4225 = vrcp.f32 %v1249_v15  ;;  %v1479_v2 = vsel %vm1476_vm12, %v1478_v31, %v1474_v19  ;;  %vm1488_vm15 = vmor %vm1486_vm14, %vm1487_vm13  ;;  %v1522_v40 = vand.u32 2147483648, %v1249_v15  ;;  %v1507_v35 = vand.u32 2147483648, %v1246_v58 }
 0x357   : > { %v1483_v61 = vsub.f32 1.0, %v1482_v49  ;;  %4227 = vrcp.f32 %v1246_v58  ;;  %v1480_v21 = vmul.f32 %v5136_v30, %v1479_v2  ;;  %v1520_v49 = vand.u32 2147483647, %v1249_v15 }
 0x358   : > { %vm1516_vm6 = vweird.f32 %v1249_v15  ;;  %v1523_v2 = vor.u32 1.1754944e-38, %v1522_v40  ;;  %vm1501_vm7 = vweird.f32 %v1246_v58 }
 0x359   : > { %v1484_v24 = vmul.f32 %v4224_v55, %v1483_v61  ;;  %1792 = vst.msk [vmem:[%s5194_s29 + $0x58] sm:$0xff] %vm1012_vm3, %v1480_v21  ;;  %4028 = vmatmul.msk.f32.gmra.mxu2 %vm1012_vm3, %v1480_v21  ;;  %vm1521_vm10 = vcmp.eq.f32.partialorder %v1520_v49, 8.507059e+37 }
 0x35b   : > { %v1485_v27 = vadd.f32 %v4224_v55, %v1484_v24 }
 0x35c   : > { %v4226_v33 = vpop.eup %4225 }
 0x35d   : > { %v4228_v29 = vpop.eup %4227  ;;  %v1512_v28 = vmul.f32 %v4226_v33, %v1249_v15  ;;  %v5307_v56 = vpop.xlane.xlu1 %1251  ;;  %v1489_v41 = vsel %vm1488_vm15, %v4224_v55, %v1485_v27  ;;  %vm1517_vm4 = vweird.f32 %v4226_v33  ;;  %v1505_v55 = vand.u32 2147483647, %v1246_v58 }
 0x35e   : > { %v1081_v44 = vpop.xlane.xlu2 %1080  ;;  %v1497_v30 = vmul.f32 %v4228_v29, %v1246_v58  ;;  %4229 = vrcp.f32 %v5307_v56  ;;  %v1494_v62 = vsel %vm1491_vm0, %v1493_v39, %v1489_v41  ;;  %vm1502_vm5 = vweird.f32 %v4228_v29  ;;  %vm1518_vm8 = vmor %vm1516_vm6, %vm1517_vm4 }
 0x35f   : > { %v1513_v1 = vsub.f32 1.0, %v1512_v28  ;;  %v1131_v20 = vsub.f32 %v5164_v50, %v1081_v44  ;;  %v1495_v43 = vmul.f32 %v5144_v37, %v1494_v62  ;;  %v1508_v37 = vor.u32 1.1754944e-38, %v1507_v35  ;;  %vm1503_vm9 = vmor %vm1501_vm7, %vm1502_vm5 }
 0x360   : > { %v1498_v36 = vsub.f32 1.0, %v1497_v30  ;;  %vm1506_vm11 = vcmp.eq.f32.partialorder %v1505_v55, 8.507059e+37  ;;  %v1537_v40 = vand.u32 2147483648, %v5307_v56  ;;  %vm1531_vm13 = vweird.f32 %v5307_v56 }
 0x361   : > { %v1514_v52 = vmul.f32 %v4226_v33, %v1513_v1  ;;  %v1185_v31 = vmul.f32 1.442695, %v1131_v20  ;;  %1793 = vst.msk [vmem:[%s5194_s29 + $0x60] sm:$0xff] %vm1012_vm3, %v1495_v43  ;;  %4029 = vmatmul.msk.f32.gmra.mxu2 %vm1012_vm3, %v1495_v43 }
 0x362   : > { %v1499_v19 = vmul.f32 %v4228_v29, %v1498_v36 }
 0x363   : > { %4231 = vpow2.f32 %v1185_v31  ;;  %v1515_v50 = vadd.f32 %v4226_v33, %v1514_v52 }
 0x364   : > { %v4230_v61 = vpop.eup %4229  ;;  %v1500_v21 = vadd.f32 %v4228_v29, %v1499_v19 }
 0x365   : > { %v1527_v24 = vmul.f32 %v4230_v61, %v5307_v56  ;;  %v5316_v60 = vpop.xlane.xlu1 %1107  ;;  %v1519_v27 = vsel %vm1518_vm8, %v4226_v33, %v1515_v50  ;;  %vm1532_vm12 = vweird.f32 %v4230_v61  ;;  %v1538_v33 = vor.u32 1.1754944e-38, %v1537_v40 }
 0x366   : > { %v1084_v26 = vpop.xlane.xlu2 %1083  ;;  %v1504_v39 = vsel %vm1503_vm9, %v4228_v29, %v1500_v21  ;;  %v1524_v28 = vsel %vm1521_vm10, %v1523_v2, %v1519_v27  ;;  %vm1533_vm14 = vmor %vm1531_vm13, %vm1532_vm12 }
 0x367   : > { %v1132_v15 = vsub.f32 %v5174_v53, %v1084_v26  ;;  %v1528_v44 = vsub.f32 1.0, %v1527_v24  ;;  %v1509_v58 = vsel %vm1506_vm11, %v1508_v37, %v1504_v39  ;;  %v1525_v41 = vmul.f32 %v5157_v47, %v1524_v28 }
 0x368   : > { %v1510_v1 = vmul.f32 %v5152_v25, %v1509_v58  ;;  %v1535_v47 = vand.u32 2147483647, %v5307_v56 }
 0x369   : > { %v1187_v30 = vmul.f32 1.442695, %v1132_v15  ;;  %v5321_v20 = vpop.eup %4231  ;;  %v1529_v62 = vmul.f32 %v4230_v61, %v1528_v44  ;;  %1795 = vst.msk [vmem:[%s5194_s29 + $0x70] sm:$0xff] %vm1012_vm3, %v1525_v41 }
 0x36a   : > { %1794 = vst.msk [vmem:[%s5194_s29 + $0x68] sm:$0xff] %vm1012_vm3, %v1510_v1  ;;  %4030 = vmatmul.msk.f32.gmra.mxu2 %vm1012_vm3, %v1510_v1  ;;  %v1271_v53 = vsel %vm1012_vm3, %v5321_v20, 0.0  ;;  %vm1536_vm15 = vcmp.eq.f32.partialorder %v1535_v47, 8.507059e+37 }
 0x36b   : > { %4233 = vpow2.f32 %v1187_v30  ;;  %1272 = vadd.xlane.f32.xlu1 %v1271_v53  ;;  %v1530_v25 = vadd.f32 %v4230_v61, %v1529_v62 }
 0x36d   : > { %v1255_v36 = vpop.xlane.xlu1 %1254  ;;  %v1534_v35 = vsel %vm1533_vm14, %v4230_v61, %v1530_v25 }
 0x36e   : > { %v1087_v29 = vpop.xlane.xlu2 %1086  ;;  %4235 = vrcp.f32 %v1255_v36  ;;  %v1539_v52 = vsel %vm1536_vm15, %v1538_v33, %v1534_v35  ;;  %v1552_v26 = vand.u32 2147483648, %v1255_v36  ;;  %v1550_v15 = vand.u32 2147483647, %v1255_v36 }
 0x36f   : > { %v1133_v43 = vsub.f32 %v5185_v63, %v1087_v29  ;;  %v1540_v19 = vmul.f32 %v5168_v48, %v1539_v52  ;;  %vm1546_vm4 = vweird.f32 %v1255_v36 }
 0x370   : > { %v1553_v44 = vor.u32 1.1754944e-38, %v1552_v26  ;;  %vm1551_vm6 = vcmp.eq.f32.partialorder %v1550_v15, 8.507059e+37 }
 0x371   : > { %v5334_v31 = vpop.eup %4233  ;;  %v1189_v49 = vmul.f32 1.442695, %v1133_v43  ;;  %1796 = vst.msk [vmem:[%s5194_s29 + $0x78] sm:$0xff] %vm1012_vm3, %v1540_v19 }
 0x372   : > { %v1274_v56 = vsel %vm1012_vm3, %v5334_v31, 0.0  ;;  %4031 = vmatmul.msk.f32.gmra.mxu2 %vm1012_vm3, %v1525_v41 }
 0x373   : > { %4237 = vpow2.f32 %v1189_v49  ;;  %1275 = vadd.xlane.f32.xlu1 %v1274_v56 }
 0x374   : > { %v4236_v55 = vpop.eup %4235 }
 0x375   : > { %v1542_v50 = vmul.f32 %v4236_v55, %v1255_v36  ;;  %v1258_v61 = vpop.xlane.xlu1 %1257  ;;  %vm1547_vm0 = vweird.f32 %v4236_v55 }
 0x376   : > { %v1090_v63 = vpop.xlane.xlu2 %1089  ;;  %4239 = vrcp.f32 %v1258_v61  ;;  %vm1548_vm5 = vmor %vm1546_vm4, %vm1547_vm0  ;;  %v1567_v29 = vand.u32 2147483648, %v1258_v61  ;;  %v1565_v35 = vand.u32 2147483647, %v1258_v61  ;;  %vm1561_vm8 = vweird.f32 %v1258_v61 }
 0x377   : > { %v1134_v2 = vsub.f32 %v5207_v18, %v1090_v63  ;;  %v1543_v21 = vsub.f32 1.0, %v1542_v50 }
 0x378   : > { %vm1566_vm10 = vcmp.eq.f32.partialorder %v1565_v35, 8.507059e+37 }
 0x379   : > { %v5343_v37 = vpop.eup %4237  ;;  %v1191_v48 = vmul.f32 1.442695, %v1134_v2  ;;  %v1544_v24 = vmul.f32 %v4236_v55, %v1543_v21 }
 0x37a   : > { %v1277_v27 = vsel %vm1012_vm3, %v5343_v37, 0.0  ;;  %4032 = vmatmul.msk.f32.gmra.mxu2 %vm1012_vm3, %v1540_v19 }
 0x37b   : > { %4241 = vpow2.f32 %v1191_v48  ;;  %1278 = vadd.xlane.f32.xlu1 %v1277_v27  ;;  %v1545_v39 = vadd.f32 %v4236_v55, %v1544_v24 }
 0x37c   : > { %v4240_v28 = vpop.eup %4239  ;;  %v5348_v18 = vpop.f32.mrf.mxu2 }
 0x37d   : > { %v1557_v58 = vmul.f32 %v4240_v28, %v1258_v61  ;;  %v1261_v30 = vpop.xlane.xlu1 %1260  ;;  %v1549_v1 = vsel %vm1548_vm5, %v4236_v55, %v1545_v39  ;;  %vm1562_vm7 = vweird.f32 %v4240_v28  ;;  %v2026_v26 = vsel %vm766_vm2, %v5348_v18, 0.0 }
 0x37e   : > { %v1093_v41 = vpop.xlane.xlu2 %1092  ;;  %4243 = vrcp.f32 %v1261_v30  ;;  %v1554_v40 = vsel %vm1551_vm6, %v1553_v44, %v1549_v1  ;;  %vm1563_vm9 = vmor %vm1561_vm8, %vm1562_vm7  ;;  %v1582_v24 = vand.u32 2147483648, %v1261_v30  ;;  %v1580_v27 = vand.u32 2147483647, %v1261_v30 }
 0x37f   : > { %v1558_v62 = vsub.f32 1.0, %v1557_v58  ;;  %v1135_v47 = vsub.f32 %v5224_v22, %v1093_v41  ;;  %v1555_v25 = vmul.f32 %v5189_v32, %v1554_v40  ;;  %v1568_v32 = vor.u32 1.1754944e-38, %v1567_v29 }
 0x380   : > { %vm1576_vm12 = vweird.f32 %v1261_v30  ;;  %vm1581_vm14 = vcmp.eq.f32.partialorder %v1580_v27, 8.507059e+37 }
 0x381   : > { %v5350_v53 = vpop.eup %4241  ;;  %v1559_v33 = vmul.f32 %v4240_v28, %v1558_v62  ;;  %1797 = vst.msk [vmem:[%s5194_s29 + $0x80] sm:$0xff] %vm1012_vm3, %v1555_v25  ;;  %v1193_v49 = vmul.f32 1.442695, %v1135_v47 }
 0x382   : > { %v1280_v36 = vsel %vm1012_vm3, %v5350_v53, 0.0  ;;  %4033 = vmatmul.msk.f32.gmra.mxu2 %vm1012_vm3, %v1555_v25 }
 0x383   : > { %1281 = vadd.xlane.f32.xlu2 %v1280_v36  ;;  %v1560_v43 = vadd.f32 %v4240_v28, %v1559_v33 }
 0x384   : > { %v4244_v52 = vpop.eup %4243  ;;  %v5359_v19 = vpop.f32.mrf.mxu2 }
 0x385   : > { %v1572_v22 = vmul.f32 %v4244_v52, %v1261_v30  ;;  %v1264_v55 = vpop.xlane.xlu1 %1263  ;;  %v1564_v50 = vsel %vm1563_vm9, %v4240_v28, %v1560_v43  ;;  %vm1577_vm11 = vweird.f32 %v4244_v52 }
 0x386   : > { %v1096_v56 = vpop.xlane.xlu2 %1095  ;;  %4245 = vrcp.f32 %v1264_v55  ;;  %v1569_v2 = vsel %vm1566_vm10, %v1568_v32, %v1564_v50  ;;  %vm1578_vm13 = vmor %vm1576_vm12, %vm1577_vm11  ;;  %v1597_v29 = vand.u32 2147483648, %v1264_v55  ;;  %v1595_v35 = vand.u32 2147483647, %v1264_v55 }
 0x387   : > { %v1573_v63 = vsub.f32 1.0, %v1572_v22  ;;  %4247 = vpow2.f32 %v1193_v49  ;;  %v1136_v21 = vsub.f32 %v5239_v46, %v1096_v56  ;;  %v1570_v61 = vmul.f32 %v5210_v59, %v1569_v2 }
 0x388   : > { %v1583_v46 = vor.u32 1.1754944e-38, %v1582_v24  ;;  %vm1591_vm0 = vweird.f32 %v1264_v55  ;;  %vm1596_vm5 = vcmp.eq.f32.partialorder %v1595_v35, 8.507059e+37 }
 0x389   : > { %v1574_v48 = vmul.f32 %v4244_v52, %v1573_v63  ;;  %1798 = vst.msk [vmem:[%s5194_s29 + $0x88] sm:$0xff] %vm1012_vm3, %v1570_v61  ;;  %v1195_v28 = vmul.f32 1.442695, %v1136_v21 }
 0x38a   : > { %4034 = vmatmul.msk.f32.gmra.mxu2 %vm1012_vm3, %v1570_v61 }
 0x38b   : > { %2027 = vadd.xlane.f32.xlu2 %v2026_v26  ;;  %v1575_v15 = vadd.f32 %v4244_v52, %v1574_v48 }
 0x38c   : > { %v4246_v39 = vpop.eup %4245  ;;  %v5370_v62 = vpop.f32.mrf.mxu2 }
 0x38d   : > { %v1587_v44 = vmul.f32 %v4246_v39, %v1264_v55  ;;  %v1267_v58 = vpop.xlane.xlu1 %1266  ;;  %v1579_v41 = vsel %vm1578_vm13, %v4244_v52, %v1575_v15  ;;  %v5368_v1 = vpop.eup %4247  ;;  %vm1592_vm15 = vweird.f32 %v4246_v39 }
 0x38e   : > { %v1099_v59 = vpop.xlane.xlu2 %1098  ;;  %4249 = vrcp.f32 %v1267_v58  ;;  %v1584_v47 = vsel %vm1581_vm14, %v1583_v46, %v1579_v41  ;;  %v1283_v36 = vsel %vm1012_vm3, %v5368_v1, 0.0  ;;  %vm1593_vm4 = vmor %vm1591_vm0, %vm1592_vm15  ;;  %v1612_v21 = vand.u32 2147483648, %v1267_v58 }
 0x38f   : > { %v1588_v40 = vsub.f32 1.0, %v1587_v44  ;;  %4251 = vpow2.f32 %v1195_v28  ;;  %v1137_v30 = vsub.f32 %v5252_v38, %v1099_v59  ;;  %v1585_v25 = vmul.f32 %v5227_v54, %v1584_v47 }
 0x390   : > { %v1598_v38 = vor.u32 1.1754944e-38, %v1597_v29  ;;  %v1610_v27 = vand.u32 2147483647, %v1267_v58  ;;  %vm1606_vm7 = vweird.f32 %v1267_v58  ;;  %v1613_v28 = vor.u32 1.1754944e-38, %v1612_v21 }
 0x391   : > { %v1589_v33 = vmul.f32 %v4246_v39, %v1588_v40  ;;  %1799 = vst.msk [vmem:[%s5194_s29 + $0x90] sm:$0xff] %vm1012_vm3, %v1585_v25  ;;  %v1197_v49 = vmul.f32 1.442695, %v1137_v30  ;;  %v2032_v21 = vsel %vm766_vm2, %v5370_v62, 0.0 }
 0x392   : > { %4035 = vmatmul.msk.f32.gmra.mxu2 %vm1012_vm3, %v1585_v25  ;;  %vm1611_vm9 = vcmp.eq.f32.partialorder %v1610_v27, 8.507059e+37 }
 0x393   : > { %1284 = vadd.xlane.f32.xlu2 %v1283_v36  ;;  %v1590_v43 = vadd.f32 %v4246_v39, %v1589_v33 }
 0x394   : > { %v4250_v52 = vpop.eup %4249  ;;  %v5381_v61 = vpop.f32.mrf.mxu2 }
 0x395   : > { %v1602_v32 = vmul.f32 %v4250_v52, %v1267_v58  ;;  %v1270_v22 = vpop.xlane.xlu1 %1269  ;;  %v1594_v56 = vsel %vm1593_vm4, %v4246_v39, %v1590_v43  ;;  %v5379_v50 = vpop.eup %4251  ;;  %vm1607_vm6 = vweird.f32 %v4250_v52 }
 0x396   : > { %v1102_v54 = vpop.xlane.xlu2 %1101  ;;  %4253 = vrcp.f32 %v1270_v22  ;;  %v1599_v2 = vsel %vm1596_vm5, %v1598_v38, %v1594_v56  ;;  %v1286_v26 = vsel %vm1012_vm3, %v5379_v50, 0.0  ;;  %vm1608_vm8 = vmor %vm1606_vm7, %vm1607_vm6  ;;  %v1627_v58 = vand.u32 2147483648, %v1270_v22 }
 0x397   : > { %v1603_v63 = vsub.f32 1.0, %v1602_v32  ;;  %4255 = vpow2.f32 %v1197_v49  ;;  %v1138_v55 = vsub.f32 %v5266_v51, %v1102_v54  ;;  %v1600_v48 = vmul.f32 %v5241_v34, %v1599_v2 }
 0x398   : > { %v1625_v36 = vand.u32 2147483647, %v1270_v22  ;;  %vm1621_vm11 = vweird.f32 %v1270_v22 }
 0x399   : > { %v1604_v24 = vmul.f32 %v4250_v52, %v1603_v63  ;;  %1800 = vst.msk [vmem:[%s5194_s29 + $0x98] sm:$0xff] %vm1012_vm3, %v1600_v48  ;;  %v1199_v46 = vmul.f32 1.442695, %v1138_v55  ;;  %v2029_v63 = vsel %vm766_vm2, %v5359_v19, 0.0 }
 0x39a   : > { %4036 = vmatmul.msk.f32.gmra.mxu2 %vm1012_vm3, %v1600_v48  ;;  %vm1626_vm13 = vcmp.eq.f32.partialorder %v1625_v36, 8.507059e+37  ;;  %v2035_v48 = vsel %vm766_vm2, %v5381_v61, 0.0 }
 0x39b   : > { %1287 = vadd.xlane.f32.xlu2 %v1286_v26  ;;  %v1605_v15 = vadd.f32 %v4250_v52, %v1604_v24  ;;  %4257 = vpow2.f32 %v1199_v46 }
 0x39c   : > { %v4254_v39 = vpop.eup %4253  ;;  %v5398_v35 = vpop.f32.mrf.mxu2 }
 0x39d   : > { %v1617_v51 = vmul.f32 %v4254_v39, %v1270_v22  ;;  %v1609_v44 = vsel %vm1608_vm8, %v4250_v52, %v1605_v15  ;;  %v5390_v59 = vpop.eup %4255  ;;  %vm1622_vm10 = vweird.f32 %v4254_v39  ;;  %v2038_v26 = vsel %vm766_vm2, %v5398_v35, 0.0 }
 0x39e   : > { %v1105_v34 = vpop.xlane.xlu2 %1104  ;;  %v1614_v40 = vsel %vm1611_vm9, %v1613_v28, %v1609_v44  ;;  %v1289_v29 = vsel %vm1012_vm3, %v5390_v59, 0.0  ;;  %vm1623_vm12 = vmor %vm1621_vm11, %vm1622_vm10 }
 0x39f   : > { %v1139_v41 = vsub.f32 %v5279_v42, %v1105_v34  ;;  %v1618_v47 = vsub.f32 1.0, %v1617_v51  ;;  %v1615_v30 = vmul.f32 %v5254_v57, %v1614_v40  ;;  %v1628_v42 = vor.u32 1.1754944e-38, %v1627_v58 }
 0x3a1   : > { %v1201_v25 = vmul.f32 1.442695, %v1139_v41  ;;  %v1619_v33 = vmul.f32 %v4254_v39, %v1618_v47  ;;  %1801 = vst.msk [vmem:[%s5194_s29 + $0xa0] sm:$0xff] %vm1012_vm3, %v1615_v30  ;;  %v5401_v52 = vpop.eup %4257 }
 0x3a2   : > { %4037 = vmatmul.msk.f32.gmra.mxu2 %vm1012_vm3, %v1615_v30  ;;  %v1292_v54 = vsel %vm1012_vm3, %v5401_v52, 0.0 }
 0x3a3   : > { %4259 = vpow2.f32 %v1201_v25  ;;  %1290 = vadd.xlane.f32.xlu2 %v1289_v29  ;;  %v1620_v57 = vadd.f32 %v4254_v39, %v1619_v33 }
 0x3a4   : > { %v5413_v56 = vpop.f32.mrf.mxu2 }
 0x3a5   : > { %v1624_v43 = vsel %vm1623_vm12, %v4254_v39, %v1620_v57  ;;  %v2041_v15 = vsel %vm766_vm2, %v5413_v56, 0.0 }
 0x3a6   : > { %v1629_v49 = vsel %vm1626_vm13, %v1628_v42, %v1624_v43 }
 0x3a7   : > { %v1630_v38 = vmul.f32 %v5271_v0, %v1629_v49 }
 0x3a9   : > { %v5404_v32 = vpop.eup %4259  ;;  %1802 = vst.msk [vmem:[%s5194_s29 + $0xa8] sm:$0xff] %vm1012_vm3, %v1630_v38 }
 0x3aa   : > { %v1295_v22 = vsel %vm1012_vm3, %v5404_v32, 0.0  ;;  %4038 = vmatmul.msk.f32.gmra.mxu2 %vm1012_vm3, %v1630_v38 }
 0x3ab   : > { %1293 = vadd.xlane.f32.xlu2 %v1292_v54  ;;  %1296 = vadd.xlane.f32.xlu1 %v1295_v22 }
 0x3b3   : > { %2030 = vadd.xlane.f32.xlu1 %v2029_v63 }
 0x3b4   : > { %v5417_v0 = vpop.f32.mrf.mxu2 }
 0x3b5   : > { %v2044_v2 = vsel %vm766_vm2, %v5417_v0, 0.0 }
 0x3b6   : > { %2045 = vadd.xlane.f32.xlu2 %v2044_v2 }
 0x3bb   : > { %2033 = vadd.xlane.f32.xlu1 %v2032_v21 }
 0x3bc   : > { %v5423_v55 = vpop.f32.mrf.mxu2 }
 0x3c3   : > { %2036 = vadd.xlane.f32.xlu1 %v2035_v48 }
 0x3c4   : > { %v5427_v24 = vpop.f32.mrf.mxu2 }
 0x3cb   : > { %2039 = vadd.xlane.f32.xlu1 %v2038_v26 }
 0x3cc   : > { %v5431_v27 = vpop.f32.mrf.mxu2 }
 0x3d3   : > { %2042 = vadd.xlane.f32.xlu1 %v2041_v15 }
 0x3d4   : > { %v5435_v39 = vpop.f32.mrf.mxu2 }
 0x3dc   : > { %v5437_v28 = vpop.f32.mrf.mxu2 }
 0x3de   : > { %v1273_v46 = vpop.xlane.xlu1 %1272 }
 0x3df   : > { %4261 = vrcp.f32 %v1273_v46  ;;  %v1642_v30 = vand.u32 2147483648, %v1273_v46  ;;  %v1640_v58 = vand.u32 2147483647, %v1273_v46  ;;  %vm1636_vm15 = vweird.f32 %v1273_v46 }
 0x3e1   : > { %v1643_v36 = vor.u32 1.1754944e-38, %v1642_v30  ;;  %vm1641_vm4 = vcmp.eq.f32.partialorder %v1640_v58, 8.507059e+37 }
 0x3e4   : > { %v5439_v34 = vpop.f32.mrf.mxu2 }
 0x3e5   : > { %v4262_v51 = vpop.eup %4261 }
 0x3e6   : > { %v1632_v44 = vmul.f32 %v4262_v51, %v1273_v46  ;;  %v1276_v41 = vpop.xlane.xlu1 %1275  ;;  %vm1637_vm14 = vweird.f32 %v4262_v51 }
 0x3e7   : > { %4263 = vrcp.f32 %v1276_v41  ;;  %vm1638_vm0 = vmor %vm1636_vm15, %vm1637_vm14  ;;  %v1657_v63 = vand.u32 2147483648, %v1276_v41  ;;  %v1655_v2 = vand.u32 2147483647, %v1276_v41  ;;  %vm1651_vm6 = vweird.f32 %v1276_v41 }
 0x3e8   : > { %v1633_v40 = vsub.f32 1.0, %v1632_v44 }
 0x3e9   : > { %v1658_v46 = vor.u32 1.1754944e-38, %v1657_v63  ;;  %vm1656_vm8 = vcmp.eq.f32.partialorder %v1655_v2, 8.507059e+37 }
 0x3ea   : > { %v1634_v47 = vmul.f32 %v4262_v51, %v1633_v40 }
 0x3ec   : > { %v1635_v25 = vadd.f32 %v4262_v51, %v1634_v47 }
 0x3ed   : > { %v4264_v33 = vpop.eup %4263  ;;  %v5441_v29 = vpop.f32.mrf.mxu2 }
 0x3ee   : > { %v1647_v57 = vmul.f32 %v4264_v33, %v1276_v41  ;;  %v1279_v42 = vpop.xlane.xlu1 %1278  ;;  %v1639_v43 = vsel %vm1638_vm0, %v4262_v51, %v1635_v25  ;;  %vm1652_vm5 = vweird.f32 %v4264_v33  ;;  %v1140_v41 = vsub.f32 %v5176_v45, %v5316_v60 }
 0x3ef   : > { %4265 = vrcp.f32 %v1279_v42  ;;  %v1644_v38 = vsel %vm1641_vm4, %v1643_v36, %v1639_v43  ;;  %vm1653_vm7 = vmor %vm1651_vm6, %vm1652_vm5  ;;  %v1672_v47 = vand.u32 2147483648, %v1279_v42  ;;  %v1670_v25 = vand.u32 2147483647, %v1279_v42 }
 0x3f0   : > { %v1648_v49 = vsub.f32 1.0, %v1647_v57  ;;  %v1645_v54 = vmul.f32 %v5321_v20, %v1644_v38  ;;  %vm1666_vm10 = vweird.f32 %v1279_v42 }
 0x3f1   : > { %vm1671_vm12 = vcmp.eq.f32.partialorder %v1670_v25, 8.507059e+37 }
 0x3f2   : > { %v1649_v22 = vmul.f32 %v4264_v33, %v1648_v49  ;;  %1803 = vst.msk [vmem:[%s5194_s29 + $0xb0] sm:$0xff] %vm1012_vm3, %v1645_v54  ;;  %4039 = vmatmul.msk.f32.gmra.mxu2 %vm1012_vm3, %v1645_v54 }
 0x3f4   : > { %v1650_v21 = vadd.f32 %v4264_v33, %v1649_v22  ;;  %v1203_v22 = vmul.f32 1.442695, %v1140_v41 }
 0x3f5   : > { %v4266_v48 = vpop.eup %4265  ;;  %v5447_v26 = vpop.f32.mrf.mxu2 }
 0x3f6   : > { %v1282_v15 = vpop.xlane.xlu2 %1281  ;;  %v1662_v51 = vmul.f32 %v4266_v48, %v1279_v42  ;;  %v1654_v20 = vsel %vm1653_vm7, %v4264_v33, %v1650_v21  ;;  %vm1667_vm9 = vweird.f32 %v4266_v48  ;;  %v1673_v33 = vor.u32 1.1754944e-38, %v1672_v47 }
 0x3f7   : > { %4267 = vrcp.f32 %v1282_v15  ;;  %v1659_v40 = vsel %vm1656_vm8, %v1658_v46, %v1654_v20  ;;  %vm1668_vm11 = vmor %vm1666_vm10, %vm1667_vm9  ;;  %v1687_v42 = vand.u32 2147483648, %v1282_v15  ;;  %v1685_v46 = vand.u32 2147483647, %v1282_v15 }
 0x3f8   : > { %v1663_v44 = vsub.f32 1.0, %v1662_v51  ;;  %v1660_v30 = vmul.f32 %v5334_v31, %v1659_v40  ;;  %4269 = vpow2.f32 %v1203_v22  ;;  %vm1681_vm14 = vweird.f32 %v1282_v15 }
 0x3f9   : > { %v1688_v20 = vor.u32 1.1754944e-38, %v1687_v42  ;;  %vm1686_vm0 = vcmp.eq.f32.partialorder %v1685_v46, 8.507059e+37 }
 0x3fa   : > { %v1664_v58 = vmul.f32 %v4266_v48, %v1663_v44  ;;  %1804 = vst.msk [vmem:[%s5194_s29 + $0xb8] sm:$0xff] %vm1012_vm3, %v1660_v30  ;;  %4040 = vmatmul.msk.f32.gmra.mxu2 %vm1012_vm3, %v1660_v30 }
 0x3fc   : > { %v1665_v57 = vadd.f32 %v4266_v48, %v1664_v58 }
 0x3fd   : > { %v4268_v36 = vpop.eup %4267  ;;  %v5455_v49 = vpop.f32.mrf.mxu2 }
 0x3fe   : > { %v1677_v43 = vmul.f32 %v4268_v36, %v1282_v15  ;;  %v2028_v31 = vpop.xlane.xlu2 %2027  ;;  %v1669_v54 = vsel %vm1668_vm11, %v4266_v48, %v1665_v57  ;;  %vm1682_vm13 = vweird.f32 %v4268_v36  ;;  %v5470_v58 = vpop.eup %4269 }
 0x3ff   : > { %v2122_v38 = vmul.f32 0.25, %v2028_v31  ;;  %v1674_v45 = vsel %vm1671_vm12, %v1673_v33, %v1669_v54  ;;  %vm1683_vm15 = vmor %vm1681_vm14, %vm1682_vm13  ;;  %v1298_v25 = vsel %vm1012_vm3, %v5470_v58, 0.0 }
 0x400   : > { %v1678_v63 = vsub.f32 1.0, %v1677_v43  ;;  %v1675_v2 = vmul.f32 %v5343_v37, %v1674_v45 }
 0x401   : > { %v5458_v60 = vsub.f32 %v5348_v18, %v2122_v38 }
 0x402   : > { %v1679_v21 = vmul.f32 %v4268_v36, %v1678_v63  ;;  %1805 = vst.msk [vmem:[%s5194_s29 + $0xc0] sm:$0xff] %vm1012_vm3, %v1675_v2  ;;  %4041 = vmatmul.msk.f32.gmra.mxu2 %vm1012_vm3, %v1675_v2 }
 0x403   : > { %v2186_v51 = vmul.f32 %v5458_v60, %v5458_v60 }
 0x404   : > { %v1680_v48 = vadd.f32 %v4268_v36, %v1679_v21 }
 0x405   : > { %v2218_v18 = vsel %vm766_vm2, %v2186_v51, 0.0  ;;  %v5467_v37 = vpop.f32.mrf.mxu2 }
 0x406   : > { %2219 = vadd.xlane.f32.xlu2 %v2218_v18  ;;  %v1285_v44 = vpop.xlane.xlu2 %1284  ;;  %v1684_v40 = vsel %vm1683_vm15, %v4268_v36, %v1680_v48 }
 0x407   : > { %4271 = vrcp.f32 %v1285_v44  ;;  %v1689_v47 = vsel %vm1686_vm0, %v1688_v20, %v1684_v40  ;;  %v1700_v31 = vand.u32 2147483647, %v1285_v44  ;;  %vm1696_vm5 = vweird.f32 %v1285_v44 }
 0x408   : > { %v1690_v30 = vmul.f32 %v5350_v53, %v1689_v47  ;;  %v1702_v53 = vand.u32 2147483648, %v1285_v44 }
 0x409   : > { %vm1701_vm7 = vcmp.eq.f32.partialorder %v1700_v31, 8.507059e+37 }
 0x40a   : > { %1806 = vst.msk [vmem:[%s5194_s29 + $0xc8] sm:$0xff] %vm1012_vm3, %v1690_v30  ;;  %4042 = vmatmul.msk.f32.gmra.mxu2 %vm1012_vm3, %v1690_v30  ;;  %v1703_v22 = vor.u32 1.1754944e-38, %v1702_v53 }
 0x40d   : > { %v4272_v15 = vpop.eup %4271  ;;  %v5477_v57 = vpop.f32.mrf.mxu2 }
 0x40e   : > { %v1692_v41 = vmul.f32 %v4272_v15, %v1285_v44  ;;  %v1288_v33 = vpop.xlane.xlu2 %1287  ;;  %1299 = vadd.xlane.f32.xlu2 %v1298_v25  ;;  %vm1697_vm4 = vweird.f32 %v4272_v15 }
 0x40f   : > { %4273 = vrcp.f32 %v1288_v33  ;;  %vm1698_vm6 = vmor %vm1696_vm5, %vm1697_vm4  ;;  %v1717_v20 = vand.u32 2147483648, %v1288_v33  ;;  %vm1711_vm9 = vweird.f32 %v1288_v33  ;;  %v1715_v40 = vand.u32 2147483647, %v1288_v33 }
 0x410   : > { %v1693_v36 = vsub.f32 1.0, %v1692_v41 }
 0x411   : > { %v1718_v41 = vor.u32 1.1754944e-38, %v1717_v20  ;;  %vm1716_vm11 = vcmp.eq.f32.partialorder %v1715_v40, 8.507059e+37 }
 0x412   : > { %v1694_v43 = vmul.f32 %v4272_v15, %v1693_v36 }
 0x414   : > { %v1695_v38 = vadd.f32 %v4272_v15, %v1694_v43 }
 0x415   : > { %v4274_v54 = vpop.eup %4273  ;;  %v5479_v45 = vpop.f32.mrf.mxu2 }
 0x416   : > { %v1707_v63 = vmul.f32 %v4274_v54, %v1288_v33  ;;  %v1291_v2 = vpop.xlane.xlu2 %1290  ;;  %v1699_v21 = vsel %vm1698_vm6, %v4272_v15, %v1695_v38  ;;  %v2080_v46 = vsel %vm766_vm2, %v5479_v45, 0.0  ;;  %vm1712_vm8 = vweird.f32 %v4274_v54 }
 0x417   : > { %4275 = vrcp.f32 %v1291_v2  ;;  %v1704_v51 = vsel %vm1701_vm7, %v1703_v22, %v1699_v21  ;;  %2081 = vadd.xlane.f32.xlu0 %v2080_v46  ;;  %vm1713_vm10 = vmor %vm1711_vm9, %vm1712_vm8  ;;  %v1732_v43 = vand.u32 2147483648, %v1291_v2  ;;  %v1730_v38 = vand.u32 2147483647, %v1291_v2 }
 0x418   : > { %v1708_v42 = vsub.f32 1.0, %v1707_v63  ;;  %v1705_v48 = vmul.f32 %v5368_v1, %v1704_v51  ;;  %vm1726_vm13 = vweird.f32 %v1291_v2 }
 0x419   : > { %v1733_v63 = vor.u32 1.1754944e-38, %v1732_v43  ;;  %vm1731_vm15 = vcmp.eq.f32.partialorder %v1730_v38, 8.507059e+37 }
 0x41a   : > { %v1709_v18 = vmul.f32 %v4274_v54, %v1708_v42  ;;  %1807 = vst.msk [vmem:[%s5194_s29 + $0xd0] sm:$0xff] %vm1012_vm3, %v1705_v48  ;;  %4043 = vmatmul.msk.f32.gmra.mxu2 %vm1012_vm3, %v1705_v48 }
 0x41c   : > { %v1710_v44 = vadd.f32 %v4274_v54, %v1709_v18 }
 0x41d   : > { %v4276_v47 = vpop.eup %4275 }
 0x41e   : > { %v1722_v30 = vmul.f32 %v4276_v47, %v1291_v2  ;;  %v1294_v15 = vpop.xlane.xlu2 %1293  ;;  %v1714_v25 = vsel %vm1713_vm10, %v4274_v54, %v1710_v44  ;;  %v1297_v36 = vpop.xlane.xlu1 %1296  ;;  %vm1727_vm12 = vweird.f32 %v4276_v47 }
 0x41f   : > { %4277 = vrcp.f32 %v1294_v15  ;;  %v1719_v53 = vsel %vm1716_vm11, %v1718_v41, %v1714_v25  ;;  %vm1728_vm14 = vmor %vm1726_vm13, %vm1727_vm12  ;;  %v1745_v2 = vand.u32 2147483647, %v1294_v15  ;;  %v1747_v40 = vand.u32 2147483648, %v1294_v15 }
 0x420   : > { %v1723_v1 = vsub.f32 1.0, %v1722_v30  ;;  %4279 = vrcp.f32 %v1297_v36  ;;  %v1720_v22 = vmul.f32 %v5379_v50, %v1719_v53  ;;  %v1762_v41 = vand.u32 2147483648, %v1297_v36 }
 0x421   : > { %vm1741_vm5 = vweird.f32 %v1294_v15  ;;  %vm1756_vm7 = vweird.f32 %v1297_v36  ;;  %vm1746_vm8 = vcmp.eq.f32.partialorder %v1745_v2, 8.507059e+37 }
 0x422   : > { %v1724_v31 = vmul.f32 %v4276_v47, %v1723_v1  ;;  %1808 = vst.msk [vmem:[%s5194_s29 + $0xd8] sm:$0xff] %vm1012_vm3, %v1720_v22  ;;  %4044 = vmatmul.msk.f32.gmra.mxu2 %vm1012_vm3, %v1720_v22 }
 0x424   : > { %v1725_v33 = vadd.f32 %v4276_v47, %v1724_v31  ;;  %v1748_v31 = vor.u32 1.1754944e-38, %v1747_v40 }
 0x425   : > { %v4278_v54 = vpop.eup %4277 }
 0x426   : > { %v4280_v21 = vpop.eup %4279  ;;  %v1737_v42 = vmul.f32 %v4278_v54, %v1294_v15  ;;  %v1729_v46 = vsel %vm1728_vm14, %v4276_v47, %v1725_v33  ;;  %v2031_v48 = vpop.xlane.xlu1 %2030  ;;  %vm1742_vm0 = vweird.f32 %v4278_v54  ;;  %v1760_v47 = vand.u32 2147483647, %v1297_v36 }
 0x427   : > { %v1752_v51 = vmul.f32 %v4280_v21, %v1297_v36  ;;  %v1734_v18 = vsel %vm1731_vm15, %v1733_v63, %v1729_v46  ;;  %v2123_v44 = vmul.f32 0.25, %v2031_v48  ;;  %vm1757_vm4 = vweird.f32 %v4280_v21  ;;  %vm1743_vm6 = vmor %vm1741_vm5, %vm1742_vm0 }
 0x428   : > { %v1738_v20 = vsub.f32 1.0, %v1737_v42  ;;  %v1735_v50 = vmul.f32 %v5390_v59, %v1734_v18  ;;  %vm1758_vm9 = vmor %vm1756_vm7, %vm1757_vm4  ;;  %vm1761_vm10 = vcmp.eq.f32.partialorder %v1760_v47, 8.507059e+37 }
 0x429   : > { %v1753_v30 = vsub.f32 1.0, %v1752_v51  ;;  %v5493_v1 = vsub.f32 %v5359_v19, %v2123_v44  ;;  %v1763_v19 = vor.u32 1.1754944e-38, %v1762_v41  ;;  %v2053_v41 = vsel %vm766_vm2, %v5431_v27, 0.0  ;;  %v2046_v47 = vpop.xlane.xlu2 %2045 }
 0x42a   : > { %v1739_v25 = vmul.f32 %v4278_v54, %v1738_v20  ;;  %1809 = vst.msk [vmem:[%s5194_s29 + $0xe0] sm:$0xff] %vm1012_vm3, %v1735_v50  ;;  %4045 = vmatmul.msk.f32.gmra.mxu2 %vm1012_vm3, %v1735_v50  ;;  %v2050_v50 = vsel %vm766_vm2, %v5427_v24, 0.0 }
 0x42b   : > { %v1754_v43 = vmul.f32 %v4280_v21, %v1753_v30  ;;  %v2187_v59 = vmul.f32 %v5493_v1, %v5493_v1 }
 0x42c   : > { %v1740_v53 = vadd.f32 %v4278_v54, %v1739_v25 }
 0x42d   : > { %v1755_v38 = vadd.f32 %v4280_v21, %v1754_v43  ;;  %v2221_v22 = vsel %vm766_vm2, %v2187_v59, 0.0 }
 0x42e   : > { %v1744_v33 = vsel %vm1743_vm6, %v4278_v54, %v1740_v53  ;;  %2222 = vadd.xlane.f32.xlu1 %v2221_v22  ;;  %v2034_v15 = vpop.xlane.xlu1 %2033  ;;  %v2056_v22 = vsel %vm766_vm2, %v5435_v39, 0.0 }
 0x42f   : > { %v1749_v63 = vsel %vm1746_vm8, %v1748_v31, %v1744_v33  ;;  %v1759_v42 = vsel %vm1758_vm9, %v4280_v21, %v1755_v38  ;;  %v2124_v46 = vmul.f32 0.25, %v2034_v15  ;;  %v2047_v21 = vsel %vm766_vm2, %v5423_v55, 0.0 }
 0x430   : > { %v1750_v51 = vmul.f32 %v5401_v52, %v1749_v63  ;;  %v1764_v48 = vsel %vm1761_vm10, %v1763_v19, %v1759_v42  ;;  %v2128_v31 = vmul.f32 0.25, %v2046_v47  ;;  %v2065_v42 = vsel %vm766_vm2, %v5441_v29, 0.0 }
 0x431   : > { %v1765_v18 = vmul.f32 %v5404_v32, %v1764_v48  ;;  %v5504_v36 = vsub.f32 %v5370_v62, %v2124_v46  ;;  %v2068_v46 = vsel %vm766_vm2, %v5447_v26, 0.0 }
 0x432   : > { %1810 = vst.msk [vmem:[%s5194_s29 + $0xe8] sm:$0xff] %vm1012_vm3, %v1750_v51  ;;  %4046 = vmatmul.msk.f32.gmra.mxu2 %vm1012_vm3, %v1750_v51  ;;  %v5539_v19 = vsub.f32 %v5417_v0, %v2128_v31  ;;  %v2062_v0 = vsel %vm766_vm2, %v5439_v34, 0.0  ;;  %v2071_v51 = vsel %vm766_vm2, %v5455_v49, 0.0 }
 0x433   : > { %1811 = vst.msk [vmem:[%s5194_s29 + $0xf0] sm:$0xff] %vm1012_vm3, %v1765_v18  ;;  %v2188_v54 = vmul.f32 %v5504_v36, %v5504_v36 }
 0x434   : > { %v2192_v15 = vmul.f32 %v5539_v19, %v5539_v19 }
 0x435   : > { %v2224_v52 = vsel %vm766_vm2, %v2188_v54, 0.0  ;;  %v2074_v54 = vsel %vm766_vm2, %v5467_v37, 0.0 }
 0x436   : > { %2048 = vadd.xlane.f32.xlu1 %v2047_v21  ;;  %2225 = vadd.xlane.f32.xlu2 %v2224_v52  ;;  %v2037_v32 = vpop.xlane.xlu1 %2036  ;;  %v2236_v63 = vsel %vm766_vm2, %v2192_v15, 0.0 }
 0x437   : > { %v2125_v20 = vmul.f32 0.25, %v2037_v32 }
 0x439   : > { %v5517_v62 = vsub.f32 %v5381_v61, %v2125_v20 }
 0x43a   : > { %4047 = vmatmul.msk.f32.gmra.mxu2 %vm1012_vm3, %v1765_v18 }
 0x43b   : > { %v2189_v44 = vmul.f32 %v5517_v62, %v5517_v62 }
 0x43d   : > { %v2227_v2 = vsel %vm766_vm2, %v2189_v44, 0.0  ;;  %v2077_v44 = vsel %vm766_vm2, %v5477_v57, 0.0 }
 0x43e   : > { %2051 = vadd.xlane.f32.xlu1 %v2050_v50  ;;  %2228 = vadd.xlane.f32.xlu2 %v2227_v2  ;;  %v2040_v40 = vpop.xlane.xlu1 %2039 }
 0x43f   : > { %v2126_v30 = vmul.f32 0.25, %v2040_v40  ;;  %v3274_v40 = vld [vmem:[%s6591_s5] sm:$0xf] }
 0x440   : > { %4049 = vmatpush.msk.msra.mxu3 %vm863_vm1, %v3274_v40 }
 0x441   : > { %v5526_v25 = vsub.f32 %v5398_v35, %v2126_v30 }
 0x443   : > { %v2190_v61 = vmul.f32 %v5526_v25, %v5526_v25 }
 0x445   : > { %v2230_v43 = vsel %vm766_vm2, %v2190_v61, 0.0 }
 0x446   : > { %2054 = vadd.xlane.f32.xlu1 %v2053_v41  ;;  %2231 = vadd.xlane.f32.xlu2 %v2230_v43  ;;  %v2043_v53 = vpop.xlane.xlu1 %2042 }
 0x447   : > { %v2127_v59 = vmul.f32 0.25, %v2043_v53 }
 0x449   : > { %v5534_v38 = vsub.f32 %v5413_v56, %v2127_v59  ;;  %v2059_v56 = vsel %vm766_vm2, %v5437_v28, 0.0 }
 0x44b   : > { %v2191_v35 = vmul.f32 %v5534_v38, %v5534_v38 }
 0x44d   : > { %v2233_v33 = vsel %vm766_vm2, %v2191_v35, 0.0 }
 0x44e   : > { %2057 = vadd.xlane.f32.xlu1 %v2056_v22  ;;  %2234 = vadd.xlane.f32.xlu2 %v2233_v33 }
 0x456   : > { %2060 = vadd.xlane.f32.xlu1 %v2059_v56  ;;  %2237 = vadd.xlane.f32.xlu2 %v2236_v63 }
 0x45e   : > { %2063 = vadd.xlane.f32.xlu1 %v2062_v0 }
 0x466   : > { %2066 = vadd.xlane.f32.xlu1 %v2065_v42 }
 0x46e   : > { %2069 = vadd.xlane.f32.xlu1 %v2068_v46 }
 0x476   : > { %2072 = vadd.xlane.f32.xlu1 %v2071_v51 }
 0x479   : > { %v2220_v48 = vpop.xlane.xlu2 %2219 }
 0x47a   : > { %v2314_v18 = vmul.f32 0.33333334, %v2220_v48 }
 0x47c   : > { %4281 = vrsqrt.f32 %v2314_v18  ;;  %vm2353_vm12 = vcmp.eq.f32.partialorder %v2314_v18, inf  ;;  %v2356_v35 = vand.u32 2147483648, %v2314_v18  ;;  %vm2355_vm14 = vcmp.eq.f32.partialorder %v2314_v18, 0.0 }
 0x47e   : > { %2075 = vadd.xlane.f32.xlu1 %v2074_v54 }
 0x481   : > { %v1300_v21 = vpop.xlane.xlu2 %1299 }
 0x482   : > { %v4282_v52 = vpop.eup %4281  ;;  %4283 = vrcp.f32 %v1300_v21  ;;  %v1777_v47 = vand.u32 2147483648, %v1300_v21  ;;  %v1775_v31 = vand.u32 2147483647, %v1300_v21  ;;  %vm1771_vm13 = vweird.f32 %v1300_v21 }
 0x483   : > { %v2347_v32 = vmul.f32 %v4282_v52, %v2314_v18 }
 0x484   : > { %v1778_v15 = vor.u32 1.1754944e-38, %v1777_v47  ;;  %vm1776_vm0 = vcmp.eq.f32.partialorder %v1775_v31, 8.507059e+37 }
 0x485   : > { %v2348_v20 = vmul.f32 %v4282_v52, %v2347_v32 }
 0x486   : > { %2078 = vadd.xlane.f32.xlu1 %v2077_v44 }
 0x487   : > { %v2349_v50 = vmul.f32 0.5, %v2348_v20 }
 0x488   : > { %v4284_v2 = vpop.eup %4283 }
 0x489   : > { %v2350_v30 = vsub.f32 1.5, %v2349_v50  ;;  %v1767_v61 = vmul.f32 %v4284_v2, %v1300_v21  ;;  %vm1772_vm11 = vweird.f32 %v4284_v2 }
 0x48a   : > { %vm1773_vm15 = vmor %vm1771_vm13, %vm1772_vm11 }
 0x48b   : > { %v2351_v41 = vmul.f32 %v4282_v52, %v2350_v30  ;;  %v1768_v43 = vsub.f32 1.0, %v1767_v61 }
 0x48d   : > { %v2352_v53 = vmul.f32 %v2351_v41, %v2314_v18  ;;  %v1769_v59 = vmul.f32 %v4284_v2, %v1768_v43 }
 0x48f   : > { %v1770_v22 = vadd.f32 %v4284_v2, %v1769_v59  ;;  %v2354_v33 = vsel %vm2353_vm12, %v2314_v18, %v2352_v53 }
 0x490   : > { %v2357_v56 = vsel %vm2355_vm14, %v2356_v35, %v2354_v33 }
 0x491   : > { %v1774_v63 = vsel %vm1773_vm15, %v4284_v2, %v1770_v22  ;;  %v2730_v0 = vadd.f32 1e-06, %v2357_v56 }
 0x492   : > { %v1779_v42 = vsel %vm1776_vm0, %v1778_v15, %v1774_v63 }
 0x493   : > { %v1780_v46 = vmul.f32 %v5470_v58, %v1779_v42  ;;  %4285 = vrcp.f32 %v2730_v0  ;;  %v2773_v21 = vand.u32 2147483648, %v2730_v0  ;;  %v2771_v18 = vand.u32 2147483647, %v2730_v0 }
 0x494   : > { %vm2767_vm4 = vweird.f32 %v2730_v0 }
 0x495   : > { %1812 = vst.msk [vmem:[%s5194_s29 + $0xf8] sm:$0xff] %vm1012_vm3, %v1780_v46  ;;  %4048 = vmatmul.msk.f32.gmra.mxu2 %vm1012_vm3, %v1780_v46  ;;  %v2774_v20 = vor.u32 1.1754944e-38, %v2773_v21  ;;  %vm2772_vm6 = vcmp.eq.f32.partialorder %v2771_v18, 8.507059e+37 }
 0x499   : > { %v4286_v51 = vpop.eup %4285 }
 0x49a   : > { %v2763_v48 = vmul.f32 %v4286_v51, %v2730_v0  ;;  %vm2768_vm1 = vweird.f32 %v4286_v51 }
 0x49b   : > { %vm2769_vm5 = vmor %vm2767_vm4, %vm2768_vm1 }
 0x49c   : > { %v2764_v54 = vsub.f32 1.0, %v2763_v48 }
 0x49e   : > { %v2765_v52 = vmul.f32 %v4286_v51, %v2764_v54 }
 0x4a0   : > { %v2766_v32 = vadd.f32 %v4286_v51, %v2765_v52 }
 0x4a1   : > { %v2223_v44 = vpop.xlane.xlu1 %2222 }
 0x4a2   : > { %v2770_v50 = vsel %vm2769_vm5, %v4286_v51, %v2766_v32  ;;  %v2315_v58 = vmul.f32 0.33333334, %v2223_v44 }
 0x4a3   : > { %v2775_v2 = vsel %vm2772_vm6, %v2774_v20, %v2770_v50 }
 0x4a4   : > { %v2776_v40 = vmul.f32 %v2775_v2, %v5458_v60  ;;  %4287 = vrsqrt.f32 %v2315_v58  ;;  %vm2365_vm3 = vcmp.eq.f32.partialorder %v2315_v58, inf  ;;  %v2368_v52 = vand.u32 2147483648, %v2315_v58 }
 0x4a5   : > { %vm2367_vm7 = vcmp.eq.f32.partialorder %v2315_v58, 0.0 }
 0x4a6   : > { %v3242_v30 = vmax.f32 %v2776_v40, 0.0 }
 0x4a8   : > { %4050 = vmatmul.msk.f32.vlgmr.msra.gmra.mxu3 %vm766_vm2, %v3242_v30 }
 0x4a9   : > { %v2226_v61 = vpop.xlane.xlu2 %2225  ;;  %v2049_v41 = vpop.xlane.xlu1 %2048 }
 0x4aa   : > { %v4288_v43 = vpop.eup %4287  ;;  %v2316_v47 = vmul.f32 0.33333334, %v2226_v61  ;;  %v2129_v53 = vmul.f32 0.25, %v2049_v41 }
 0x4ab   : > { %v2359_v59 = vmul.f32 %v4288_v43, %v2315_v58 }
 0x4ac   : > { %4289 = vrsqrt.f32 %v2316_v47  ;;  %v5572_v31 = vsub.f32 %v5423_v55, %v2129_v53  ;;  %vm2377_vm8 = vcmp.eq.f32.partialorder %v2316_v47, inf  ;;  %vm2379_vm9 = vcmp.eq.f32.partialorder %v2316_v47, 0.0 }
 0x4ad   : > { %v2360_v35 = vmul.f32 %v4288_v43, %v2359_v59 }
 0x4ae   : > { %v2193_v22 = vmul.f32 %v5572_v31, %v5572_v31 }
 0x4af   : > { %v2361_v33 = vmul.f32 0.5, %v2360_v35 }
 0x4b0   : > { %v2239_v60 = vsel %vm766_vm2, %v2193_v22, 0.0 }
 0x4b1   : > { %v2362_v15 = vsub.f32 1.5, %v2361_v33  ;;  %v2229_v56 = vpop.xlane.xlu2 %2228  ;;  %2240 = vadd.xlane.f32.xlu2 %v2239_v60  ;;  %v2052_v63 = vpop.xlane.xlu1 %2051  ;;  %v2380_v33 = vand.u32 2147483648, %v2316_v47 }
 0x4b2   : > { %v4290_v0 = vpop.eup %4289  ;;  %v5577_v42 = vmul.f32 0.33333334, %v2229_v56  ;;  %v2130_v46 = vmul.f32 0.25, %v2052_v63 }
 0x4b3   : > { %v2363_v51 = vmul.f32 %v4288_v43, %v2362_v15  ;;  %v2371_v48 = vmul.f32 %v4290_v0, %v2316_v47 }
 0x4b4   : > { %4291 = vrsqrt.f32 %v5577_v42  ;;  %v5581_v55 = vsub.f32 %v5427_v24, %v2130_v46  ;;  %vm2389_vm10 = vcmp.eq.f32.partialorder %v5577_v42, inf  ;;  %vm2391_vm12 = vcmp.eq.f32.partialorder %v5577_v42, 0.0 }
 0x4b5   : > { %v2364_v54 = vmul.f32 %v2363_v51, %v2315_v58  ;;  %v2372_v21 = vmul.f32 %v4290_v0, %v2371_v48 }
 0x4b6   : > { %v2194_v18 = vmul.f32 %v5581_v55, %v5581_v55 }
 0x4b7   : > { %v2373_v32 = vmul.f32 0.5, %v2372_v21  ;;  %v2366_v20 = vsel %vm2365_vm3, %v2315_v58, %v2364_v54 }
 0x4b8   : > { %v2242_v44 = vsel %vm766_vm2, %v2194_v18, 0.0  ;;  %v2369_v50 = vsel %vm2367_vm7, %v2368_v52, %v2366_v20 }
 0x4b9   : > { %v2374_v2 = vsub.f32 1.5, %v2373_v32  ;;  %v2232_v40 = vpop.xlane.xlu2 %2231  ;;  %2243 = vadd.xlane.f32.xlu2 %v2242_v44  ;;  %v2055_v30 = vpop.xlane.xlu1 %2054  ;;  %v5586_v61 = vadd.f32 1e-06, %v2369_v50 }
 0x4ba   : > { %v4292_v24 = vpop.eup %4291  ;;  %v5588_v41 = vmul.f32 0.33333334, %v2232_v40  ;;  %v2131_v43 = vmul.f32 0.25, %v2055_v30 }
 0x4bb   : > { %v2375_v53 = vmul.f32 %v4290_v0, %v2374_v2  ;;  %v2383_v59 = vmul.f32 %v4292_v24, %v5577_v42  ;;  %4293 = vrcp.f32 %v5586_v61  ;;  %v2392_v2 = vand.u32 2147483648, %v5577_v42 }
 0x4bc   : > { %4295 = vrsqrt.f32 %v5588_v41  ;;  %v5594_v58 = vsub.f32 %v5431_v27, %v2131_v43  ;;  %vm2782_vm11 = vweird.f32 %v5586_v61  ;;  %v2788_v43 = vand.u32 2147483648, %v5586_v61 }
 0x4bd   : > { %v2376_v35 = vmul.f32 %v2375_v53, %v2316_v47  ;;  %v2384_v22 = vmul.f32 %v4292_v24, %v2383_v59  ;;  %vm2401_vm14 = vcmp.eq.f32.partialorder %v5588_v41, inf  ;;  %vm2403_vm1 = vcmp.eq.f32.partialorder %v5588_v41, 0.0 }
 0x4be   : > { %v2195_v60 = vmul.f32 %v5594_v58, %v5594_v58 }
 0x4bf   : > { %v2385_v15 = vmul.f32 0.5, %v2384_v22  ;;  %v2378_v56 = vsel %vm2377_vm8, %v2316_v47, %v2376_v35  ;;  %v2786_v22 = vand.u32 2147483647, %v5586_v61 }
 0x4c0   : > { %v2245_v63 = vsel %vm766_vm2, %v2195_v60, 0.0  ;;  %v2381_v0 = vsel %vm2379_vm9, %v2380_v33, %v2378_v56  ;;  %v2404_v56 = vand.u32 2147483648, %v5588_v41 }
 0x4c1   : > { %v4294_v46 = vpop.eup %4293  ;;  %v2386_v51 = vsub.f32 1.5, %v2385_v15  ;;  %v2235_v48 = vpop.xlane.xlu2 %2234  ;;  %2246 = vadd.xlane.f32.xlu2 %v2245_v63  ;;  %v5599_v27 = vadd.f32 1e-06, %v2381_v0  ;;  %vm2787_vm0 = vcmp.eq.f32.partialorder %v2786_v22, 8.507059e+37 }
 0x4c2   : > { %v2058_v54 = vpop.xlane.xlu1 %2057  ;;  %v4296_v21 = vpop.eup %4295  ;;  %v5601_v52 = vmul.f32 0.33333334, %v2235_v48  ;;  %v2778_v32 = vmul.f32 %v4294_v46, %v5586_v61  ;;  %vm2783_vm13 = vweird.f32 %v4294_v46 }
 0x4c3   : > { %v2132_v18 = vmul.f32 0.25, %v2058_v54  ;;  %v2387_v20 = vmul.f32 %v4292_v24, %v2386_v51  ;;  %v2395_v44 = vmul.f32 %v4296_v21, %v5588_v41  ;;  %4297 = vrcp.f32 %v5599_v27  ;;  %vm2784_vm15 = vmor %vm2782_vm11, %vm2783_vm13 }
 0x4c4   : > { %4299 = vrsqrt.f32 %v5601_v52  ;;  %v2779_v30 = vsub.f32 1.0, %v2778_v32  ;;  %v2789_v32 = vor.u32 1.1754944e-38, %v2788_v43  ;;  %vm2797_vm5 = vweird.f32 %v5599_v27 }
 0x4c5   : > { %v5609_v47 = vsub.f32 %v5435_v39, %v2132_v18  ;;  %v2388_v50 = vmul.f32 %v2387_v20, %v5577_v42  ;;  %v2396_v40 = vmul.f32 %v4296_v21, %v2395_v44  ;;  %vm2413_vm6 = vcmp.eq.f32.partialorder %v5601_v52, inf }
 0x4c6   : > { %v2780_v59 = vmul.f32 %v4294_v46, %v2779_v30  ;;  %vm2415_vm9 = vcmp.eq.f32.partialorder %v5601_v52, 0.0 }
 0x4c7   : > { %v2196_v24 = vmul.f32 %v5609_v47, %v5609_v47  ;;  %v2397_v53 = vmul.f32 0.5, %v2396_v40  ;;  %v2390_v39 = vsel %vm2389_vm10, %v5577_v42, %v2388_v50  ;;  %v5633_v40 = vpop.f32.mrf.mxu2 }
 0x4c8   : > { %v2393_v33 = vsel %vm2391_vm12, %v2392_v2, %v2390_v39  ;;  %v2781_v51 = vadd.f32 %v4294_v46, %v2780_v59  ;;  %v2801_v59 = vand.u32 2147483647, %v5599_v27  ;;  %v2803_v39 = vand.u32 2147483648, %v5599_v27 }
 0x4c9   : > { %v2248_v35 = vsel %vm766_vm2, %v2196_v24, 0.0  ;;  %v4298_v60 = vpop.eup %4297  ;;  %v2398_v15 = vsub.f32 1.5, %v2397_v53  ;;  %v2238_v63 = vpop.xlane.xlu2 %2237  ;;  %v5623_v48 = vadd.f32 1e-06, %v2393_v33 }
 0x4ca   : > { %2249 = vadd.xlane.f32.xlu2 %v2248_v35  ;;  %v2061_v0 = vpop.xlane.xlu1 %2060  ;;  %v4300_v54 = vpop.eup %4299  ;;  %v5625_v18 = vmul.f32 0.33333334, %v2238_v63  ;;  %v2793_v20 = vmul.f32 %v4298_v60, %v5599_v27  ;;  %v2785_v2 = vsel %vm2784_vm15, %v4294_v46, %v2781_v51  ;;  %vm2798_vm4 = vweird.f32 %v4298_v60 }
 0x4cb   : > { %v2133_v42 = vmul.f32 0.25, %v2061_v0  ;;  %v2399_v44 = vmul.f32 %v4296_v21, %v2398_v15  ;;  %v2407_v50 = vmul.f32 %v4300_v54, %v5601_v52  ;;  %4301 = vrcp.f32 %v5623_v48  ;;  %vm2799_vm3 = vmor %vm2797_vm5, %vm2798_vm4 }
 0x4cc   : > { %4303 = vrsqrt.f32 %v5625_v18  ;;  %v2790_v43 = vsel %vm2787_vm0, %v2789_v32, %v2785_v2  ;;  %v2794_v21 = vsub.f32 1.0, %v2793_v20  ;;  %vm2802_vm7 = vcmp.eq.f32.partialorder %v2801_v59, 8.507059e+37 }
 0x4cd   : > { %v5637_v30 = vsub.f32 %v5437_v28, %v2133_v42  ;;  %v2400_v61 = vmul.f32 %v2399_v44, %v5588_v41  ;;  %v2408_v24 = vmul.f32 %v4300_v54, %v2407_v50  ;;  %v2791_v53 = vmul.f32 %v2790_v43, %v5493_v1 }
 0x4ce   : > { %v2795_v28 = vmul.f32 %v4298_v60, %v2794_v21  ;;  %v2804_v27 = vor.u32 1.1754944e-38, %v2803_v39  ;;  %v2818_v39 = vand.u32 2147483648, %v5623_v48  ;;  %vm2812_vm10 = vweird.f32 %v5623_v48 }
 0x4cf   : > { %v2197_v46 = vmul.f32 %v5637_v30, %v5637_v30  ;;  %v2409_v35 = vmul.f32 0.5, %v2408_v24  ;;  %v2402_v22 = vsel %vm2401_vm14, %v5588_v41, %v2400_v61  ;;  %v3243_v33 = vmax.f32 %v2791_v53, 0.0 }
 0x4d0   : > { %v2405_v1 = vsel %vm2403_vm1, %v2404_v56, %v2402_v22  ;;  %v2796_v42 = vadd.f32 %v4298_v60, %v2795_v28  ;;  %v2416_v61 = vand.u32 2147483648, %v5601_v52  ;;  %v2816_v28 = vand.u32 2147483647, %v5623_v48 }
 0x4d1   : > { %v2251_v15 = vsel %vm766_vm2, %v2197_v46, 0.0  ;;  %v4302_v63 = vpop.eup %4301  ;;  %v2410_v0 = vsub.f32 1.5, %v2409_v35  ;;  %v5654_v32 = vadd.f32 1e-06, %v2405_v1  ;;  %4051 = vmatmul.msk.f32.gmra.mxu3 %vm766_vm2, %v3243_v33  ;;  %vm2425_vm13 = vcmp.eq.f32.partialorder %v5625_v18, inf }
 0x4d2   : > { %2252 = vadd.xlane.f32.xlu2 %v2251_v15  ;;  %v2064_v51 = vpop.xlane.xlu1 %2063  ;;  %v4304_v20 = vpop.eup %4303  ;;  %v2808_v41 = vmul.f32 %v4302_v63, %v5623_v48  ;;  %v2800_v2 = vsel %vm2799_vm3, %v4298_v60, %v2796_v42  ;;  %vm2813_vm8 = vweird.f32 %v4302_v63  ;;  %vm2817_vm12 = vcmp.eq.f32.partialorder %v2816_v28, 8.507059e+37 }
 0x4d3   : > { %v2134_v44 = vmul.f32 0.25, %v2064_v51  ;;  %v2411_v56 = vmul.f32 %v4300_v54, %v2410_v0  ;;  %v2419_v50 = vmul.f32 %v4304_v20, %v5625_v18  ;;  %4305 = vrcp.f32 %v5654_v32  ;;  %v5668_v54 = vpop.f32.mrf.mxu2  ;;  %vm2814_vm11 = vmor %vm2812_vm10, %vm2813_vm8 }
 0x4d4   : > { %v2805_v43 = vsel %vm2802_vm7, %v2804_v27, %v2800_v2  ;;  %v2809_v21 = vsub.f32 1.0, %v2808_v41  ;;  %vm2427_vm15 = vcmp.eq.f32.partialorder %v5625_v18, 0.0  ;;  %vm2827_vm0 = vweird.f32 %v5654_v32 }
 0x4d5   : > { %v5663_v24 = vsub.f32 %v5439_v34, %v2134_v44  ;;  %v2412_v53 = vmul.f32 %v2411_v56, %v5601_v52  ;;  %v2420_v46 = vmul.f32 %v4304_v20, %v2419_v50  ;;  %v2806_v59 = vmul.f32 %v2805_v43, %v5504_v36 }
 0x4d6   : > { %v2810_v35 = vmul.f32 %v4302_v63, %v2809_v21  ;;  %v2819_v44 = vor.u32 1.1754944e-38, %v2818_v39 }
 0x4d7   : > { %v2198_v60 = vmul.f32 %v5663_v24, %v5663_v24  ;;  %v2421_v34 = vmul.f32 0.5, %v2420_v46  ;;  %v3244_v22 = vmax.f32 %v2806_v59, 0.0  ;;  %v2414_v33 = vsel %vm2413_vm6, %v5601_v52, %v2412_v53 }
 0x4d8   : > { %v2811_v15 = vadd.f32 %v4302_v63, %v2810_v35  ;;  %v2417_v1 = vsel %vm2415_vm9, %v2416_v61, %v2414_v33  ;;  %v2428_v53 = vand.u32 2147483648, %v5625_v18  ;;  %v2833_v46 = vand.u32 2147483648, %v5654_v32 }
 0x4d9   : > { %v2254_v36 = vsel %vm766_vm2, %v2198_v60, 0.0  ;;  %v4306_v0 = vpop.eup %4305  ;;  %v2422_v51 = vsub.f32 1.5, %v2421_v34  ;;  %v5679_v27 = vadd.f32 1e-06, %v2417_v1  ;;  %4052 = vmatmul.msk.f32.gmra.mxu3 %vm766_vm2, %v3244_v22 }
 0x4da   : > { %2255 = vadd.xlane.f32.xlu2 %v2254_v36  ;;  %v2067_v42 = vpop.xlane.xlu1 %2066  ;;  %v2815_v56 = vsel %vm2814_vm11, %v4302_v63, %v2811_v15  ;;  %v2823_v52 = vmul.f32 %v4306_v0, %v5654_v32  ;;  %v2831_v63 = vand.u32 2147483647, %v5654_v32  ;;  %vm2828_vm14 = vweird.f32 %v4306_v0 }
 0x4db   : > { %v2135_v41 = vmul.f32 0.25, %v2067_v42  ;;  %v2423_v50 = vmul.f32 %v4304_v20, %v2422_v51  ;;  %v2820_v2 = vsel %vm2817_vm12, %v2819_v44, %v2815_v56  ;;  %4307 = vrcp.f32 %v5679_v27  ;;  %v5699_v60 = vpop.f32.mrf.mxu2  ;;  %vm2829_vm1 = vmor %vm2827_vm0, %vm2828_vm14 }
 0x4dc   : > { %v2821_v61 = vmul.f32 %v2820_v2, %v5517_v62  ;;  %v2824_v43 = vsub.f32 1.0, %v2823_v52  ;;  %v2834_v36 = vor.u32 1.1754944e-38, %v2833_v46  ;;  %vm2832_vm4 = vcmp.eq.f32.partialorder %v2831_v63, 8.507059e+37 }
 0x4dd   : > { %v5686_v48 = vsub.f32 %v5441_v29, %v2135_v41  ;;  %v2424_v21 = vmul.f32 %v2423_v50, %v5625_v18  ;;  %v2083_v29 = vsel %vm766_vm2, %v5633_v40, 0.0  ;;  %v2846_v56 = vand.u32 2147483647, %v5679_v27 }
 0x4de   : > { %v3245_v20 = vmax.f32 %v2821_v61, 0.0  ;;  %v2825_v39 = vmul.f32 %v4306_v0, %v2824_v43  ;;  %v2848_v52 = vand.u32 2147483648, %v5679_v27  ;;  %v2086_v43 = vsel %vm766_vm2, %v5668_v54, 0.0 }
 0x4df   : > { %v2199_v59 = vmul.f32 %v5686_v48, %v5686_v48  ;;  %v2426_v62 = vsel %vm2425_vm13, %v5625_v18, %v2424_v21  ;;  %vm2842_vm6 = vweird.f32 %v5679_v27  ;;  %vm2847_vm7 = vcmp.eq.f32.partialorder %v2846_v56, 8.507059e+37 }
 0x4e0   : > { %v2826_v28 = vadd.f32 %v4306_v0, %v2825_v39  ;;  %v2429_v34 = vsel %vm2427_vm15, %v2428_v53, %v2426_v62  ;;  %v2849_v63 = vor.u32 1.1754944e-38, %v2848_v52 }
 0x4e1   : > { %v2257_v35 = vsel %vm766_vm2, %v2199_v59, 0.0  ;;  %v4308_v22 = vpop.eup %4307  ;;  %v2736_v15 = vadd.f32 1e-06, %v2429_v34  ;;  %4053 = vmatmul.msk.f32.gmra.mxu3 %vm766_vm2, %v3245_v20 }
 0x4e2   : > { %2084 = vadd.xlane.f32.xlu2 %v2083_v29  ;;  %2258 = vadd.xlane.f32.xlu1 %v2257_v35  ;;  %v2070_v33 = vpop.xlane.xlu1 %2069  ;;  %v2830_v51 = vsel %vm2829_vm1, %v4306_v0, %v2826_v28  ;;  %v2838_v18 = vmul.f32 %v4308_v22, %v5679_v27  ;;  %vm2843_vm5 = vweird.f32 %v4308_v22 }
 0x4e3   : > { %v2136_v1 = vmul.f32 0.25, %v2070_v33  ;;  %v2835_v42 = vsel %vm2832_vm4, %v2834_v36, %v2830_v51  ;;  %4309 = vrcp.f32 %v2736_v15  ;;  %v5713_v61 = vpop.f32.mrf.mxu2  ;;  %vm2844_vm3 = vmor %vm2842_vm6, %vm2843_vm5  ;;  %v2861_v27 = vand.u32 2147483647, %v2736_v15 }
 0x4e4   : > { %v2836_v32 = vmul.f32 %v2835_v42, %v5526_v25  ;;  %v2839_v41 = vsub.f32 1.0, %v2838_v18  ;;  %v2863_v28 = vand.u32 2147483648, %v2736_v15  ;;  %vm2857_vm9 = vweird.f32 %v2736_v15  ;;  %v2082_v42 = vpop.xlane.xlu0 %2081 }
 0x4e5   : > { %v5706_v44 = vsub.f32 %v5447_v26, %v2136_v1  ;;  %vm2862_vm11 = vcmp.eq.f32.partialorder %v2861_v27, 8.507059e+37 }
 0x4e6   : > { %v3246_v50 = vmax.f32 %v2836_v32, 0.0  ;;  %v2840_v0 = vmul.f32 %v4308_v22, %v2839_v41 }
 0x4e7   : > { %v2200_v2 = vmul.f32 %v5706_v44, %v5706_v44 }
 0x4e8   : > { %v2841_v21 = vadd.f32 %v4308_v22, %v2840_v0 }
 0x4e9   : > { %v2260_v26 = vsel %vm766_vm2, %v2200_v2, 0.0  ;;  %v4310_v25 = vpop.eup %4309  ;;  %4054 = vmatmul.msk.f32.gmra.mxu3 %vm766_vm2, %v3246_v50 }
 0x4ea   : > { %2087 = vadd.xlane.f32.xlu1 %v2086_v43  ;;  %2261 = vadd.xlane.f32.xlu0 %v2260_v26  ;;  %v2073_v53 = vpop.xlane.xlu1 %2072  ;;  %v2845_v20 = vsel %vm2844_vm3, %v4308_v22, %v2841_v21  ;;  %v2853_v59 = vmul.f32 %v4310_v25, %v2736_v15  ;;  %vm2858_vm8 = vweird.f32 %v4310_v25  ;;  %v2089_v22 = vsel %vm766_vm2, %v5699_v60, 0.0 }
 0x4eb   : > { %v2137_v46 = vmul.f32 0.25, %v2073_v53  ;;  %v2850_v39 = vsel %vm2847_vm7, %v2849_v63, %v2845_v20  ;;  %vm2859_vm10 = vmor %vm2857_vm9, %vm2858_vm8  ;;  %v5729_v18 = vpop.f32.mrf.mxu2  ;;  %v2140_v15 = vmul.f32 0.25, %v2082_v42  ;;  %v2092_v43 = vsel %vm766_vm2, %v5713_v61, 0.0 }
 0x4ec   : > { %v2851_v62 = vmul.f32 %v2850_v39, %v5534_v38  ;;  %v2854_v35 = vsub.f32 1.0, %v2853_v59  ;;  %v2864_v38 = vor.u32 1.1754944e-38, %v2863_v28 }
 0x4ed   : > { %v5721_v29 = vsub.f32 %v5455_v49, %v2137_v46  ;;  %v5742_v21 = vsub.f32 %v5479_v45, %v2140_v15  ;;  %v2095_v45 = vsel %vm766_vm2, %v5729_v18, 0.0 }
 0x4ee   : > { %v3247_v34 = vmax.f32 %v2851_v62, 0.0  ;;  %v2855_v36 = vmul.f32 %v4310_v25, %v2854_v35 }
 0x4ef   : > { %v2201_v33 = vmul.f32 %v5721_v29, %v5721_v29  ;;  %v2204_v63 = vmul.f32 %v5742_v21, %v5742_v21 }
 0x4f0   : > { %v2856_v51 = vadd.f32 %v4310_v25, %v2855_v36 }
 0x4f1   : > { %v2263_v1 = vsel %vm766_vm2, %v2201_v33, 0.0  ;;  %4055 = vmatmul.msk.f32.gmra.mxu3 %vm766_vm2, %v3247_v34  ;;  %v2272_v59 = vsel %vm766_vm2, %v2204_v63, 0.0 }
 0x4f2   : > { %2090 = vadd.xlane.f32.xlu0 %v2089_v22  ;;  %2264 = vadd.xlane.f32.xlu2 %v2263_v1  ;;  %v2076_v49 = vpop.xlane.xlu1 %2075  ;;  %v2860_v41 = vsel %vm2859_vm10, %v4310_v25, %v2856_v51 }
 0x4f3   : > { %v2138_v32 = vmul.f32 0.25, %v2076_v49  ;;  %v2865_v56 = vsel %vm2862_vm11, %v2864_v38, %v2860_v41 }
 0x4f4   : > { %v2866_v50 = vmul.f32 %v2865_v56, %v5539_v19  ;;  %v5745_v19 = vpop.f32.mrf.mxu2 }
 0x4f5   : > { %v5733_v52 = vsub.f32 %v5467_v37, %v2138_v32 }
 0x4f6   : > { %v3248_v2 = vmax.f32 %v2866_v50, 0.0 }
 0x4f7   : > { %v2202_v0 = vmul.f32 %v5733_v52, %v5733_v52 }
 0x4f9   : > { %v2266_v26 = vsel %vm766_vm2, %v2202_v0, 0.0  ;;  %4056 = vmatmul.msk.f32.gmra.mxu3 %vm766_vm2, %v3248_v2 }
 0x4fa   : > { %2093 = vadd.xlane.f32.xlu2 %v2092_v43  ;;  %2267 = vadd.xlane.f32.xlu1 %v2266_v26  ;;  %v2079_v25 = vpop.xlane.xlu1 %2078 }
 0x4fb   : > { %v2139_v37 = vmul.f32 0.25, %v2079_v25 }
 0x4fc   : > { %v5758_v39 = vpop.f32.mrf.mxu2 }
 0x4fd   : > { %v5748_v53 = vsub.f32 %v5477_v57, %v2139_v37  ;;  %v2098_v57 = vsel %vm766_vm2, %v5745_v19, 0.0  ;;  %v2101_v62 = vsel %vm766_vm2, %v5758_v39, 0.0 }
 0x4ff   : > { %v2203_v46 = vmul.f32 %v5748_v53, %v5748_v53 }
 0x501   : > { %v2269_v20 = vsel %vm766_vm2, %v2203_v46, 0.0 }
 0x502   : > { %2096 = vadd.xlane.f32.xlu1 %v2095_v45  ;;  %2270 = vadd.xlane.f32.xlu0 %v2269_v20 }
 0x503   : > { %2273 = vadd.xlane.f32.xlu2 %v2272_v59 }
 0x504   : > { %v5764_v46 = vpop.f32.mrf.mxu2 }
 0x50a   : > { %2099 = vadd.xlane.f32.xlu0 %v2098_v57 }
 0x50b   : > { %2102 = vadd.xlane.f32.xlu2 %v2101_v62 }
 0x524   : > { %v2241_v35 = vpop.xlane.xlu2 %2240 }
 0x525   : > { %v2321_v27 = vmul.f32 0.33333334, %v2241_v35 }
 0x527   : > { %4311 = vrsqrt.f32 %v2321_v27  ;;  %vm2437_vm12 = vcmp.eq.f32.partialorder %v2321_v27, inf  ;;  %v2440_v15 = vand.u32 2147483648, %v2321_v27  ;;  %vm2439_vm13 = vcmp.eq.f32.partialorder %v2321_v27, 0.0 }
 0x52c   : > { %v2244_v28 = vpop.xlane.xlu2 %2243 }
 0x52d   : > { %v4312_v34 = vpop.eup %4311  ;;  %v2322_v33 = vmul.f32 0.33333334, %v2244_v28 }
 0x52e   : > { %v2431_v36 = vmul.f32 %v4312_v34, %v2321_v27 }
 0x52f   : > { %4313 = vrsqrt.f32 %v2322_v33  ;;  %vm2449_vm14 = vcmp.eq.f32.partialorder %v2322_v33, inf  ;;  %v2452_v35 = vand.u32 2147483648, %v2322_v33  ;;  %vm2451_vm15 = vcmp.eq.f32.partialorder %v2322_v33, 0.0 }
 0x530   : > { %v2432_v22 = vmul.f32 %v4312_v34, %v2431_v36 }
 0x532   : > { %v2433_v1 = vmul.f32 0.5, %v2432_v22 }
 0x534   : > { %v2434_v51 = vsub.f32 1.5, %v2433_v1  ;;  %v2247_v49 = vpop.xlane.xlu2 %2246 }
 0x535   : > { %v4314_v38 = vpop.eup %4313  ;;  %v2323_v42 = vmul.f32 0.33333334, %v2247_v49 }
 0x536   : > { %v2435_v32 = vmul.f32 %v4312_v34, %v2434_v51  ;;  %v2443_v41 = vmul.f32 %v4314_v38, %v2322_v33 }
 0x537   : > { %4315 = vrsqrt.f32 %v2323_v42  ;;  %vm2461_vm0 = vcmp.eq.f32.partialorder %v2323_v42, inf  ;;  %vm2463_vm4 = vcmp.eq.f32.partialorder %v2323_v42, 0.0 }
 0x538   : > { %v2436_v56 = vmul.f32 %v2435_v32, %v2321_v27  ;;  %v2444_v50 = vmul.f32 %v4314_v38, %v2443_v41 }
 0x53a   : > { %v2445_v2 = vmul.f32 0.5, %v2444_v50  ;;  %v2438_v0 = vsel %vm2437_vm12, %v2321_v27, %v2436_v56  ;;  %v5775_v50 = vpop.f32.mrf.mxu2 }
 0x53b   : > { %v2441_v43 = vsel %vm2439_vm13, %v2440_v15, %v2438_v0 }
 0x53c   : > { %v2446_v26 = vsub.f32 1.5, %v2445_v2  ;;  %v2737_v37 = vadd.f32 1e-06, %v2441_v43  ;;  %v2464_v43 = vand.u32 2147483648, %v2323_v42 }
 0x53d   : > { %v2250_v25 = vpop.xlane.xlu2 %2249  ;;  %v4316_v63 = vpop.eup %4315 }
 0x53e   : > { %v5766_v45 = vmul.f32 0.33333334, %v2250_v25  ;;  %v2447_v20 = vmul.f32 %v4314_v38, %v2446_v26  ;;  %v2455_v59 = vmul.f32 %v4316_v63, %v2323_v42  ;;  %4317 = vrcp.f32 %v2737_v37 }
 0x53f   : > { %v2878_v0 = vand.u32 2147483648, %v2737_v37  ;;  %v2876_v25 = vand.u32 2147483647, %v2737_v37  ;;  %vm2872_vm5 = vweird.f32 %v2737_v37 }
 0x540   : > { %4319 = vrsqrt.f32 %v5766_v45  ;;  %v2448_v57 = vmul.f32 %v2447_v20, %v2322_v33  ;;  %v2456_v62 = vmul.f32 %v4316_v63, %v2455_v59  ;;  %vm2473_vm7 = vcmp.eq.f32.partialorder %v5766_v45, inf }
 0x541   : > { %vm2877_vm3 = vcmp.eq.f32.partialorder %v2876_v25, 8.507059e+37  ;;  %vm2475_vm8 = vcmp.eq.f32.partialorder %v5766_v45, 0.0 }
 0x542   : > { %v2457_v28 = vmul.f32 0.5, %v2456_v62  ;;  %v2450_v27 = vsel %vm2449_vm14, %v2322_v33, %v2448_v57 }
 0x543   : > { %v2453_v34 = vsel %vm2451_vm15, %v2452_v35, %v2450_v27  ;;  %v2879_v27 = vor.u32 1.1754944e-38, %v2878_v0 }
 0x544   : > { %v4318_v36 = vpop.eup %4317  ;;  %v2458_v22 = vsub.f32 1.5, %v2457_v28  ;;  %v5769_v51 = vadd.f32 1e-06, %v2453_v34 }
 0x545   : > { %v2253_v1 = vpop.xlane.xlu2 %2252  ;;  %v2868_v38 = vmul.f32 %v4318_v36, %v2737_v37  ;;  %vm2873_vm1 = vweird.f32 %v4318_v36 }
 0x546   : > { %v4320_v49 = vpop.eup %4319  ;;  %v5771_v32 = vmul.f32 0.33333334, %v2253_v1  ;;  %v2459_v41 = vmul.f32 %v4316_v63, %v2458_v22  ;;  %4321 = vrcp.f32 %v5769_v51  ;;  %vm2874_vm6 = vmor %vm2872_vm5, %vm2873_vm1  ;;  %vm2887_vm10 = vweird.f32 %v5769_v51 }
 0x547   : > { %v2467_v56 = vmul.f32 %v4320_v49, %v5766_v45  ;;  %v2869_v33 = vsub.f32 1.0, %v2868_v38 }
 0x548   : > { %4323 = vrsqrt.f32 %v5771_v32  ;;  %v2460_v15 = vmul.f32 %v2459_v41, %v2323_v42  ;;  %vm2485_vm13 = vcmp.eq.f32.partialorder %v5771_v32, inf }
 0x549   : > { %v2468_v2 = vmul.f32 %v4320_v49, %v2467_v56  ;;  %v2870_v26 = vmul.f32 %v4318_v36, %v2869_v33 }
 0x54a   : > { %v2462_v59 = vsel %vm2461_vm0, %v2323_v42, %v2460_v15  ;;  %vm2487_vm0 = vcmp.eq.f32.partialorder %v5771_v32, 0.0 }
 0x54b   : > { %v2469_v20 = vmul.f32 0.5, %v2468_v2  ;;  %v2871_v63 = vadd.f32 %v4318_v36, %v2870_v26  ;;  %v2465_v57 = vsel %vm2463_vm4, %v2464_v43, %v2462_v59  ;;  %v2476_v43 = vand.u32 2147483648, %v5766_v45 }
 0x54c   : > { %v4322_v62 = vpop.eup %4321  ;;  %v5778_v34 = vadd.f32 1e-06, %v2465_v57  ;;  %v2893_v26 = vand.u32 2147483648, %v5769_v51  ;;  %v2891_v59 = vand.u32 2147483647, %v5769_v51 }
 0x54d   : > { %v2470_v35 = vsub.f32 1.5, %v2469_v20  ;;  %v2256_v28 = vpop.xlane.xlu2 %2255  ;;  %v2875_v38 = vsel %vm2874_vm6, %v4318_v36, %v2871_v63  ;;  %v2883_v41 = vmul.f32 %v4322_v62, %v5769_v51  ;;  %v5789_v36 = vpop.f32.mrf.mxu2  ;;  %vm2888_vm9 = vweird.f32 %v4322_v62 }
 0x54e   : > { %v4324_v22 = vpop.eup %4323  ;;  %v5780_v1 = vmul.f32 0.33333334, %v2256_v28  ;;  %v2880_v33 = vsel %vm2877_vm3, %v2879_v27, %v2875_v38  ;;  %4325 = vrcp.f32 %v5778_v34  ;;  %vm2889_vm11 = vmor %vm2887_vm10, %vm2888_vm9  ;;  %vm2892_vm12 = vcmp.eq.f32.partialorder %v2891_v59, 8.507059e+37 }
 0x54f   : > { %v2471_v56 = vmul.f32 %v4320_v49, %v2470_v35  ;;  %v2479_v42 = vmul.f32 %v4324_v22, %v5771_v32  ;;  %v2881_v37 = vmul.f32 %v2880_v33, %v5572_v31  ;;  %v2884_v0 = vsub.f32 1.0, %v2883_v41 }
 0x550   : > { %4327 = vrsqrt.f32 %v5780_v1  ;;  %vm2902_vm15 = vweird.f32 %v5778_v34  ;;  %vm2497_vm5 = vcmp.eq.f32.partialorder %v5780_v1, inf  ;;  %vm2499_vm3 = vcmp.eq.f32.partialorder %v5780_v1, 0.0 }
 0x551   : > { %v2472_v15 = vmul.f32 %v2471_v56, %v5766_v45  ;;  %v2480_v2 = vmul.f32 %v4324_v22, %v2479_v42  ;;  %v3249_v49 = vmax.f32 %v2881_v37, 0.0  ;;  %v2885_v20 = vmul.f32 %v4322_v62, %v2884_v0 }
 0x552   : > { %v2894_v0 = vor.u32 1.1754944e-38, %v2893_v26 }
 0x553   : > { %v2481_v25 = vmul.f32 0.5, %v2480_v2  ;;  %v2474_v31 = vsel %vm2473_vm7, %v5766_v45, %v2472_v15  ;;  %4057 = vmatmul.msk.f32.gmra.mxu3 %vm766_vm2, %v3249_v49  ;;  %v2886_v38 = vadd.f32 %v4322_v62, %v2885_v20 }
 0x554   : > { %v2477_v63 = vsel %vm2475_vm8, %v2476_v43, %v2474_v31  ;;  %v4326_v57 = vpop.eup %4325 }
 0x555   : > { %v2482_v35 = vsub.f32 1.5, %v2481_v25  ;;  %v2085_v28 = vpop.xlane.xlu2 %2084  ;;  %v2259_v27 = vpop.xlane.xlu1 %2258  ;;  %v2898_v33 = vmul.f32 %v4326_v57, %v5778_v34  ;;  %v5801_v45 = vadd.f32 1e-06, %v2477_v63  ;;  %v2890_v2 = vsel %vm2889_vm11, %v4322_v62, %v2886_v38 }
 0x556   : > { %v4328_v41 = vpop.eup %4327  ;;  %v2141_v56 = vmul.f32 0.25, %v2085_v28  ;;  %v5798_v42 = vmul.f32 0.33333334, %v2259_v27  ;;  %v2895_v25 = vsel %vm2892_vm12, %v2894_v0, %v2890_v2  ;;  %vm2903_vm14 = vweird.f32 %v4326_v57 }
 0x557   : > { %v2483_v37 = vmul.f32 %v4324_v22, %v2482_v35  ;;  %v2491_v15 = vmul.f32 %v4328_v41, %v5780_v1  ;;  %v2896_v20 = vmul.f32 %v2895_v25, %v5581_v55  ;;  %v2899_v22 = vsub.f32 1.0, %v2898_v33  ;;  %vm2904_vm1 = vmor %vm2902_vm15, %vm2903_vm14 }
 0x558   : > { %v5805_v43 = vsub.f32 %v5633_v40, %v2141_v56  ;;  %4329 = vrsqrt.f32 %v5798_v42  ;;  %v5814_v40 = vpop.f32.mrf.mxu2  ;;  %v2908_v35 = vand.u32 2147483648, %v5778_v34  ;;  %v2906_v38 = vand.u32 2147483647, %v5778_v34 }
 0x559   : > { %v2484_v51 = vmul.f32 %v2483_v37, %v5771_v32  ;;  %v2492_v49 = vmul.f32 %v4328_v41, %v2491_v15  ;;  %4331 = vrcp.f32 %v5801_v45  ;;  %v3250_v26 = vmax.f32 %v2896_v20, 0.0 }
 0x55a   : > { %v2205_v31 = vmul.f32 %v5805_v43, %v5805_v43  ;;  %v2900_v63 = vmul.f32 %v4326_v57, %v2899_v22  ;;  %v2488_v37 = vand.u32 2147483648, %v5771_v32  ;;  %vm2907_vm4 = vcmp.eq.f32.partialorder %v2906_v38, 8.507059e+37 }
 0x55b   : > { %v2493_v62 = vmul.f32 0.5, %v2492_v49  ;;  %v2486_v56 = vsel %vm2485_vm13, %v5771_v32, %v2484_v51  ;;  %4058 = vmatmul.msk.f32.gmra.mxu3 %vm766_vm2, %v3250_v26  ;;  %v2909_v51 = vor.u32 1.1754944e-38, %v2908_v35  ;;  %v2104_v35 = vsel %vm766_vm2, %v5764_v46, 0.0 }
 0x55c   : > { %v2275_v59 = vsel %vm766_vm2, %v2205_v31, 0.0  ;;  %v2901_v0 = vadd.f32 %v4326_v57, %v2900_v63  ;;  %v2489_v22 = vsel %vm2487_vm0, %v2488_v37, %v2486_v56  ;;  %vm2917_vm7 = vweird.f32 %v5801_v45 }
 0x55d   : > { %v2494_v28 = vsub.f32 1.5, %v2493_v62  ;;  %2276 = vadd.xlane.f32.xlu1 %v2275_v59  ;;  %v2088_v55 = vpop.xlane.xlu1 %2087  ;;  %v2262_v27 = vpop.xlane.xlu0 %2261  ;;  %vm2509_vm10 = vcmp.eq.f32.partialorder %v5798_v42, inf  ;;  %vm2511_vm14 = vcmp.eq.f32.partialorder %v5798_v42, 0.0 }
 0x55e   : > { %v4330_v33 = vpop.eup %4329  ;;  %v2142_v15 = vmul.f32 0.25, %v2088_v55  ;;  %v5822_v2 = vmul.f32 0.33333334, %v2262_v27  ;;  %v2905_v26 = vsel %vm2904_vm1, %v4326_v57, %v2901_v0 }
 0x55f   : > { %v2495_v49 = vmul.f32 %v4328_v41, %v2494_v28  ;;  %v2503_v25 = vmul.f32 %v4330_v33, %v5798_v42  ;;  %v4332_v20 = vpop.eup %4331  ;;  %v2910_v41 = vsel %vm2907_vm4, %v2909_v51, %v2905_v26  ;;  %v5837_v28 = vadd.f32 1e-06, %v2489_v22 }
 0x560   : > { %v5828_v31 = vsub.f32 %v5668_v54, %v2142_v15  ;;  %4333 = vrsqrt.f32 %v5822_v2  ;;  %v2913_v34 = vmul.f32 %v4332_v20, %v5801_v45  ;;  %v2911_v54 = vmul.f32 %v2910_v41, %v5594_v58  ;;  %v5847_v51 = vpop.f32.mrf.mxu2 }
 0x561   : > { %v2504_v62 = vmul.f32 %v4330_v33, %v2503_v25  ;;  %v2496_v32 = vmul.f32 %v2495_v49, %v5780_v1  ;;  %4335 = vrcp.f32 %v5837_v28  ;;  %v2923_v25 = vand.u32 2147483648, %v5801_v45 }
 0x562   : > { %v2206_v59 = vmul.f32 %v5828_v31, %v5828_v31  ;;  %v2914_v57 = vsub.f32 1.0, %v2913_v34  ;;  %v3251_v38 = vmax.f32 %v2911_v54, 0.0  ;;  %vm2918_vm6 = vweird.f32 %v4332_v20 }
 0x563   : > { %v2505_v63 = vmul.f32 0.5, %v2504_v62  ;;  %v2921_v62 = vand.u32 2147483647, %v5801_v45  ;;  %v2498_v26 = vsel %vm2497_vm5, %v5780_v1, %v2496_v32  ;;  %v2500_v41 = vand.u32 2147483648, %v5780_v1  ;;  %vm2919_vm8 = vmor %vm2917_vm7, %vm2918_vm6 }
 0x564   : > { %v2278_v55 = vsel %vm766_vm2, %v2206_v59, 0.0  ;;  %v2915_v49 = vmul.f32 %v4332_v20, %v2914_v57  ;;  %4059 = vmatmul.msk.f32.gmra.mxu3 %vm766_vm2, %v3251_v38  ;;  %v2107_v1 = vsel %vm766_vm2, %v5775_v50, 0.0  ;;  %vm2932_vm12 = vweird.f32 %v5837_v28 }
 0x565   : > { %v2506_v27 = vsub.f32 1.5, %v2505_v63  ;;  %v2265_v56 = vpop.xlane.xlu2 %2264  ;;  %2105 = vadd.xlane.f32.xlu1 %v2104_v35  ;;  %2279 = vadd.xlane.f32.xlu0 %v2278_v55  ;;  %v2091_v37 = vpop.xlane.xlu0 %2090  ;;  %v2924_v35 = vor.u32 1.1754944e-38, %v2923_v25  ;;  %v2501_v32 = vsel %vm2499_vm3, %v2500_v41, %v2498_v26  ;;  %vm2922_vm9 = vcmp.eq.f32.partialorder %v2921_v62, 8.507059e+37 }
 0x566   : > { %v4334_v15 = vpop.eup %4333  ;;  %v5844_v58 = vmul.f32 0.33333334, %v2265_v56  ;;  %v2143_v0 = vmul.f32 0.25, %v2091_v37  ;;  %v2916_v54 = vadd.f32 %v4332_v20, %v2915_v49  ;;  %v5864_v37 = vadd.f32 1e-06, %v2501_v32 }
 0x567   : > { %v2515_v22 = vmul.f32 %v4334_v15, %v5822_v2  ;;  %v2507_v34 = vmul.f32 %v4330_v33, %v2506_v27  ;;  %v4336_v57 = vpop.eup %4335  ;;  %vm2521_vm15 = vcmp.eq.f32.partialorder %v5822_v2, inf  ;;  %vm2523_vm1 = vcmp.eq.f32.partialorder %v5822_v2, 0.0 }
 0x568   : > { %4337 = vrsqrt.f32 %v5844_v58  ;;  %v5858_v59 = vsub.f32 %v5699_v60, %v2143_v0  ;;  %v2920_v56 = vsel %vm2919_vm8, %v4332_v20, %v2916_v54  ;;  %v2928_v45 = vmul.f32 %v4336_v57, %v5837_v28  ;;  %v5879_v54 = vpop.f32.mrf.mxu2 }
 0x569   : > { %v2516_v63 = vmul.f32 %v4334_v15, %v2515_v22  ;;  %v2925_v60 = vsel %vm2922_vm9, %v2924_v35, %v2920_v56  ;;  %v2508_v27 = vmul.f32 %v2507_v34, %v5798_v42  ;;  %v2110_v20 = vsel %vm766_vm2, %v5789_v36, 0.0 }
 0x56a   : > { %v2207_v55 = vmul.f32 %v5858_v59, %v5858_v59  ;;  %v2926_v0 = vmul.f32 %v2925_v60, %v5609_v47  ;;  %4339 = vrcp.f32 %v5864_v37  ;;  %v5885_v35 = vsel %vm766_vm2, %v5814_v40, 0.0 }
 0x56b   : > { %v2517_v38 = vmul.f32 0.5, %v2516_v63  ;;  %v2929_v63 = vsub.f32 1.0, %v2928_v45  ;;  %vm2933_vm11 = vweird.f32 %v4336_v57  ;;  %vm2947_vm5 = vweird.f32 %v5864_v37 }
 0x56c   : > { %v2281_v33 = vsel %vm766_vm2, %v2207_v55, 0.0  ;;  %v3252_v34 = vmax.f32 %v2926_v0, 0.0  ;;  %v5889_v55 = vsel %vm766_vm2, %v5847_v51, 0.0  ;;  %v2510_v0 = vsel %vm2509_vm10, %v5798_v42, %v2508_v27  ;;  %vm5911_vm13 = vmor %vm2932_vm12, %vm2933_vm11 }
 0x56d   : > { %v2094_v49 = vpop.xlane.xlu2 %2093  ;;  %2108 = vadd.xlane.f32.xlu0 %v2107_v1  ;;  %v2268_v25 = vpop.xlane.xlu1 %2267  ;;  %2282 = vadd.xlane.f32.xlu2 %v2281_v33  ;;  %v2518_v62 = vsub.f32 1.5, %v2517_v38  ;;  %v2938_v38 = vand.u32 2147483648, %v5837_v28  ;;  %v2930_v60 = vmul.f32 %v4336_v57, %v2929_v63  ;;  %v2936_v1 = vand.u32 2147483647, %v5837_v28 }
 0x56e   : > { %v5875_v22 = vpop.eup %4337  ;;  %v2144_v26 = vmul.f32 0.25, %v2094_v49  ;;  %v5877_v41 = vmul.f32 0.33333334, %v2268_v25  ;;  %4060 = vmatmul.msk.f32.gmra.mxu3 %vm766_vm2, %v3252_v34  ;;  %v5902_v33 = vsel %vm766_vm2, %v5879_v54, 0.0  ;;  %v2512_v25 = vand.u32 2147483648, %v5798_v42 }
 0x56f   : > { %v2527_v47 = vmul.f32 %v5875_v22, %v5844_v58  ;;  %v2519_v45 = vmul.f32 %v4334_v15, %v2518_v62  ;;  %v2939_v34 = vor.u32 1.1754944e-38, %v2938_v38  ;;  %vm2937_vm0 = vcmp.eq.f32.partialorder %v2936_v1, 8.507059e+37 }
 0x570   : > { %v5893_v32 = vsub.f32 %v5713_v61, %v2144_v26  ;;  %4341 = vrsqrt.f32 %v5877_v41  ;;  %v5907_v49 = vpop.eup %4339  ;;  %vm2533_vm6 = vcmp.eq.f32.partialorder %v5844_v58, inf  ;;  %vm2545_vm8 = vcmp.eq.f32.partialorder %v5877_v41, inf }
 0x571   : > { %v2528_v56 = vmul.f32 %v5875_v22, %v2527_v47  ;;  %v2931_v47 = vadd.f32 %v4336_v57, %v2930_v60  ;;  %v2943_v62 = vmul.f32 %v5907_v49, %v5864_v37  ;;  %v2513_v60 = vsel %vm2511_vm14, %v2512_v25, %v2510_v0 }
 0x572   : > { %v2208_v61 = vmul.f32 %v5893_v32, %v5893_v32  ;;  %v2520_v38 = vmul.f32 %v2519_v45, %v5822_v2  ;;  %v5933_v0 = vadd.f32 1e-06, %v2513_v60  ;;  %v2524_v45 = vand.u32 2147483648, %v5822_v2 }
 0x573   : > { %v2529_v26 = vmul.f32 0.5, %v2528_v56  ;;  %v2935_v27 = vsel %vm5911_vm13, %v4336_v57, %v2931_v47  ;;  %v2944_v57 = vsub.f32 1.0, %v2943_v62  ;;  %vm2948_vm4 = vweird.f32 %v5907_v49 }
 0x574   : > { %v2284_v15 = vsel %vm766_vm2, %v2208_v61, 0.0  ;;  %v2940_v61 = vsel %vm2937_vm0, %v2939_v34, %v2935_v27  ;;  %vm2949_vm3 = vmor %vm2947_vm5, %vm2948_vm4  ;;  %vm2962_vm9 = vweird.f32 %v5933_v0  ;;  %vm2535_vm13 = vcmp.eq.f32.partialorder %v5844_v58, 0.0 }
 0x575   : > { %2285 = vadd.xlane.f32.xlu1 %v2284_v15  ;;  %v2097_v28 = vpop.xlane.xlu1 %2096  ;;  %2111 = vadd.xlane.f32.xlu2 %v2110_v20  ;;  %v2271_v56 = vpop.xlane.xlu0 %2270  ;;  %v2530_v42 = vsub.f32 1.5, %v2529_v26  ;;  %v2941_v63 = vmul.f32 %v2940_v61, %v5637_v30  ;;  %v2951_v30 = vand.u32 2147483647, %v5864_v37  ;;  %v2953_v26 = vand.u32 2147483648, %v5864_v37 }
 0x576   : > { %v4342_v23 = vpop.eup %4341  ;;  %v2145_v17 = vmul.f32 0.25, %v2097_v28  ;;  %v2274_v16 = vpop.xlane.xlu2 %2273  ;;  %v5923_v14 = vmul.f32 0.33333334, %v2271_v56  ;;  %v2536_v15 = vand.u32 2147483648, %v5844_v58  ;;  %vm2547_vm0 = vcmp.eq.f32.partialorder %v5877_v41, 0.0 }
 0x577   : > { %v2539_v13 = vmul.f32 %v4342_v23, %v5877_v41  ;;  %v5930_v20 = vmul.f32 0.33333334, %v2274_v16  ;;  %v3253_v47 = vmax.f32 %v2941_v63, 0.0  ;;  %v2522_v16 = vsel %vm2521_vm15, %v5822_v2, %v2520_v38 }
 0x578   : > { %v5928_v1 = vsub.f32 %v5729_v18, %v2145_v17  ;;  %4343 = vrsqrt.f32 %v5923_v14  ;;  %v2945_v18 = vmul.f32 %v5907_v49, %v2944_v57  ;;  %v2531_v34 = vmul.f32 %v5875_v22, %v2530_v42 }
 0x579   : > { %v2540_v25 = vmul.f32 %v4342_v23, %v2539_v13  ;;  %4345 = vrsqrt.f32 %v5930_v20  ;;  %4061 = vmatmul.msk.f32.gmra.mxu3 %vm766_vm2, %v3253_v47  ;;  %v2525_v60 = vsel %vm2523_vm1, %v2524_v45, %v2522_v16  ;;  %v2548_v38 = vand.u32 2147483648, %v5877_v41 }
 0x57a   : > { %v2209_v13 = vmul.f32 %v5928_v1, %v5928_v1  ;;  %4347 = vrcp.f32 %v5933_v0  ;;  %v2946_v27 = vadd.f32 %v5907_v49, %v2945_v18  ;;  %v2954_v37 = vor.u32 1.1754944e-38, %v2953_v26 }
 0x57b   : > { %v2541_v17 = vmul.f32 0.5, %v2540_v25  ;;  %v5961_v63 = vadd.f32 1e-06, %v2525_v60  ;;  %vm2952_vm7 = vcmp.eq.f32.partialorder %v2951_v30, 8.507059e+37  ;;  %v2966_v2 = vand.u32 2147483647, %v5933_v0 }
 0x57c   : > { %v2287_v28 = vsel %vm766_vm2, %v2209_v13, 0.0  ;;  %v2950_v57 = vsel %vm2949_vm3, %v5907_v49, %v2946_v27  ;;  %v2532_v26 = vmul.f32 %v2531_v34, %v5844_v58  ;;  %v2968_v34 = vand.u32 2147483648, %v5933_v0 }
 0x57d   : > { %v2542_v62 = vsub.f32 1.5, %v2541_v17  ;;  %2114 = vadd.xlane.f32.xlu1 %v5885_v35  ;;  %v2100_v56 = vpop.xlane.xlu0 %2099  ;;  %2288 = vadd.xlane.f32.xlu0 %v2287_v28  ;;  %v2955_v25 = vsel %vm2952_vm7, %v2954_v37, %v2950_v57  ;;  %4349 = vrcp.f32 %v5961_v63  ;;  %vm5982_vm10 = vcmp.eq.f32.partialorder %v2966_v2, 8.507059e+37 }
 0x57e   : > { %v4344_v22 = vpop.eup %4343  ;;  %v2103_v61 = vpop.xlane.xlu2 %2102  ;;  %v2146_v42 = vmul.f32 0.25, %v2100_v56  ;;  %v2956_v30 = vmul.f32 %v2955_v25, %v5663_v24  ;;  %vm2557_vm11 = vcmp.eq.f32.partialorder %v5923_v14, inf  ;;  %v2534_v25 = vsel %vm2533_vm6, %v5844_v58, %v2532_v26 }
 0x57f   : > { %v2551_v35 = vmul.f32 %v4344_v22, %v5923_v14  ;;  %v4346_v45 = vpop.eup %4345  ;;  %v2147_v47 = vmul.f32 0.25, %v2103_v61  ;;  %v2543_v17 = vmul.f32 %v4342_v23, %v2542_v62  ;;  %vm2569_vm1 = vcmp.eq.f32.partialorder %v5930_v20, inf }
 0x580   : > { %v5967_v16 = vsub.f32 %v5745_v19, %v2146_v42  ;;  %v2563_v18 = vmul.f32 %v4346_v45, %v5930_v20  ;;  %v4348_v49 = vpop.eup %4347  ;;  %v3254_v62 = vmax.f32 %v2956_v30, 0.0  ;;  %v2969_v30 = vor.u32 1.1754944e-38, %v2968_v34 }
 0x581   : > { %v2552_v13 = vmul.f32 %v4344_v22, %v2551_v35  ;;  %v5975_v27 = vsub.f32 %v5758_v39, %v2147_v47  ;;  %v2958_v23 = vmul.f32 %v4348_v49, %v5933_v0  ;;  %v2544_v37 = vmul.f32 %v2543_v17, %v5877_v41 }
 0x582   : > { %v2210_v19 = vmul.f32 %v5967_v16, %v5967_v16  ;;  %v2564_v28 = vmul.f32 %v4346_v45, %v2563_v18  ;;  %4062 = vmatmul.msk.f32.gmra.mxu3 %vm766_vm2, %v3254_v62  ;;  %vm2963_vm12 = vweird.f32 %v4348_v49  ;;  %vm2977_vm4 = vweird.f32 %v5961_v63 }
 0x583   : > { %v2553_v56 = vmul.f32 0.5, %v2552_v13  ;;  %v2211_v24 = vmul.f32 %v5975_v27, %v5975_v27  ;;  %v2959_v35 = vsub.f32 1.0, %v2958_v23  ;;  %v4350_v57 = vpop.eup %4349  ;;  %vm2964_vm15 = vmor %vm2962_vm9, %vm2963_vm12  ;;  %v2546_v34 = vsel %vm2545_vm8, %v5877_v41, %v2544_v37 }
 0x584   : > { %v2290_v39 = vsel %vm766_vm2, %v2210_v19, 0.0  ;;  %v2565_v61 = vmul.f32 0.5, %v2564_v28  ;;  %v2973_v13 = vmul.f32 %v4350_v57, %v5961_v63  ;;  %v2981_v19 = vand.u32 2147483647, %v5961_v63 }
 0x585   : > { %v2554_v42 = vsub.f32 1.5, %v2553_v56  ;;  %2291 = vadd.xlane.f32.xlu2 %v2290_v39  ;;  %2117 = vadd.xlane.f32.xlu0 %v5889_v55  ;;  %v2293_v2 = vsel %vm766_vm2, %v2211_v24, 0.0  ;;  %v2960_v18 = vmul.f32 %v4348_v49, %v2959_v35  ;;  %v2983_v28 = vand.u32 2147483648, %v5961_v63 }
 0x586   : > { %v2566_v47 = vsub.f32 1.5, %v2565_v61  ;;  %2294 = vadd.xlane.f32.xlu1 %v2293_v2  ;;  %v2537_v55 = vsel %vm2535_vm13, %v2536_v15, %v2534_v25  ;;  %v2974_v62 = vsub.f32 1.0, %v2973_v13  ;;  %vm2978_vm14 = vweird.f32 %v4350_v57 }
 0x587   : > { %v2555_v17 = vmul.f32 %v4344_v22, %v2554_v42  ;;  %v2961_v23 = vadd.f32 %v4348_v49, %v2960_v18  ;;  %v2745_v22 = vadd.f32 1e-06, %v2537_v55  ;;  %v2549_v24 = vsel %vm2547_vm0, %v2548_v38, %v2546_v34  ;;  %vm2979_vm5 = vmor %vm2977_vm4, %vm2978_vm14 }
 0x588   : > { %v2567_v56 = vmul.f32 %v4346_v45, %v2566_v47  ;;  %v2975_v45 = vmul.f32 %v4350_v57, %v2974_v62  ;;  %v2572_v39 = vand.u32 2147483648, %v5930_v20  ;;  %v2560_v42 = vand.u32 2147483648, %v5923_v14 }
 0x589   : > { %v2556_v26 = vmul.f32 %v2555_v17, %v5923_v14  ;;  %v2965_v15 = vsel %vm2964_vm15, %v4348_v49, %v2961_v23  ;;  %4351 = vrcp.f32 %v2745_v22  ;;  %v2746_v49 = vadd.f32 1e-06, %v2549_v24 }
 0x58a   : > { %v2568_v58 = vmul.f32 %v2567_v56, %v5930_v20  ;;  %v2970_v0 = vsel %vm5982_vm10, %v2969_v30, %v2965_v15  ;;  %v2976_v37 = vadd.f32 %v4350_v57, %v2975_v45  ;;  %v2984_v41 = vor.u32 1.1754944e-38, %v2983_v28  ;;  %v6033_v30 = vpop.f32.mrf.mxu3 }
 0x58b   : > { %v2971_v61 = vmul.f32 %v2970_v0, %v5686_v48  ;;  %v2558_v38 = vsel %vm2557_vm11, %v5923_v14, %v2556_v26  ;;  %vm2982_vm6 = vcmp.eq.f32.partialorder %v2981_v19, 8.507059e+37  ;;  %4353 = vrcp.f32 %v2746_v49 }
 0x58c   : > { %v2570_v60 = vsel %vm2569_vm1, %v5930_v20, %v2568_v58  ;;  %v2980_v2 = vsel %vm2979_vm5, %v4350_v57, %v2976_v37  ;;  %vm2559_vm3 = vcmp.eq.f32.partialorder %v5923_v14, 0.0  ;;  %vm2571_vm7 = vcmp.eq.f32.partialorder %v5930_v20, 0.0 }
 0x58d   : > { %2120 = vadd.xlane.f32.xlu2 %v5902_v33  ;;  %v3255_v35 = vmax.f32 %v2971_v61, 0.0  ;;  %v2985_v48 = vsel %vm2982_vm6, %v2984_v41, %v2980_v2  ;;  %v2561_v63 = vsel %vm2559_vm3, %v2560_v42, %v2558_v38  ;;  %v2573_v25 = vsel %vm2571_vm7, %v2572_v39, %v2570_v60 }
 0x58e   : > { %v2986_v33 = vmul.f32 %v2985_v48, %v5706_v44  ;;  %v2747_v17 = vadd.f32 1e-06, %v2561_v63  ;;  %v6031_v18 = vadd.f32 1e-06, %v2573_v25  ;;  %v2998_v14 = vand.u32 2147483648, %v2745_v22 }
 0x58f   : > { %4063 = vmatmul.msk.f32.gmra.mxu3 %vm766_vm2, %v3255_v35  ;;  %v4352_v47 = vpop.eup %4351  ;;  %v2996_v44 = vand.u32 2147483647, %v2745_v22  ;;  %vm2992_vm9 = vweird.f32 %v2745_v22  ;;  %v3013_v62 = vand.u32 2147483648, %v2746_v49  ;;  %v3011_v15 = vand.u32 2147483647, %v2746_v49 }
 0x590   : > { %v2988_v13 = vmul.f32 %v4352_v47, %v2745_v22  ;;  %4355 = vrcp.f32 %v2747_v17  ;;  %v3256_v19 = vmax.f32 %v2986_v33, 0.0  ;;  %vm2993_vm8 = vweird.f32 %v4352_v47 }
 0x591   : > { %v4354_v57 = vpop.eup %4353  ;;  %4357 = vrcp.f32 %v6031_v18  ;;  %vm2994_vm10 = vmor %vm2992_vm9, %vm2993_vm8  ;;  %v2999_v34 = vor.u32 1.1754944e-38, %v2998_v14  ;;  %vm2997_vm12 = vcmp.eq.f32.partialorder %v2996_v44, 8.507059e+37  ;;  %vm3007_vm13 = vweird.f32 %v2746_v49 }
 0x592   : > { %v2989_v28 = vsub.f32 1.0, %v2988_v13  ;;  %v3003_v20 = vmul.f32 %v4354_v57, %v2746_v49  ;;  %vm3008_vm11 = vweird.f32 %v4354_v57  ;;  %v6037_v37 = vpop.f32.mrf.mxu3  ;;  %v3014_v22 = vor.u32 1.1754944e-38, %v3013_v62 }
 0x593   : > { %vm3009_vm14 = vmor %vm3007_vm13, %vm3008_vm11  ;;  %vm3012_vm15 = vcmp.eq.f32.partialorder %v3011_v15, 8.507059e+37  ;;  %vm3022_vm1 = vweird.f32 %v2747_v17  ;;  %v3028_v33 = vand.u32 2147483648, %v2747_v17  ;;  %v3026_v25 = vand.u32 2147483647, %v2747_v17 }
 0x594   : > { %v2990_v55 = vmul.f32 %v4352_v47, %v2989_v28  ;;  %v3004_v56 = vsub.f32 1.0, %v3003_v20  ;;  %vm3037_vm3 = vweird.f32 %v6031_v18 }
 0x595   : > { %v3029_v13 = vor.u32 1.1754944e-38, %v3028_v33  ;;  %vm3027_vm5 = vcmp.eq.f32.partialorder %v3026_v25, 8.507059e+37 }
 0x596   : > { %v2991_v23 = vadd.f32 %v4352_v47, %v2990_v55  ;;  %v4356_v26 = vpop.eup %4355  ;;  %v3005_v58 = vmul.f32 %v4354_v57, %v3004_v56 }
 0x597   : > { %4064 = vmatmul.msk.f32.gmra.mxu3 %vm766_vm2, %v3256_v19  ;;  %v4358_v45 = vpop.eup %4357  ;;  %v3018_v39 = vmul.f32 %v4356_v26, %v2747_v17  ;;  %vm3023_vm0 = vweird.f32 %v4356_v26  ;;  %v3041_v17 = vand.u32 2147483647, %v6031_v18 }
 0x598   : > { %v2995_v24 = vsel %vm2994_vm10, %v4352_v47, %v2991_v23  ;;  %v3006_v61 = vadd.f32 %v4354_v57, %v3005_v58  ;;  %v3033_v38 = vmul.f32 %v4358_v45, %v6031_v18  ;;  %vm3024_vm4 = vmor %vm3022_vm1, %vm3023_vm0  ;;  %vm3038_vm6 = vweird.f32 %v4358_v45 }
 0x599   : > { %v3000_v0 = vsel %vm2997_vm12, %v2999_v34, %v2995_v24  ;;  %v3019_v41 = vsub.f32 1.0, %v3018_v39  ;;  %vm3039_vm7 = vmor %vm3037_vm3, %vm3038_vm6  ;;  %vm3042_vm8 = vcmp.eq.f32.partialorder %v3041_v17, 8.507059e+37 }
 0x59a   : > { %v3001_v42 = vmul.f32 %v3000_v0, %v5721_v29  ;;  %v3010_v60 = vsel %vm3009_vm14, %v4354_v57, %v3006_v61  ;;  %v3034_v29 = vsub.f32 1.0, %v3033_v38  ;;  %v6043_v14 = vpop.f32.mrf.mxu3 }
 0x59b   : > { %v3015_v2 = vsel %vm3012_vm15, %v3014_v22, %v3010_v60  ;;  %v3020_v48 = vmul.f32 %v4356_v26, %v3019_v41 }
 0x59c   : > { %v3257_v35 = vmax.f32 %v3001_v42, 0.0  ;;  %v3016_v49 = vmul.f32 %v3015_v2, %v5733_v52  ;;  %v3035_v57 = vmul.f32 %v4358_v45, %v3034_v29  ;;  %v3043_v52 = vand.u32 2147483648, %v6031_v18 }
 0x59d   : > { %v3021_v63 = vadd.f32 %v4356_v26, %v3020_v48 }
 0x59e   : > { %v3258_v19 = vmax.f32 %v3016_v49, 0.0  ;;  %v3036_v55 = vadd.f32 %v4358_v45, %v3035_v57  ;;  %v3044_v23 = vor.u32 1.1754944e-38, %v3043_v52 }
 0x59f   : > { %4065 = vmatmul.msk.f32.gmra.mxu3 %vm766_vm2, %v3257_v35  ;;  %v3025_v47 = vsel %vm3024_vm4, %v4356_v26, %v3021_v63 }
 0x5a0   : > { %v3030_v28 = vsel %vm3027_vm5, %v3029_v13, %v3025_v47  ;;  %v3040_v56 = vsel %vm3039_vm7, %v4358_v45, %v3036_v55 }
 0x5a1   : > { %v3031_v20 = vmul.f32 %v3030_v28, %v5748_v53  ;;  %v3045_v62 = vsel %vm3042_vm8, %v3044_v23, %v3040_v56 }
 0x5a2   : > { %v6050_v26 = vpop.f32.mrf.mxu3  ;;  %v3046_v53 = vmul.f32 %v3045_v62, %v5742_v21 }
 0x5a3   : > { %v3259_v44 = vmax.f32 %v3031_v20, 0.0 }
 0x5a4   : > { %v3260_v34 = vmax.f32 %v3046_v53, 0.0 }
 0x5a7   : > { %4066 = vmatmul.msk.f32.gmra.mxu3 %vm766_vm2, %v3258_v19 }
 0x5aa   : > { %v6055_v58 = vpop.f32.mrf.mxu3 }
 0x5af   : > { %4067 = vmatmul.msk.f32.gmra.mxu3 %vm766_vm2, %v3259_v44 }
 0x5b2   : > { %v6057_v15 = vpop.f32.mrf.mxu3 }
 0x5b7   : > { %4068 = vmatmul.msk.f32.gmra.mxu3 %vm766_vm2, %v3260_v34 }
 0x5ba   : > { %v6059_v18 = vpop.f32.mrf.mxu3 }
 0x5d0   : > { %v2277_v24 = vpop.xlane.xlu1 %2276 }
 0x5d1   : > { %v2333_v45 = vmul.f32 0.33333334, %v2277_v24 }
 0x5d3   : > { %4359 = vrsqrt.f32 %v2333_v45  ;;  %vm2581_vm9 = vcmp.eq.f32.partialorder %v2333_v45, inf  ;;  %v2584_v55 = vand.u32 2147483648, %v2333_v45  ;;  %vm2583_vm10 = vcmp.eq.f32.partialorder %v2333_v45, 0.0 }
 0x5d6   : > { %v6061_v39 = vpop.f32.mrf.mxu3 }
 0x5d8   : > { %v2106_v0 = vpop.xlane.xlu1 %2105  ;;  %v2280_v61 = vpop.xlane.xlu0 %2279 }
 0x5d9   : > { %v4360_v42 = vpop.eup %4359  ;;  %v2148_v22 = vmul.f32 0.25, %v2106_v0  ;;  %v2334_v41 = vmul.f32 0.33333334, %v2280_v61 }
 0x5da   : > { %v2575_v21 = vmul.f32 %v4360_v42, %v2333_v45 }
 0x5db   : > { %v6064_v38 = vsub.f32 %v5764_v46, %v2148_v22  ;;  %4361 = vrsqrt.f32 %v2334_v41  ;;  %vm2593_vm11 = vcmp.eq.f32.partialorder %v2334_v41, inf  ;;  %vm2595_vm12 = vcmp.eq.f32.partialorder %v2334_v41, 0.0 }
 0x5dc   : > { %v2576_v60 = vmul.f32 %v4360_v42, %v2575_v21 }
 0x5dd   : > { %v2212_v35 = vmul.f32 %v6064_v38, %v6064_v38 }
 0x5de   : > { %v2577_v2 = vmul.f32 0.5, %v2576_v60  ;;  %v6071_v46 = vpop.f32.mrf.mxu3 }
 0x5df   : > { %v2296_v48 = vsel %vm766_vm2, %v2212_v35, 0.0 }
 0x5e0   : > { %v2578_v33 = vsub.f32 1.5, %v2577_v2  ;;  %2297 = vadd.xlane.f32.xlu0 %v2296_v48  ;;  %v2283_v49 = vpop.xlane.xlu2 %2282  ;;  %v2109_v63 = vpop.xlane.xlu0 %2108  ;;  %v2596_v2 = vand.u32 2147483648, %v2334_v41 }
 0x5e1   : > { %v4362_v25 = vpop.eup %4361  ;;  %v6069_v29 = vmul.f32 0.33333334, %v2283_v49  ;;  %v2149_v47 = vmul.f32 0.25, %v2109_v63 }
 0x5e2   : > { %v2579_v13 = vmul.f32 %v4360_v42, %v2578_v33  ;;  %v2587_v19 = vmul.f32 %v4362_v25, %v2334_v41 }
 0x5e3   : > { %4363 = vrsqrt.f32 %v6069_v29  ;;  %v6075_v57 = vsub.f32 %v5775_v50, %v2149_v47  ;;  %vm2605_vm13 = vcmp.eq.f32.partialorder %v6069_v29, inf  ;;  %vm2607_vm15 = vcmp.eq.f32.partialorder %v6069_v29, 0.0 }
 0x5e4   : > { %v2580_v28 = vmul.f32 %v2579_v13, %v2333_v45  ;;  %v2588_v20 = vmul.f32 %v4362_v25, %v2587_v19 }
 0x5e5   : > { %v2213_v52 = vmul.f32 %v6075_v57, %v6075_v57 }
 0x5e6   : > { %v2589_v17 = vmul.f32 0.5, %v2588_v20  ;;  %v2582_v44 = vsel %vm2581_vm9, %v2333_v45, %v2580_v28 }
 0x5e7   : > { %v2299_v56 = vsel %vm766_vm2, %v2213_v52, 0.0  ;;  %v2585_v23 = vsel %vm2583_vm10, %v2584_v55, %v2582_v44  ;;  %v6084_v60 = vpop.f32.mrf.mxu3 }
 0x5e8   : > { %v2590_v62 = vsub.f32 1.5, %v2589_v17  ;;  %v2286_v53 = vpop.xlane.xlu1 %2285  ;;  %v2112_v34 = vpop.xlane.xlu2 %2111  ;;  %2300 = vadd.xlane.f32.xlu1 %v2299_v56  ;;  %v2749_v24 = vadd.f32 1e-06, %v2585_v23 }
 0x5e9   : > { %v4364_v50 = vpop.eup %4363  ;;  %v6080_v0 = vmul.f32 0.33333334, %v2286_v53  ;;  %v2150_v61 = vmul.f32 0.25, %v2112_v34 }
 0x5ea   : > { %v2591_v42 = vmul.f32 %v4362_v25, %v2590_v62  ;;  %v2599_v22 = vmul.f32 %v4364_v50, %v6069_v29  ;;  %4365 = vrcp.f32 %v2749_v24  ;;  %vm3052_vm0 = vweird.f32 %v2749_v24 }
 0x5eb   : > { %4367 = vrsqrt.f32 %v6080_v0  ;;  %v6087_v35 = vsub.f32 %v5789_v36, %v2150_v61  ;;  %vm2617_vm5 = vcmp.eq.f32.partialorder %v6080_v0, inf  ;;  %vm2619_vm3 = vcmp.eq.f32.partialorder %v6080_v0, 0.0 }
 0x5ec   : > { %v2592_v21 = vmul.f32 %v2591_v42, %v2334_v41  ;;  %v2600_v45 = vmul.f32 %v4364_v50, %v2599_v22  ;;  %v3058_v22 = vand.u32 2147483648, %v2749_v24 }
 0x5ed   : > { %v2214_v33 = vmul.f32 %v6087_v35, %v6087_v35 }
 0x5ee   : > { %v2601_v48 = vmul.f32 0.5, %v2600_v45  ;;  %v2594_v49 = vsel %vm2593_vm11, %v2334_v41, %v2592_v21  ;;  %v2608_v41 = vand.u32 2147483648, %v6069_v29 }
 0x5ef   : > { %v2597_v63 = vsel %vm2595_vm12, %v2596_v2, %v2594_v49  ;;  %v2302_v19 = vsel %vm766_vm2, %v2214_v33, 0.0 }
 0x5f0   : > { %v4366_v25 = vpop.eup %4365  ;;  %v2602_v47 = vsub.f32 1.5, %v2601_v48  ;;  %v2115_v13 = vpop.xlane.xlu1 %2114  ;;  %v6092_v28 = vadd.f32 1e-06, %v2597_v63  ;;  %2303 = vadd.xlane.f32.xlu2 %v2302_v19 }
 0x5f1   : > { %v4368_v20 = vpop.eup %4367  ;;  %v2151_v55 = vmul.f32 0.25, %v2115_v13  ;;  %v2289_v36 = vpop.xlane.xlu0 %2288  ;;  %v3048_v52 = vmul.f32 %v4366_v25, %v2749_v24  ;;  %vm3053_vm14 = vweird.f32 %v4366_v25 }
 0x5f2   : > { %v2603_v17 = vmul.f32 %v4364_v50, %v2602_v47  ;;  %v2611_v44 = vmul.f32 %v4368_v20, %v6080_v0  ;;  %v6095_v56 = vmul.f32 0.33333334, %v2289_v36  ;;  %4369 = vrcp.f32 %v6092_v28  ;;  %v6107_v45 = vpop.f32.mrf.mxu3  ;;  %vm6114_vm1 = vmor %vm3052_vm0, %vm3053_vm14 }
 0x5f3   : > { %v6101_v23 = vsub.f32 %v5814_v40, %v2151_v55  ;;  %v3049_v62 = vsub.f32 1.0, %v3048_v52  ;;  %v3056_v50 = vand.u32 2147483647, %v2749_v24  ;;  %v3059_v36 = vor.u32 1.1754944e-38, %v3058_v22 }
 0x5f4   : > { %v2604_v53 = vmul.f32 %v2603_v17, %v6069_v29  ;;  %v2612_v34 = vmul.f32 %v4368_v20, %v2611_v44  ;;  %4371 = vrsqrt.f32 %v6095_v56  ;;  %vm3067_vm7 = vweird.f32 %v6092_v28 }
 0x5f5   : > { %v2215_v61 = vmul.f32 %v6101_v23, %v6101_v23  ;;  %v3050_v42 = vmul.f32 %v4366_v25, %v3049_v62  ;;  %vm3057_vm4 = vcmp.eq.f32.partialorder %v3056_v50, 8.507059e+37  ;;  %vm2629_vm10 = vcmp.eq.f32.partialorder %v6095_v56, inf }
 0x5f6   : > { %v2613_v21 = vmul.f32 0.5, %v2612_v34  ;;  %v2606_v2 = vsel %vm2605_vm13, %v6069_v29, %v2604_v53  ;;  %vm2631_vm11 = vcmp.eq.f32.partialorder %v6095_v56, 0.0 }
 0x5f7   : > { %v2305_v40 = vsel %vm766_vm2, %v2215_v61, 0.0  ;;  %v3051_v48 = vadd.f32 %v4366_v25, %v3050_v42  ;;  %v2609_v33 = vsel %vm2607_vm15, %v2608_v41, %v2606_v2 }
 0x5f8   : > { %v6112_v49 = vpop.eup %4369  ;;  %v2614_v63 = vsub.f32 1.5, %v2613_v21  ;;  %2306 = vadd.xlane.f32.xlu0 %v2305_v40  ;;  %v2292_v47 = vpop.xlane.xlu2 %2291  ;;  %v6124_v62 = vadd.f32 1e-06, %v2609_v33  ;;  %v3071_v40 = vand.u32 2147483647, %v6092_v28 }
 0x5f9   : > { %v6118_v19 = vmul.f32 0.33333334, %v2292_v47  ;;  %v2118_v55 = vpop.xlane.xlu0 %2117  ;;  %v3055_v29 = vsel %vm6114_vm1, %v4366_v25, %v3051_v48  ;;  %v2295_v17 = vpop.xlane.xlu1 %2294  ;;  %v3063_v41 = vmul.f32 %v6112_v49, %v6092_v28  ;;  %v3073_v48 = vand.u32 2147483648, %v6092_v28 }
 0x5fa   : > { %v4372_v52 = vpop.eup %4371  ;;  %v2615_v24 = vmul.f32 %v4368_v20, %v2614_v63  ;;  %v2152_v44 = vmul.f32 0.25, %v2118_v55  ;;  %v6127_v34 = vmul.f32 0.33333334, %v2295_v17  ;;  %v3060_v61 = vsel %vm3057_vm4, %v3059_v36, %v3055_v29 }
 0x5fb   : > { %v2623_v53 = vmul.f32 %v4372_v52, %v6095_v56  ;;  %4373 = vrsqrt.f32 %v6118_v19  ;;  %v3061_v42 = vmul.f32 %v3060_v61, %v5805_v43  ;;  %v3064_v21 = vsub.f32 1.0, %v3063_v41 }
 0x5fc   : > { %v6131_v25 = vsub.f32 %v5847_v51, %v2152_v44  ;;  %4375 = vrsqrt.f32 %v6127_v34  ;;  %v2616_v50 = vmul.f32 %v2615_v24, %v6080_v0  ;;  %v6142_v51 = vpop.f32.mrf.mxu3  ;;  %vm3068_vm6 = vweird.f32 %v6112_v49 }
 0x5fd   : > { %v2624_v20 = vmul.f32 %v4372_v52, %v2623_v53  ;;  %4377 = vrcp.f32 %v6124_v62  ;;  %v3261_v33 = vmax.f32 %v3061_v42, 0.0  ;;  %v3065_v13 = vmul.f32 %v6112_v49, %v3064_v21  ;;  %vm3069_vm8 = vmor %vm3067_vm7, %vm3068_vm6 }
 0x5fe   : > { %v2216_v22 = vmul.f32 %v6131_v25, %v6131_v25  ;;  %v2620_v55 = vand.u32 2147483648, %v6080_v0  ;;  %v2618_v44 = vsel %vm2617_vm5, %v6080_v0, %v2616_v50  ;;  %vm3072_vm9 = vcmp.eq.f32.partialorder %v3071_v40, 8.507059e+37 }
 0x5ff   : > { %v2625_v2 = vmul.f32 0.5, %v2624_v20  ;;  %4069 = vmatmul.msk.f32.gmra.mxu3 %vm766_vm2, %v3261_v33  ;;  %v3066_v17 = vadd.f32 %v6112_v49, %v3065_v13  ;;  %v3074_v20 = vor.u32 1.1754944e-38, %v3073_v48  ;;  %vm2641_vm13 = vcmp.eq.f32.partialorder %v6118_v19, inf }
 0x600   : > { %v2121_v63 = vpop.xlane.xlu2 %2120  ;;  %v2308_v47 = vsel %vm766_vm2, %v2216_v22, 0.0  ;;  %v2621_v28 = vsel %vm2619_vm3, %v2620_v55, %v2618_v44  ;;  %vm3082_vm14 = vweird.f32 %v6124_v62  ;;  %vm2653_vm15 = vcmp.eq.f32.partialorder %v6127_v34, inf }
 0x601   : > { %v4374_v43 = vpop.eup %4373  ;;  %v2626_v29 = vsub.f32 1.5, %v2625_v2  ;;  %v2153_v36 = vmul.f32 0.25, %v2121_v63  ;;  %2309 = vadd.xlane.f32.xlu1 %v2308_v47  ;;  %v3070_v21 = vsel %vm3069_vm8, %v6112_v49, %v3066_v17  ;;  %v2632_v49 = vand.u32 2147483648, %v6095_v56 }
 0x602   : > { %v2635_v24 = vmul.f32 %v4374_v43, %v6118_v19  ;;  %v4376_v41 = vpop.eup %4375  ;;  %v3075_v0 = vsel %vm3072_vm9, %v3074_v20, %v3070_v21  ;;  %v3088_v17 = vand.u32 2147483648, %v6124_v62  ;;  %vm2655_vm4 = vcmp.eq.f32.partialorder %v6127_v34, 0.0 }
 0x603   : > { %v2627_v53 = vmul.f32 %v4372_v52, %v2626_v29  ;;  %v6157_v61 = vsub.f32 %v5879_v54, %v2153_v36  ;;  %v2647_v42 = vmul.f32 %v4376_v41, %v6127_v34  ;;  %v4378_v2 = vpop.eup %4377  ;;  %v6166_v54 = vadd.f32 1e-06, %v2621_v28 }
 0x604   : > { %v2636_v22 = vmul.f32 %v4374_v43, %v2635_v24  ;;  %v3076_v40 = vmul.f32 %v3075_v0, %v5828_v31  ;;  %v3078_v48 = vmul.f32 %v4378_v2, %v6124_v62  ;;  %v3086_v24 = vand.u32 2147483647, %v6124_v62 }
 0x605   : > { %v2628_v33 = vmul.f32 %v2627_v53, %v6095_v56  ;;  %v2217_v52 = vmul.f32 %v6157_v61, %v6157_v61  ;;  %v2648_v50 = vmul.f32 %v4376_v41, %v2647_v42  ;;  %4379 = vrcp.f32 %v6166_v54  ;;  %v6178_v20 = vpop.f32.mrf.mxu3 }
 0x606   : > { %v2637_v63 = vmul.f32 0.5, %v2636_v22  ;;  %v3262_v29 = vmax.f32 %v3076_v40, 0.0  ;;  %v3079_v36 = vsub.f32 1.0, %v3078_v48  ;;  %vm3083_vm12 = vweird.f32 %v4378_v2 }
 0x607   : > { %v2311_v47 = vsel %vm766_vm2, %v2217_v52, 0.0  ;;  %v2649_v13 = vmul.f32 0.5, %v2648_v50  ;;  %v2630_v31 = vsel %vm2629_vm10, %v6095_v56, %v2628_v33  ;;  %v2644_v56 = vand.u32 2147483648, %v6118_v19  ;;  %vm3084_vm0 = vmor %vm3082_vm14, %vm3083_vm12 }
 0x608   : > { %v2638_v55 = vsub.f32 1.5, %v2637_v63  ;;  %2312 = vadd.xlane.f32.xlu2 %v2311_v47  ;;  %4070 = vmatmul.msk.f32.gmra.mxu3 %vm766_vm2, %v3262_v29  ;;  %v3080_v42 = vmul.f32 %v4378_v2, %v3079_v36  ;;  %v2633_v22 = vsel %vm2631_vm11, %v2632_v49, %v2630_v31  ;;  %vm3087_vm1 = vcmp.eq.f32.partialorder %v3086_v24, 8.507059e+37 }
 0x609   : > { %v2650_v44 = vsub.f32 1.5, %v2649_v13  ;;  %v6186_v52 = vadd.f32 1e-06, %v2633_v22  ;;  %vm2643_vm5 = vcmp.eq.f32.partialorder %v6118_v19, 0.0  ;;  %v3103_v24 = vand.u32 2147483648, %v6166_v54 }
 0x60a   : > { %v2639_v53 = vmul.f32 %v4374_v43, %v2638_v55  ;;  %v3081_v0 = vadd.f32 %v4378_v2, %v3080_v42  ;;  %v3089_v43 = vor.u32 1.1754944e-38, %v3088_v17  ;;  %v6214_v42 = vld [vmem:[%s6593_s7] ss:$0 sm:$0xff]  ;;  %vm3097_vm3 = vweird.f32 %v6166_v54 }
 0x60b   : > { %v2651_v21 = vmul.f32 %v4376_v41, %v2650_v44  ;;  %v4380_v33 = vpop.eup %4379  ;;  %v2656_v41 = vand.u32 2147483648, %v6127_v34  ;;  %4381 = vrcp.f32 %v6186_v52  ;;  %vm3112_vm10 = vweird.f32 %v6186_v52 }
 0x60c   : > { %v2640_v28 = vmul.f32 %v2639_v53, %v6118_v19  ;;  %v3085_v40 = vsel %vm3084_vm0, %v4378_v2, %v3081_v0  ;;  %v3093_v62 = vmul.f32 %v4380_v33, %v6166_v54  ;;  %v6200_v2 = vld [vmem:[%s6592_s6] ss:$0 sm:$0xff]  ;;  %vm3098_vm6 = vweird.f32 %v4380_v33 }
 0x60d   : > { %v2652_v50 = vmul.f32 %v2651_v21, %v6127_v34  ;;  %v3090_v48 = vsel %vm3087_vm1, %v3089_v43, %v3085_v40  ;;  %v3396_v53 = vadd.f32 %v6200_v2, %v6033_v30  ;;  %vm3099_vm7 = vmor %vm3097_vm3, %vm3098_vm6  ;;  %v3104_v21 = vor.u32 1.1754944e-38, %v3103_v24 }
 0x60e   : > { %v2642_v63 = vsel %vm2641_vm13, %v6118_v19, %v2640_v28  ;;  %v3091_v47 = vmul.f32 %v3090_v48, %v5858_v59  ;;  %v3094_v13 = vsub.f32 1.0, %v3093_v62  ;;  %v3101_v19 = vand.u32 2147483647, %v6166_v54 }
 0x60f   : > { %v2654_v49 = vsel %vm2653_vm15, %v6127_v34, %v2652_v50  ;;  %v2645_v55 = vsel %vm2643_vm5, %v2644_v56, %v2642_v63  ;;  %v3495_v30 = vmul.f32 %v6214_v42, %v3396_v53  ;;  %v6223_v50 = vld [vmem:[%s6594_s8] ss:$0 sm:$0xff]  ;;  %v3118_v54 = vand.u32 2147483648, %v6186_v52 }
 0x610   : > { %v2657_v29 = vsel %vm2655_vm4, %v2656_v41, %v2654_v49  ;;  %v3263_v36 = vmax.f32 %v3091_v47, 0.0  ;;  %v2754_v17 = vadd.f32 1e-06, %v2645_v55  ;;  %v3095_v44 = vmul.f32 %v4380_v33, %v3094_v13 }
 0x611   : > { %v6203_v31 = vadd.f32 1e-06, %v2657_v29  ;;  %v4382_v59 = vpop.eup %4381  ;;  %vm3102_vm8 = vcmp.eq.f32.partialorder %v3101_v19, 8.507059e+37  ;;  %v3116_v48 = vand.u32 2147483647, %v6186_v52  ;;  %v3119_v29 = vor.u32 1.1754944e-38, %v3118_v54 }
 0x612   : > { %v6206_v34 = vpop.f32.mrf.mxu3  ;;  %4071 = vmatmul.msk.f32.gmra.mxu3 %vm766_vm2, %v3263_v36  ;;  %4383 = vrcp.f32 %v2754_v17  ;;  %v3096_v22 = vadd.f32 %v4380_v33, %v3095_v44  ;;  %v3108_v28 = vmul.f32 %v4382_v59, %v6186_v52  ;;  %vm3113_vm9 = vweird.f32 %v4382_v59 }
 0x613   : > { %4385 = vrcp.f32 %v6203_v31  ;;  %vm3114_vm11 = vmor %vm3112_vm10, %vm3113_vm9  ;;  %v3531_v36 = vadd.f32 %v6223_v50, %v3495_v30  ;;  %vm3117_vm12 = vcmp.eq.f32.partialorder %v3116_v48, 8.507059e+37  ;;  %v3133_v19 = vand.u32 2147483648, %v2754_v17 }
 0x614   : > { %v3100_v0 = vsel %vm3099_vm7, %v4380_v33, %v3096_v22  ;;  %v3109_v43 = vsub.f32 1.0, %v3108_v28  ;;  %v3131_v52 = vand.u32 2147483647, %v2754_v17  ;;  %vm3127_vm14 = vweird.f32 %v2754_v17 }
 0x615   : > { %v3105_v56 = vsel %vm3102_vm8, %v3104_v21, %v3100_v0  ;;  %vm3142_vm4 = vweird.f32 %v6203_v31 }
 0x616   : > { %v3106_v63 = vmul.f32 %v3105_v56, %v5893_v32  ;;  %v3110_v41 = vmul.f32 %v4382_v59, %v3109_v43  ;;  %v3399_v32 = vadd.f32 %v6200_v2, %v6037_v37  ;;  %v3134_v43 = vor.u32 1.1754944e-38, %v3133_v19 }
 0x617   : > { %vm3132_vm0 = vcmp.eq.f32.partialorder %v3131_v52, 8.507059e+37 }
 0x618   : > { %v4384_v40 = vpop.eup %4383  ;;  %v3264_v62 = vmax.f32 %v3106_v63, 0.0  ;;  %v3111_v13 = vadd.f32 %v4382_v59, %v3110_v41  ;;  %v3496_v30 = vmul.f32 %v6214_v42, %v3399_v32 }
 0x619   : > { %v4386_v33 = vpop.eup %4385  ;;  %v3123_v49 = vmul.f32 %v4384_v40, %v2754_v17  ;;  %vm3128_vm13 = vweird.f32 %v4384_v40 }
 0x61a   : > { %v6228_v47 = vpop.f32.mrf.mxu3  ;;  %v3138_v55 = vmul.f32 %v4386_v33, %v6203_v31  ;;  %4072 = vmatmul.msk.f32.gmra.mxu3 %vm766_vm2, %v3264_v62  ;;  %v3115_v44 = vsel %vm3114_vm11, %v4382_v59, %v3111_v13  ;;  %vm3129_vm15 = vmor %vm3127_vm14, %vm3128_vm13  ;;  %vm3143_vm1 = vweird.f32 %v4386_v33  ;;  %v3532_v17 = vadd.f32 %v6223_v50, %v3496_v30 }
 0x61b   : > { %v3124_v24 = vsub.f32 1.0, %v3123_v49  ;;  %v3120_v22 = vsel %vm3117_vm12, %v3119_v29, %v3115_v44  ;;  %v3402_v62 = vadd.f32 %v6200_v2, %v6043_v14  ;;  %vm3144_vm5 = vmor %vm3142_vm4, %vm3143_vm1  ;;  %v3405_v14 = vadd.f32 %v6200_v2, %v6050_v26 }
 0x61c   : > { %v3139_v53 = vsub.f32 1.0, %v3138_v55  ;;  %v3121_v28 = vmul.f32 %v3120_v22, %v5928_v1  ;;  %v3148_v1 = vand.u32 2147483648, %v6203_v31  ;;  %v3408_v26 = vadd.f32 %v6200_v2, %v6055_v58 }
 0x61d   : > { %v3125_v21 = vmul.f32 %v4384_v40, %v3124_v24  ;;  %v3411_v58 = vadd.f32 %v6200_v2, %v6057_v15  ;;  %v3414_v15 = vadd.f32 %v6200_v2, %v6059_v18 }
 0x61e   : > { %v3140_v37 = vmul.f32 %v4386_v33, %v3139_v53  ;;  %v3265_v56 = vmax.f32 %v3121_v28, 0.0  ;;  %v3149_v55 = vor.u32 1.1754944e-38, %v3148_v1  ;;  %v3499_v28 = vmul.f32 %v6214_v42, %v3408_v26 }
 0x61f   : > { %v3126_v0 = vadd.f32 %v4384_v40, %v3125_v21  ;;  %v3501_v1 = vmul.f32 %v6214_v42, %v3414_v15 }
 0x620   : > { %v3141_v48 = vadd.f32 %v4386_v33, %v3140_v37 }
 0x621   : > { %3595 = vxpose.xlu0.b32.start [1/16] (narrow) %v3531_v36, 8  ;;  %v3130_v63 = vsel %vm3129_vm15, %v4384_v40, %v3126_v0  ;;  %v3146_v40 = vand.u32 2147483647, %v6203_v31  ;;  %v3563_v31 = vadd.f32 %v3531_v36, %v4773_v3 }
 0x622   : > { %v6238_v59 = vpop.f32.mrf.mxu3  ;;  %v3135_v54 = vsel %vm3132_vm0, %v3134_v43, %v3130_v63  ;;  %4073 = vmatmul.msk.f32.gmra.mxu3 %vm766_vm2, %v3265_v56  ;;  %v3145_v13 = vsel %vm3144_vm5, %v4386_v33, %v3141_v48  ;;  %v3498_v33 = vmul.f32 %v6214_v42, %v3405_v14  ;;  %v3535_v56 = vadd.f32 %v6223_v50, %v3499_v28 }
 0x623   : > { %v3136_v41 = vmul.f32 %v3135_v54, %v5967_v16  ;;  %v3497_v16 = vmul.f32 %v6214_v42, %v3402_v62  ;;  %vm3147_vm6 = vcmp.eq.f32.partialorder %v3146_v40, 8.507059e+37  ;;  %v3500_v63 = vmul.f32 %v6214_v42, %v3411_v58 }
 0x624   : > { %v3150_v29 = vsel %vm3147_vm6, %v3149_v55, %v3145_v13  ;;  %v3534_v52 = vadd.f32 %v6223_v50, %v3498_v33  ;;  %v3417_v62 = vadd.f32 %v6200_v2, %v6061_v39  ;;  %v3567_v40 = vadd.f32 %v3535_v56, %v4789_v7 }
 0x625   : > { %v3266_v49 = vmax.f32 %v3136_v41, 0.0  ;;  %v3533_v24 = vadd.f32 %v6223_v50, %v3497_v16  ;;  %v3151_v44 = vmul.f32 %v3150_v29, %v5975_v27  ;;  %v3564_v27 = vadd.f32 %v3532_v17, %v4777_v4 }
 0x626   : > { %v3536_v41 = vadd.f32 %v6223_v50, %v3500_v63  ;;  %v3420_v55 = vadd.f32 %v6200_v2, %v6071_v46 }
 0x627   : > { %v3267_v53 = vmax.f32 %v3151_v44, 0.0  ;;  %v3565_v4 = vadd.f32 %v3533_v24, %v4781_v5  ;;  %v3566_v5 = vadd.f32 %v3534_v52, %v4785_v6  ;;  %v3502_v6 = vmul.f32 %v6214_v42, %v3417_v62 }
 0x628   : > { %v3568_v16 = vadd.f32 %v3536_v41, %v4793_v8  ;;  %v3503_v7 = vmul.f32 %v6214_v42, %v3420_v55  ;;  %v3423_v44 = vadd.f32 %v6200_v2, %v6084_v60 }
 0x629   : > { %3596 = vxpose.xlu0.b32.cont [2/16] (narrow) %v3532_v17, 8  ;;  %v3537_v17 = vadd.f32 %v6223_v50, %v3501_v1  ;;  %v3538_v13 = vadd.f32 %v6223_v50, %v3502_v6 }
 0x62a   : > { %v3443_v32 = vpop.f32.mrf.mxu3  ;;  %4074 = vmatmul.msk.f32.gmra.mxu3 %vm766_vm2, %v3266_v49  ;;  %v3539_v14 = vadd.f32 %v6223_v50, %v3503_v7  ;;  %v3504_v8 = vmul.f32 %v6214_v42, %v3423_v44 }
 0x62b   : > { %v3444_v19 = vadd.f32 %v6200_v2, %v3443_v32  ;;  %v3569_v46 = vadd.f32 %v3537_v17, %v4797_v9  ;;  %v3570_v9 = vadd.f32 %v3538_v13, %v4801_v10 }
 0x62c   : > { %v3540_v60 = vadd.f32 %v6223_v50, %v3504_v8 }
 0x62d   : > { %v3511_v21 = vmul.f32 %v6214_v42, %v3444_v19 }
 0x62e   : > { %v3572_v8 = vadd.f32 %v3540_v60, %v4809_v12 }
 0x62f   : > { %v6265_v36 = vadd.f32 %v6223_v50, %v3511_v21  ;;  %v3426_v21 = vadd.f32 %v6200_v2, %v6107_v45  ;;  %v3429_v45 = vadd.f32 %v6200_v2, %v6142_v51 }
 0x631   : > { %3597 = vxpose.xlu0.b32.cont [3/16] (narrow) %v3533_v24, 8  ;;  %3661 = vxpose.xlu2.b32.start [1/16] (narrow) %v3563_v31, 8  ;;  %v3505_v28 = vmul.f32 %v6214_v42, %v3426_v21  ;;  %v3506_v51 = vmul.f32 %v6214_v42, %v3429_v45 }
 0x632   : > { %v3446_v22 = vpop.f32.mrf.mxu3  ;;  %4075 = vmatmul.msk.f32.gmra.mxu3 %vm766_vm2, %v3267_v53 }
 0x633   : > { %v3447_v3 = vadd.f32 %v6200_v2, %v3446_v22  ;;  %v3541_v63 = vadd.f32 %v6223_v50, %v3505_v28  ;;  %v6673_v28 = vld [vmem:[#allocation23_spill] sm:$0xff] }
 0x635   : > { %v3512_v0 = vmul.f32 %v6214_v42, %v3447_v3 }
 0x637   : > { %v6276_v30 = vadd.f32 %v6223_v50, %v3512_v0 }
 0x639   : > { %3598 = vxpose.xlu0.b32.cont [4/16] (narrow) %v3534_v52, 8  ;;  %3662 = vxpose.xlu2.b32.cont [2/16] (narrow) %v3564_v27, 8 }
 0x63a   : > { %v3449_v37 = vpop.f32.mrf.mxu3 }
 0x63b   : > { %3627 = vxpose.xlu1.b32.start [1/16] (narrow) %v6265_v36, 8  ;;  %v3450_v43 = vadd.f32 %v6200_v2, %v3449_v37 }
 0x63d   : > { %v3513_v54 = vmul.f32 %v6214_v42, %v3450_v43 }
 0x63f   : > { %v6286_v48 = vadd.f32 %v6223_v50, %v3513_v54  ;;  %v3432_v54 = vadd.f32 %v6200_v2, %v6178_v20  ;;  %v3435_v20 = vadd.f32 %v6200_v2, %v6206_v34 }
 0x641   : > { %3599 = vxpose.xlu0.b32.cont [5/16] (narrow) %v3535_v56, 8  ;;  %3663 = vxpose.xlu2.b32.cont [3/16] (narrow) %v3565_v4, 8  ;;  %v3508_v34 = vmul.f32 %v6214_v42, %v3435_v20 }
 0x643   : > { %3628 = vxpose.xlu1.b32.cont [2/16] (narrow) %v6276_v30, 8  ;;  %v6355_v21 = vadd.f32 %v6223_v50, %v3508_v34 }
 0x649   : > { %3600 = vxpose.xlu0.b32.cont [6/16] (narrow) %v3536_v41, 8  ;;  %3664 = vxpose.xlu2.b32.cont [4/16] (narrow) %v3566_v5, 8 }
 0x64b   : > { %3629 = vxpose.xlu1.b32.cont [3/16] (narrow) %v6286_v48, 8 }
 0x651   : > { %3601 = vxpose.xlu0.b32.cont [7/16] (narrow) %v3537_v17, 8  ;;  %3665 = vxpose.xlu2.b32.cont [5/16] (narrow) %v3567_v40, 8  ;;  %v3571_v17 = vadd.f32 %v3539_v14, %v4805_v11 }
 0x653   : > { %v2298_v18 = vpop.xlane.xlu0 %2297 }
 0x654   : > { %v6295_v49 = vmul.f32 0.33333334, %v2298_v18 }
 0x656   : > { %4387 = vrsqrt.f32 %v6295_v49  ;;  %vm2665_vm3 = vcmp.eq.f32.partialorder %v6295_v49, inf  ;;  %v2668_v5 = vand.u32 2147483648, %v6295_v49  ;;  %vm2667_vm7 = vcmp.eq.f32.partialorder %v6295_v49, 0.0 }
 0x659   : > { %3602 = vxpose.xlu0.b32.cont [8/16] (narrow) %v3538_v13, 8  ;;  %3666 = vxpose.xlu2.b32.cont [6/16] (narrow) %v3568_v16, 8  ;;  %v3507_v13 = vmul.f32 %v6214_v42, %v3432_v54 }
 0x65b   : > { %v2301_v39 = vpop.xlane.xlu1 %2300  ;;  %v3543_v44 = vadd.f32 %v6223_v50, %v3507_v13 }
 0x65c   : > { %v4388_v32 = vpop.eup %4387  ;;  %v2341_v29 = vmul.f32 0.33333334, %v2301_v39  ;;  %v3542_v39 = vadd.f32 %v6223_v50, %v3506_v51 }
 0x65d   : > { %v2659_v24 = vmul.f32 %v4388_v32, %v6295_v49 }
 0x65e   : > { %4389 = vrsqrt.f32 %v2341_v29  ;;  %vm2677_vm8 = vcmp.eq.f32.partialorder %v2341_v29, inf  ;;  %v2680_v62 = vand.u32 2147483648, %v2341_v29  ;;  %vm2679_vm9 = vcmp.eq.f32.partialorder %v2341_v29, 0.0 }
 0x65f   : > { %v2660_v31 = vmul.f32 %v4388_v32, %v2659_v24 }
 0x661   : > { %v2661_v19 = vmul.f32 0.5, %v2660_v31  ;;  %3603 = vxpose.xlu0.b32.cont [9/16] (narrow) %v3539_v14, 8  ;;  %3667 = vxpose.xlu2.b32.cont [7/16] (narrow) %v3569_v46, 8  ;;  %v3438_v31 = vadd.f32 %v6200_v2, %v6228_v47 }
 0x663   : > { %v2662_v33 = vsub.f32 1.5, %v2661_v19  ;;  %v2304_v22 = vpop.xlane.xlu2 %2303 }
 0x664   : > { %v4390_v53 = vpop.eup %4389  ;;  %v6311_v26 = vmul.f32 0.33333334, %v2304_v22 }
 0x665   : > { %v2671_v52 = vmul.f32 %v4390_v53, %v2341_v29  ;;  %v2663_v27 = vmul.f32 %v4388_v32, %v2662_v33 }
 0x666   : > { %4391 = vrsqrt.f32 %v6311_v26  ;;  %vm2689_vm10 = vcmp.eq.f32.partialorder %v6311_v26, inf  ;;  %vm2691_vm11 = vcmp.eq.f32.partialorder %v6311_v26, 0.0 }
 0x667   : > { %v2672_v3 = vmul.f32 %v4390_v53, %v2671_v52  ;;  %v2664_v37 = vmul.f32 %v2663_v27, %v6295_v49  ;;  %v6672_v27 = vld [vmem:[#allocation22_spill] sm:$0xff] }
 0x668   : > { %v6359_v47 = vadd.f32 %v3542_v39, %v6672_v27 }
 0x669   : > { %v2673_v0 = vmul.f32 0.5, %v2672_v3  ;;  %3604 = vxpose.xlu0.b32.cont [10/16] (narrow) %v3540_v60, 8  ;;  %3668 = vxpose.xlu2.b32.cont [8/16] (narrow) %v3570_v9, 8  ;;  %v2666_v41 = vsel %vm2665_vm3, %v6295_v49, %v2664_v37  ;;  %v3509_v9 = vmul.f32 %v6214_v42, %v3438_v31  ;;  %v2692_v60 = vand.u32 2147483648, %v6311_v26 }
 0x66a   : > { %v2669_v18 = vsel %vm2667_vm7, %v2668_v5, %v2666_v41 }
 0x66b   : > { %v2674_v56 = vsub.f32 1.5, %v2673_v0  ;;  %v2307_v58 = vpop.xlane.xlu0 %2306  ;;  %v6336_v16 = vadd.f32 1e-06, %v2669_v18  ;;  %v6365_v0 = vadd.f32 %v3543_v44, %v6673_v28 }
 0x66c   : > { %v6320_v4 = vmul.f32 0.33333334, %v2307_v58  ;;  %v4392_v43 = vpop.eup %4391 }
 0x66d   : > { %v2675_v10 = vmul.f32 %v4390_v53, %v2674_v56  ;;  %v2683_v15 = vmul.f32 %v4392_v43, %v6311_v26  ;;  %v6671_v53 = vld [vmem:[#allocation21_spill] sm:$0xff]  ;;  %vm3157_vm13 = vweird.f32 %v6336_v16 }
 0x66e   : > { %4393 = vrsqrt.f32 %v6320_v4  ;;  %v3573_v22 = vadd.f32 %v3541_v63, %v6671_v53  ;;  %vm2701_vm12 = vcmp.eq.f32.partialorder %v6320_v4, inf  ;;  %vm2703_vm0 = vcmp.eq.f32.partialorder %v6320_v4, 0.0 }
 0x66f   : > { %v2676_v1 = vmul.f32 %v2675_v10, %v2341_v29  ;;  %v2684_v40 = vmul.f32 %v4392_v43, %v2683_v15  ;;  %4395 = vrcp.f32 %v6336_v16 }
 0x671   : > { %v2678_v6 = vsel %vm2677_vm8, %v2341_v29, %v2676_v1  ;;  %3605 = vxpose.xlu0.b32.cont [11/16] (narrow) %v3541_v63, 8  ;;  %3669 = vxpose.xlu2.b32.cont [9/16] (narrow) %v3571_v17, 8  ;;  %v2685_v55 = vmul.f32 0.5, %v2684_v40  ;;  %v3161_v1 = vand.u32 2147483647, %v6336_v16  ;;  %v3163_v17 = vand.u32 2147483648, %v6336_v16 }
 0x672   : > { %v2681_v7 = vsel %vm2679_vm9, %v2680_v62, %v2678_v6 }
 0x673   : > { %v6338_v11 = vadd.f32 1e-06, %v2681_v7  ;;  %v2686_v32 = vsub.f32 1.5, %v2685_v55  ;;  %vm3162_vm4 = vcmp.eq.f32.partialorder %v3161_v1, 8.507059e+37 }
 0x674   : > { %v4394_v49 = vpop.eup %4393  ;;  %v2310_v24 = vpop.xlane.xlu1 %2309 }
 0x675   : > { %v2695_v29 = vmul.f32 %v4394_v49, %v6320_v4  ;;  %v6344_v14 = vmul.f32 0.33333334, %v2310_v24  ;;  %4397 = vrcp.f32 %v6338_v11  ;;  %v2687_v46 = vmul.f32 %v4392_v43, %v2686_v32  ;;  %v4396_v3 = vpop.eup %4395 }
 0x676   : > { %v3153_v58 = vmul.f32 %v4396_v3, %v6336_v16  ;;  %v2704_v43 = vand.u32 2147483648, %v6320_v4  ;;  %vm3158_vm14 = vweird.f32 %v4396_v3  ;;  %v3176_v18 = vand.u32 2147483647, %v6338_v11 }
 0x677   : > { %v2696_v19 = vmul.f32 %v4394_v49, %v2695_v29  ;;  %4399 = vrsqrt.f32 %v6344_v14  ;;  %v2688_v33 = vmul.f32 %v2687_v46, %v6311_v26  ;;  %v3178_v13 = vand.u32 2147483648, %v6338_v11  ;;  %vm3159_vm1 = vmor %vm3157_vm13, %vm3158_vm14 }
 0x678   : > { %v3154_v51 = vsub.f32 1.0, %v3153_v58  ;;  %v3164_v32 = vor.u32 1.1754944e-38, %v3163_v17  ;;  %vm3172_vm5 = vweird.f32 %v6338_v11  ;;  %vm3177_vm3 = vcmp.eq.f32.partialorder %v3176_v18, 8.507059e+37 }
 0x679   : > { %v2697_v52 = vmul.f32 0.5, %v2696_v19  ;;  %3606 = vxpose.xlu0.b32.cont [12/16] (narrow) %v3542_v39, 8  ;;  %3670 = vxpose.xlu2.b32.cont [10/16] (narrow) %v3572_v8, 8  ;;  %v2690_v12 = vsel %vm2689_vm10, %v6311_v26, %v2688_v33  ;;  %v3179_v19 = vor.u32 1.1754944e-38, %v3178_v13  ;;  %vm2713_vm7 = vcmp.eq.f32.partialorder %v6344_v14, inf }
 0x67a   : > { %v2693_v54 = vsel %vm2691_vm11, %v2692_v60, %v2690_v12  ;;  %v3155_v40 = vmul.f32 %v4396_v3, %v3154_v51  ;;  %vm2715_vm8 = vcmp.eq.f32.partialorder %v6344_v14, 0.0 }
 0x67b   : > { %v4398_v37 = vpop.eup %4397  ;;  %v2698_v45 = vsub.f32 1.5, %v2697_v52  ;;  %v2313_v56 = vpop.xlane.xlu2 %2312  ;;  %v6375_v5 = vadd.f32 1e-06, %v2693_v54 }
 0x67c   : > { %v6371_v63 = vmul.f32 0.33333334, %v2313_v56  ;;  %v3168_v10 = vmul.f32 %v4398_v37, %v6338_v11  ;;  %v3156_v7 = vadd.f32 %v4396_v3, %v3155_v40  ;;  %vm3173_vm15 = vweird.f32 %v4398_v37 }
 0x67d   : > { %v4400_v41 = vpop.eup %4399  ;;  %v2699_v15 = vmul.f32 %v4394_v49, %v2698_v45  ;;  %vm3174_vm6 = vmor %vm3172_vm5, %vm3173_vm15  ;;  %v3191_v54 = vand.u32 2147483647, %v6375_v5  ;;  %vm3187_vm11 = vweird.f32 %v6375_v5 }
 0x67e   : > { %v2707_v26 = vmul.f32 %v4400_v41, %v6344_v14  ;;  %4401 = vrsqrt.f32 %v6371_v63  ;;  %v3169_v20 = vsub.f32 1.0, %v3168_v10  ;;  %v3160_v24 = vsel %vm3159_vm1, %v4396_v3, %v3156_v7 }
 0x67f   : > { %v2700_v62 = vmul.f32 %v2699_v15, %v6320_v4  ;;  %4403 = vrcp.f32 %v6375_v5  ;;  %v6399_v3 = vadd.f32 %v6223_v50, %v3509_v9  ;;  %vm2725_vm10 = vcmp.eq.f32.partialorder %v6371_v63, inf }
 0x680   : > { %v2708_v6 = vmul.f32 %v4400_v41, %v2707_v26  ;;  %v3170_v49 = vmul.f32 %v4398_v37, %v3169_v20  ;;  %vm3192_vm13 = vcmp.eq.f32.partialorder %v3191_v54, 8.507059e+37  ;;  %vm2727_vm15 = vcmp.eq.f32.partialorder %v6371_v63, 0.0 }
 0x681   : > { %v2702_v55 = vsel %vm2701_vm12, %v6320_v4, %v2700_v62  ;;  %3607 = vxpose.xlu0.b32.cont [13/16] (narrow) %v3543_v44, 8  ;;  %3671 = vxpose.xlu2.b32.cont [11/16] (narrow) %v3573_v22, 8  ;;  %v3165_v44 = vsel %vm3162_vm4, %v3164_v32, %v3160_v24 }
 0x682   : > { %v2709_v39 = vmul.f32 0.5, %v2708_v6  ;;  %v3171_v34 = vadd.f32 %v4398_v37, %v3170_v49  ;;  %v2705_v29 = vsel %vm2703_vm0, %v2704_v43, %v2702_v55  ;;  %v3452_v33 = vpop.f32.mrf.mxu3  ;;  %v3166_v16 = vmul.f32 %v3165_v44, %v6064_v38 }
 0x683   : > { %v6392_v8 = vadd.f32 1e-06, %v2705_v29  ;;  %v3453_v27 = vadd.f32 %v6200_v2, %v3452_v33 }
 0x684   : > { %v4402_v31 = vpop.eup %4401  ;;  %v2710_v46 = vsub.f32 1.5, %v2709_v39  ;;  %v3175_v53 = vsel %vm3174_vm6, %v4398_v37, %v3171_v34  ;;  %v3268_v60 = vmax.f32 %v3166_v16, 0.0  ;;  %v2716_v37 = vand.u32 2147483648, %v6344_v14 }
 0x685   : > { %v2719_v4 = vmul.f32 %v4402_v31, %v6371_v63  ;;  %v4404_v22 = vpop.eup %4403  ;;  %v3180_v11 = vsel %vm3177_vm3, %v3179_v19, %v3175_v53  ;;  %4405 = vrcp.f32 %v6392_v8  ;;  %v3514_v38 = vmul.f32 %v6214_v42, %v3453_v27 }
 0x686   : > { %v2711_v52 = vmul.f32 %v4400_v41, %v2710_v46  ;;  %v3183_v28 = vmul.f32 %v4404_v22, %v6375_v5  ;;  %4076 = vmatmul.msk.f32.gmra.mxu3 %vm766_vm2, %v3268_v60  ;;  %v3181_v9 = vmul.f32 %v3180_v11, %v6075_v57  ;;  %v3193_v41 = vand.u32 2147483648, %v6375_v5  ;;  %v6674_v11 = vld [vmem:[#allocation24_spill] sm:$0xff] }
 0x687   : > { %v2720_v12 = vmul.f32 %v4402_v31, %v2719_v4  ;;  %v6413_v10 = vadd.f32 %v6223_v50, %v3514_v38  ;;  %vm3188_vm9 = vweird.f32 %v4404_v22  ;;  %v3441_v57 = vadd.f32 %v6200_v2, %v6238_v59 }
 0x688   : > { %v2712_v45 = vmul.f32 %v2711_v52, %v6344_v14  ;;  %v3184_v58 = vsub.f32 1.0, %v3183_v28  ;;  %v3269_v40 = vmax.f32 %v3181_v9, 0.0  ;;  %vm3189_vm12 = vmor %vm3187_vm11, %vm3188_vm9  ;;  %v3194_v59 = vor.u32 1.1754944e-38, %v3193_v41 }
 0x689   : > { %v2721_v56 = vmul.f32 0.5, %v2720_v12  ;;  %3608 = vxpose.xlu0.b32.cont [14/16] (narrow) %v6355_v21, 8  ;;  %3672 = vxpose.xlu2.b32.cont [12/16] (narrow) %v6359_v47, 8  ;;  %v3206_v39 = vand.u32 2147483647, %v6392_v8  ;;  %v3208_v32 = vand.u32 2147483648, %v6392_v8  ;;  %v3510_v46 = vmul.f32 %v6214_v42, %v3441_v57 }
 0x68a   : > { %v2714_v43 = vsel %vm2713_vm7, %v6344_v14, %v2712_v45  ;;  %v3185_v51 = vmul.f32 %v4404_v22, %v3184_v58  ;;  %3630 = vxpose.xlu1.b32.cont [4/16] (narrow) %v6413_v10, 8  ;;  %v2728_v14 = vand.u32 2147483648, %v6371_v63  ;;  %vm3202_vm0 = vweird.f32 %v6392_v8  ;;  %v6676_v57 = vld [vmem:[#allocation25_spill] sm:$0xff] }
 0x68b   : > { %v2722_v15 = vsub.f32 1.5, %v2721_v56  ;;  %v2717_v26 = vsel %vm2715_vm8, %v2716_v37, %v2714_v43  ;;  %v4406_v1 = vpop.eup %4405  ;;  %v3455_v62 = vpop.f32.mrf.mxu3  ;;  %vm3207_vm4 = vcmp.eq.f32.partialorder %v3206_v39, 8.507059e+37  ;;  %v3576_v12 = vadd.f32 %v6355_v21, %v6674_v11  ;;  %v6683_v11 = vld [vmem:[#allocation33_spill] sm:$0xff] }
 0x68c   : > { %v6424_v47 = vadd.f32 1e-06, %v2717_v26  ;;  %v3186_v20 = vadd.f32 %v4404_v22, %v3185_v51  ;;  %v3198_v6 = vmul.f32 %v4406_v1, %v6392_v8  ;;  %v3456_v18 = vadd.f32 %v6200_v2, %v3455_v62 }
 0x68d   : > { %v2723_v17 = vmul.f32 %v4402_v31, %v2722_v15  ;;  %vm3203_vm14 = vweird.f32 %v4406_v1  ;;  %v6675_v15 = vld [vmem:[#allocation27_spill] sm:$0xff] }
 0x68e   : > { %4407 = vrcp.f32 %v6424_v47  ;;  %v3190_v5 = vsel %vm3189_vm12, %v4404_v22, %v3186_v20  ;;  %v3199_v55 = vsub.f32 1.0, %v3198_v6  ;;  %v3515_v7 = vmul.f32 %v6214_v42, %v3456_v18  ;;  %4077 = vmatmul.msk.f32.gmra.mxu3 %vm766_vm2, %v3269_v40  ;;  %vm3204_vm1 = vmor %vm3202_vm0, %vm3203_vm14 }
 0x68f   : > { %v2724_v13 = vmul.f32 %v2723_v17, %v6371_v63  ;;  %v3195_v49 = vsel %vm3192_vm13, %v3194_v59, %v3190_v5  ;;  %v3546_v22 = vadd.f32 %v6223_v50, %v3510_v46  ;;  %v3223_v60 = vand.u32 2147483648, %v6424_v47 }
 0x690   : > { %v3196_v34 = vmul.f32 %v3195_v49, %v6087_v35  ;;  %v3200_v29 = vmul.f32 %v4406_v1, %v3199_v55  ;;  %v6444_v31 = vadd.f32 %v6223_v50, %v3515_v7  ;;  %v3209_v35 = vor.u32 1.1754944e-38, %v3208_v32  ;;  %v6677_v55 = vld [vmem:[#allocation28_spill] sm:$0xff]  ;;  %v6678_v49 = vld [vmem:[#allocation26_spill] sm:$0xff] }
 0x691   : > { %v2726_v24 = vsel %vm2725_vm10, %v6371_v63, %v2724_v13  ;;  %3609 = vxpose.xlu0.b32.cont [15/16] (narrow) %v6399_v3, 8  ;;  %3673 = vxpose.xlu2.b32.cont [13/16] (narrow) %v6365_v0, 8  ;;  %v3221_v38 = vand.u32 2147483647, %v6424_v47  ;;  %vm3217_vm6 = vweird.f32 %v6424_v47  ;;  %v3224_v58 = vor.u32 1.1754944e-38, %v3223_v60 }
 0x692   : > { %v3201_v44 = vadd.f32 %v4406_v1, %v3200_v29  ;;  %v2729_v19 = vsel %vm2727_vm15, %v2728_v14, %v2726_v24  ;;  %3631 = vxpose.xlu1.b32.cont [5/16] (narrow) %v6444_v31, 8  ;;  %v3270_v16 = vmax.f32 %v3196_v34, 0.0  ;;  %v3579_v51 = vadd.f32 %v6265_v36, %v6675_v15 }
 0x693   : > { %v2761_v33 = vadd.f32 1e-06, %v2729_v19  ;;  %vm3222_vm7 = vcmp.eq.f32.partialorder %v3221_v38, 8.507059e+37  ;;  %v3577_v17 = vadd.f32 %v6399_v3, %v6676_v57  ;;  %v3580_v7 = vadd.f32 %v6276_v30, %v6677_v55  ;;  %v6686_v38 = vld [vmem:[#allocation36_spill] sm:$0xff] }
 0x694   : > { %v4408_v4 = vpop.eup %4407  ;;  %v3205_v53 = vsel %vm3204_vm1, %v4406_v1, %v3201_v44  ;;  %v3578_v39 = vadd.f32 %v3546_v22, %v6678_v49  ;;  %v6679_v44 = vld [vmem:[#allocation29_spill] sm:$0xff] }
 0x695   : > { %v3213_v0 = vmul.f32 %v4408_v4, %v6424_v47  ;;  %v3210_v63 = vsel %vm3207_vm4, %v3209_v35, %v3205_v53  ;;  %4409 = vrcp.f32 %v2761_v33  ;;  %v3458_v52 = vpop.f32.mrf.mxu3  ;;  %vm3218_vm5 = vweird.f32 %v4408_v4  ;;  %v6691_v49 = vld [vmem:[#allocation41_spill] sm:$0xff] }
 0x696   : > { %v3459_v8 = vadd.f32 %v6200_v2, %v3458_v52  ;;  %4078 = vmatmul.msk.f32.gmra.mxu3 %vm766_vm2, %v3270_v16  ;;  %v3211_v28 = vmul.f32 %v3210_v63, %v6101_v23  ;;  %vm3219_vm3 = vmor %vm3217_vm6, %vm3218_vm5  ;;  %v3236_v47 = vand.u32 2147483647, %v2761_v33  ;;  %v3238_v62 = vand.u32 2147483648, %v2761_v33 }
 0x697   : > { %v3214_v27 = vsub.f32 1.0, %v3213_v0  ;;  %vm3232_vm9 = vweird.f32 %v2761_v33  ;;  %v3581_v30 = vadd.f32 %v6286_v48, %v6679_v44 }
 0x698   : > { %v3516_v37 = vmul.f32 %v6214_v42, %v3459_v8  ;;  %v3271_v43 = vmax.f32 %v3211_v28, 0.0  ;;  %v3239_v18 = vor.u32 1.1754944e-38, %v3238_v62  ;;  %vm3237_vm11 = vcmp.eq.f32.partialorder %v3236_v47, 8.507059e+37  ;;  %v6685_v28 = vld [vmem:[#allocation35_spill] sm:$0xff] }
 0x699   : > { %3610 = vxpose.xlu0.b32.end [16/16] (narrow) %v3546_v22, 8  ;;  %v3215_v45 = vmul.f32 %v4408_v4, %v3214_v27  ;;  %3674 = vxpose.xlu2.b32.cont [14/16] (narrow) %v3576_v12, 8  ;;  %v6681_v22 = vld [vmem:[#allocation31_spill] sm:$0xff]  ;;  %v6682_v27 = vld [vmem:[#allocation32_spill] sm:$0xff] }
 0x69a   : > { %v3552_v21 = vadd.f32 %v6223_v50, %v3516_v37  ;;  %v3583_v52 = vadd.f32 %v6444_v31, %v6681_v22 }
 0x69b   : > { %v3216_v56 = vadd.f32 %v4408_v4, %v3215_v45  ;;  %v4410_v9 = vpop.eup %4409 }
 0x69c   : > { %v3228_v41 = vmul.f32 %v4410_v9, %v2761_v33  ;;  %3632 = vxpose.xlu1.b32.cont [6/16] (narrow) %v3552_v21, 8  ;;  %vm3233_vm8 = vweird.f32 %v4410_v9  ;;  %v6680_v33 = vld [vmem:[#allocation30_spill] sm:$0xff]  ;;  %v3584_v8 = vadd.f32 %v3552_v21, %v6682_v27 }
 0x69d   : > { %v3220_v54 = vsel %vm3219_vm3, %v4408_v4, %v3216_v56  ;;  %v3461_v1 = vpop.f32.mrf.mxu3  ;;  %vm3234_vm10 = vmor %vm3232_vm9, %vm3233_vm8  ;;  %v3582_v16 = vadd.f32 %v6413_v10, %v6680_v33  ;;  %v6684_v10 = vld [vmem:[#allocation34_spill] sm:$0xff] }
 0x69e   : > { %v3225_v23 = vsel %vm3222_vm7, %v3224_v58, %v3220_v54  ;;  %v3229_v26 = vsub.f32 1.0, %v3228_v41  ;;  %v3462_v40 = vadd.f32 %v6200_v2, %v3461_v1  ;;  %4079 = vmatmul.msk.f32.gmra.mxu3 %vm766_vm2, %v3271_v43  ;;  %v6687_v58 = vld [vmem:[#allocation37_spill] sm:$0xff] }
 0x69f   : > { %v3226_v20 = vmul.f32 %v3225_v23, %v6131_v25 }
 0x6a0   : > { %v3230_v6 = vmul.f32 %v4410_v9, %v3229_v26  ;;  %v3517_v14 = vmul.f32 %v6214_v42, %v3462_v40 }
 0x6a1   : > { %3693 = vxpose.xlu0.b32.start [1/16] (narrow) %v3579_v51, 8  ;;  %3675 = vxpose.xlu2.b32.cont [15/16] (narrow) %v3577_v17, 8  ;;  %v3272_v59 = vmax.f32 %v3226_v20, 0.0  ;;  %v6688_v51 = vld [vmem:[#allocation38_spill] sm:$0xff]  ;;  %v6689_v20 = vld [vmem:[#allocation39_spill] sm:$0xff] }
 0x6a2   : > { %v3231_v36 = vadd.f32 %v4410_v9, %v3230_v6  ;;  %v3553_v3 = vadd.f32 %v6223_v50, %v3517_v14 }
 0x6a4   : > { %v3235_v13 = vsel %vm3234_vm10, %v4410_v9, %v3231_v36  ;;  %3633 = vxpose.xlu1.b32.cont [7/16] (narrow) %v3553_v3, 8  ;;  %v3585_v12 = vadd.f32 %v3553_v3, %v6683_v11 }
 0x6a5   : > { %v3240_v5 = vsel %vm3237_vm11, %v3239_v18, %v3235_v13  ;;  %v3464_v25 = vpop.f32.mrf.mxu3 }
 0x6a6   : > { %v3465_v32 = vadd.f32 %v6200_v2, %v3464_v25  ;;  %4080 = vmatmul.msk.f32.gmra.mxu3 %vm766_vm2, %v3272_v59  ;;  %v3241_v24 = vmul.f32 %v3240_v5, %v6157_v61  ;;  %v6690_v59 = vld [vmem:[#allocation40_spill] sm:$0xff] }
 0x6a8   : > { %v3518_v34 = vmul.f32 %v6214_v42, %v3465_v32  ;;  %v3273_v46 = vmax.f32 %v3241_v24, 0.0 }
 0x6a9   : > { %3694 = vxpose.xlu0.b32.cont [2/16] (narrow) %v3580_v7, 8  ;;  %3676 = vxpose.xlu2.b32.end [16/16] (narrow) %v3578_v39, 8 }
 0x6aa   : > { %v3554_v29 = vadd.f32 %v6223_v50, %v3518_v34 }
 0x6ac   : > { %3634 = vxpose.xlu1.b32.cont [8/16] (narrow) %v3554_v29, 8  ;;  %v3586_v60 = vadd.f32 %v3554_v29, %v6684_v10 }
 0x6ad   : > { %v3467_v19 = vpop.f32.mrf.mxu3 }
 0x6ae   : > { %v3468_v4 = vadd.f32 %v6200_v2, %v3467_v19  ;;  %4081 = vmatmul.msk.f32.gmra.mxu3 %vm766_vm2, %v3273_v46  ;;  %v6692_v46 = vld [vmem:[#allocation42_spill] sm:$0xff] }
 0x6b0   : > { %v3519_v35 = vmul.f32 %v6214_v42, %v3468_v4 }
 0x6b1   : > { %3695 = vxpose.xlu0.b32.cont [3/16] (narrow) %v3581_v30, 8 }
 0x6b2   : > { %v3555_v61 = vadd.f32 %v6223_v50, %v3519_v35 }
 0x6b4   : > { %3635 = vxpose.xlu1.b32.cont [9/16] (narrow) %v3555_v61, 8  ;;  %v3587_v45 = vadd.f32 %v3555_v61, %v6685_v28 }
 0x6b5   : > { %v3470_v53 = vpop.f32.mrf.mxu3 }
 0x6b6   : > { %v3471_v0 = vadd.f32 %v6200_v2, %v3470_v53 }
 0x6b8   : > { %v3520_v48 = vmul.f32 %v6214_v42, %v3471_v0 }
 0x6b9   : > { %3696 = vxpose.xlu0.b32.cont [4/16] (narrow) %v3582_v16, 8 }
 0x6ba   : > { %v3556_v63 = vadd.f32 %v6223_v50, %v3520_v48 }
 0x6bc   : > { %3636 = vxpose.xlu1.b32.cont [10/16] (narrow) %v3556_v63, 8  ;;  %v3588_v37 = vadd.f32 %v3556_v63, %v6686_v38 }
 0x6c1   : > { %3697 = vxpose.xlu0.b32.cont [5/16] (narrow) %v3583_v52, 8 }
 0x6c5   : > { %v3611_v17 = vpop.trf.xlu0 }
 0x6c6   : > { %3659 = vst [vmem:[%s6506_s22] sm:$0xff] %v3611_v17 }
 0x6c9   : > { %3698 = vxpose.xlu0.b32.cont [6/16] (narrow) %v3584_v8, 8 }
 0x6ca   : > { %v3677_v47 = vpop.trf.xlu2 }
 0x6cb   : > { %3725 = vst [vmem:[%s6511_s26] sm:$0xff] %v3677_v47 }
 0x6d1   : > { %3699 = vxpose.xlu0.b32.cont [7/16] (narrow) %v3585_v12, 8 }
 0x6d9   : > { %3700 = vxpose.xlu0.b32.cont [8/16] (narrow) %v3586_v60, 8 }
 0x6e1   : > { %3701 = vxpose.xlu0.b32.cont [9/16] (narrow) %v3587_v45, 8 }
 0x6e9   : > { %3702 = vxpose.xlu0.b32.cont [10/16] (narrow) %v3588_v37, 8 }
 0x709   : > { %v3473_v56 = vpop.f32.mrf.mxu3 }
 0x70a   : > { %v3474_v9 = vadd.f32 %v6200_v2, %v3473_v56 }
 0x70c   : > { %v3521_v31 = vmul.f32 %v6214_v42, %v3474_v9 }
 0x70e   : > { %v3557_v21 = vadd.f32 %v6223_v50, %v3521_v31 }
 0x710   : > { %3637 = vxpose.xlu1.b32.cont [11/16] (narrow) %v3557_v21, 8  ;;  %v3589_v43 = vadd.f32 %v3557_v21, %v6687_v58 }
 0x711   : > { %v3476_v54 = vpop.f32.mrf.mxu3 }
 0x712   : > { %v3477_v41 = vadd.f32 %v6200_v2, %v3476_v54  ;;  %3703 = vxpose.xlu0.b32.cont [11/16] (narrow) %v3589_v43, 8 }
 0x714   : > { %v3522_v23 = vmul.f32 %v6214_v42, %v3477_v41 }
 0x716   : > { %v3558_v15 = vadd.f32 %v6223_v50, %v3522_v23 }
 0x718   : > { %3638 = vxpose.xlu1.b32.cont [12/16] (narrow) %v3558_v15, 8  ;;  %v3590_v26 = vadd.f32 %v3558_v15, %v6688_v51 }
 0x719   : > { %v3479_v1 = vpop.f32.mrf.mxu3 }
 0x71a   : > { %v3480_v57 = vadd.f32 %v6200_v2, %v3479_v1  ;;  %3704 = vxpose.xlu0.b32.cont [12/16] (narrow) %v3590_v26, 8 }
 0x71c   : > { %v3523_v62 = vmul.f32 %v6214_v42, %v3480_v57 }
 0x71e   : > { %v3559_v40 = vadd.f32 %v6223_v50, %v3523_v62 }
 0x720   : > { %3639 = vxpose.xlu1.b32.cont [13/16] (narrow) %v3559_v40, 8  ;;  %v3591_v6 = vadd.f32 %v3559_v40, %v6689_v20 }
 0x721   : > { %v3482_v14 = vpop.f32.mrf.mxu3 }
 0x722   : > { %v3483_v36 = vadd.f32 %v6200_v2, %v3482_v14  ;;  %3705 = vxpose.xlu0.b32.cont [13/16] (narrow) %v3591_v6, 8 }
 0x724   : > { %v3524_v18 = vmul.f32 %v6214_v42, %v3483_v36 }
 0x726   : > { %v3560_v3 = vadd.f32 %v6223_v50, %v3524_v18 }
 0x728   : > { %3640 = vxpose.xlu1.b32.cont [14/16] (narrow) %v3560_v3, 8  ;;  %v3592_v13 = vadd.f32 %v3560_v3, %v6690_v59 }
 0x729   : > { %v3485_v5 = vpop.f32.mrf.mxu3 }
 0x72a   : > { %v3486_v55 = vadd.f32 %v6200_v2, %v3485_v5  ;;  %3706 = vxpose.xlu0.b32.cont [14/16] (narrow) %v3592_v13, 8 }
 0x72c   : > { %v3525_v7 = vmul.f32 %v6214_v42, %v3486_v55 }
 0x72e   : > { %v3561_v25 = vadd.f32 %v6223_v50, %v3525_v7 }
 0x730   : > { %3641 = vxpose.xlu1.b32.cont [15/16] (narrow) %v3561_v25, 8  ;;  %v3593_v39 = vadd.f32 %v3561_v25, %v6691_v49 }
 0x731   : > { %v3488_v32 = vpop.f32.mrf.mxu3 }
 0x732   : > { %v3489_v24 = vadd.f32 %v6200_v2, %v3488_v32  ;;  %3707 = vxpose.xlu0.b32.cont [15/16] (narrow) %v3593_v39, 8 }
 0x734   : > { %v3526_v34 = vmul.f32 %v6214_v42, %v3489_v24 }
 0x736   : > { %v3562_v29 = vadd.f32 %v6223_v50, %v3526_v34 }
 0x738   : > { %3642 = vxpose.xlu1.b32.end [16/16] (narrow) %v3562_v29, 8  ;;  %v3594_v44 = vadd.f32 %v3562_v29, %v6692_v46 }
 0x73a   : > { %3708 = vxpose.xlu0.b32.end [16/16] (narrow) %v3594_v44, 8 }
 0x764   : > { %v3643_v2 = vpop.trf.xlu1 }
 0x765   : > { %3660 = vst [vmem:[%s6506_s22 + $0x8] sm:$0xff] %v3643_v2 }
 0x766   : > { %v3709_v42 = vpop.trf.xlu0 }
 0x767   : > { %4498 = shalt.err (!%p4495_p1)
}
 0x768   : > { %4099 = dma.vmem_to_hbm [thread:$0]  (%p4685_p11), %s3770_s17, 256, %s3772_s25, %s3738_s21   ;;  %3726 = vst [vmem:[%s6511_s26 + $0x8] sm:$0xff] %v3709_v42 }
 0x769   : > { %s3728_s22 = scalar_lea.sflag [#allocation4], %s4751_s12  ;;  %s4513_s20 = sshra.s32 %s6540_s13, 4  ;;  %s4514_s20 = int_to_ptr.hbm [resolvable:$true] %s4513_s20 }
 0x76a   : > { %s4515_s29 = scalar_lea.hbm %s4514_s20, 16  ;;  %s4519_s14 = scalar_lea.hbm %s6595_s9, 32 }
 0x76b   : > { %p4516_p4 = scmp.ne.s32.totalorder %s4514_s20, %s4515_s29  ;;  %p4520_p8 = scmp.lt.s32.totalorder %s4514_s20, %s6595_s9 }
 0x76c   : > { %p4521_p6 = scmp.lt.s32.totalorder %s4519_s14, %s4515_s29 }
 0x76d   : > { %p4517_p7 = pnand %p4516_p4, %p4685_p11 }
 0x76e   : > { %p4522_p13 = por %p4521_p6, %p4520_p8 }
 0x76f   : > { %p4518_p5 = pneg %p4517_p7 }
 0x771   : > { %p4523_p3 = pnand %p4522_p13, %p4518_p5 }
 0x773   : > { %4526 = shalt.err (!%p4523_p3)
}
 0x774   : > { %4098 = dma.vmem_to_hbm [thread:$0]  (%p4685_p11), %s6537_s15, 256, %s6540_s13, %s3728_s22  }
 0x775 PF: > { %s6694_s12 = sld [smem:[#allocation14_spill]] }
 0x776   : > { %s6696_s17 = sld [smem:[#allocation16_spill]] }
 0x77b   : > { %s3783_s25 = sand.u32 1, %s6694_s12  }
 0x77c   : > { %p6697_p10 = scmp.ge.s32.totalorder %s6696_s17, 2  ;;  %s3784_s21 = scalar_lea.sflag [#allocation4], %s3783_s25 }
 0x77e   : > { %p4110_p2 = pnand %p6697_p10, %p4689_p12 }
 0x780   : > { %p4111_p9 = pneg %p4110_p2 }
 0x782   : > { %4552 = dma.done.wait (%p4111_p9), %s3784_s21, 256  }
 0x783   : > { %4554 = vsyncadd (%p4111_p9), %s3784_s21, 4294967040  ;;  %s3802_s30 = scalar_lea.sflag [#allocation9], %s3783_s25 }
 0x784   : > { %4556 = dma.done.wait (%p4111_p9), %s3802_s30, 256  }
 0x785   : > { %4558 = vsyncadd (%p4111_p9), %s3802_s30, 4294967040  ;;  %s6698_s20 = sld [smem:[#allocation17_spill]]  ;;  %s6701_s17 = smov %s4565_s18 }
 0x786   : > { %s6699_s23 = sld [smem:[#allocation15_spill]] }
 0x787   : > { %s6700_s19 = sld [smem:[#allocation18_spill]] }
 0x78b   : > { %p31_p11 = scmp.ge.s32.totalorder %s6698_s20, 4  }
 0x78c   : > { %s6702_s18 = smov %s6699_s23 }
 0x78d   :  { %33 = sbr.rel (!%p31_p11) target bundleno = 11 (0xb), region = 146 }
 0x792   :  { %3808 = vsyncpa [#allocation3], 1 }
 0x793   :  { %3810 = vsyncpa [#allocation3 + $0x1], 1 }
 0x794   :  { %3811 = vsyncpa [#allocation6], 1 }
 0x795   :  { %3813 = vsyncpa [#allocation6 + $0x1], 1 }
 0x796   :  { %3814 = vsyncpa [#allocation4], 1 }
 0x797   :  { %3816 = vsyncpa [#allocation4 + $0x1], 1 }
 0x798   :  { %3817 = vsyncpa [#allocation9], 1 }
 0x799   :  { %3819 = vsyncpa [#allocation9 + $0x1], 1 }

</bundles_post_ra>
